<compile_context>
chip_gen: v5e
topology: v5e:2x2
jax: 0.10.0
libtpu: 0.0.40
codegen_flags: <defaults>
</compile_context>

<pallas_src>
import math
import functools

import jax
import jax.numpy as jnp
from jax.experimental import pallas as pl
from jax.experimental.pallas import tpu as pltpu


# ----------------------------------------------------------------------------
# Fused CoBiMambaLayer kernel
# ----------------------------------------------------------------------------

def _silu(v):
    # v * sigmoid(v); reciprocal goes to the EUP slot (approx), not a VPU divide.
    return v * pl.reciprocal(1.0 + jnp.exp(-v), approx=True)


def _softplus(v):
    # torch.nn.functional.softplus (beta=1, threshold=20)
    return jnp.where(v > 20.0, v, jnp.log(1.0 + jnp.exp(jnp.minimum(v, 20.0))))


def _cobimamba_kernel(x_ref, w_in_ref, conv_w_ref, conv_b_ref, w_dt_ref,
                      dt_b_ref, wb_ref, wc_ref, a_ref, d_skip_ref,
                      w_out_ref, ln_w_ref, ln_b_ref, o_ref, y_scr,
                      *, batch, seq_len, d_inner, d_state, d_conv):
    f32, bf16 = jnp.float32, jnp.bfloat16
    B, T, S, din = batch, seq_len, d_state, d_inner
    M = B * T                      # rows, time-major: row = t*B + b
    L = M * S                      # state-expanded rows: (t*B + b)*S + s

    x = x_ref[...]                 # (M, D) f32 residual input
    conv_b = conv_b_ref[...]       # (1, din)
    dt_b = dt_b_ref[...]           # (1, din)
    d_skip = d_skip_ref[...]       # (1, din)
    ln_w = ln_w_ref[...]           # (1, D)
    ln_b = ln_b_ref[...]           # (1, D)

    # ---- in_proj: one bf16 MXU matmul over all B*T rows, f32 accumulate ----
    xz = jnp.dot(x.astype(bf16), w_in_ref[...], preferred_element_type=f32)
    xi, z = xz[:, :din], xz[:, din:]                        # (M, din) each

    # ---- depthwise causal conv: sublane roll + iota mask (XLU/VPU, no MXU) -
    row = jax.lax.broadcasted_iota(jnp.int32, (M, 1), 0)    # time-major row id
    acc = conv_b
    for k in range(d_conv):
        off = d_conv - 1 - k                                # tap looks back `off` steps
        w_k = conv_w_ref[k:k + 1, :]                        # (1, din)
        if off == 0:
            tap = xi
        else:
            # shift by off timesteps == off*B rows; zero rows with t < off
            tap = jnp.where(row >= off * B,
                            pltpu.roll(xi, shift=off * B, axis=0), 0.0)
        acc = acc + w_k * tap
    xc = _silu(acc)                                         # (M, din) f32

    # ---- dt = softplus(xc @ (x_proj_dt . dt_proj) + bias); f32 operands so
    #      the exp() input inside the scan stays accurate --------------------
    dt = _softplus(jnp.dot(xc, w_dt_ref[...], preferred_element_type=f32) + dt_b)
    du = dt * xc                                            # (M, din)

    # ---- selective scan, batch folded into the state h = (B*S, din) --------
    # Sublane broadcasts instead of replication matmuls; both reshapes keep the
    # trailing (S, din) = (16, 256) block tile-aligned, so they are cheap.
    def rows_rep(v):      # (M, din) -> (L, din): every row repeated S times
        return jnp.broadcast_to(v.reshape(M, 1, din), (M, S, din)).reshape(L, din)

    def block_tile(w):    # (S, din) -> (L, din): whole (S, din) block tiled M times
        return jnp.broadcast_to(w.reshape(1, S, din), (M, S, din)).reshape(L, din)

    xc_rep = rows_rep(xc)
    b_col = jnp.sum(xc_rep * block_tile(wb_ref[...]), axis=-1, keepdims=True)  # (L,1)
    c_col = jnp.sum(xc_rep * block_tile(wc_ref[...]), axis=-1, keepdims=True)  # (L,1)
    dA = jnp.exp(rows_rep(dt) * block_tile(a_ref[...]))     # (L, din) one EUP pass
    dBu = b_col * rows_rep(du)                              # (L, din)
    # TODO(synk): for long sequences (T >= ~256) chunk the (L, din) hoists and
    # the loop below over T-blocks so the live set stays small on v7x (64 MiB VMEM).

    h = jnp.zeros((B * S, din), f32)
    for t in range(T):                 # only the recurrence itself is serial
        blk = slice(t * B * S, (t + 1) * B * S)
        h = dA[blk] * h + dBu[blk]                          # (B*S, din)
        ch = c_col[blk] * h
        for b in range(B):             # y[t,b,:] = sum_s C[t,b,s] * h[b,s,:]
            y_scr[t * B + b:t * B + b + 1, :] = jnp.sum(
                ch[b * S:(b + 1) * S, :], axis=0, keepdims=True)

    y = y_scr[...] + d_skip * xc                            # D-skip
    y = y * _silu(z)                                        # gate with SiLU(z)

    # ---- out_proj (bf16 MXU) + LayerNorm(eps=1e-6) + residual, dense store --
    out = jnp.dot(y.astype(bf16), w_out_ref[...], preferred_element_type=f32)
    mu = jnp.mean(out, axis=-1, keepdims=True)
    ctr = out - mu
    var = jnp.mean(ctr * ctr, axis=-1, keepdims=True)
    o_ref[...] = x + (ctr * jax.lax.rsqrt(var + 1e-6)) * ln_w + ln_b


# ----------------------------------------------------------------------------
# Parameter packing (done once) and the layer wrapper
# ----------------------------------------------------------------------------

def pack_cobimamba_params(params):
    """Pre-transpose / pre-combine / stack the (g, r) stream weights once."""
    f32, bf16 = jnp.float32, jnp.bfloat16

    def prep(mp, ln_w, ln_b):
        din, S, dtr = mp["d_inner"], mp["d_state"], mp["dt_rank"]
        x_proj = mp["x_proj_w"]                                   # (dtr + 2S, din)
        # dt_proj folded into x_proj's dt rows; kept f32 (feeds softplus/exp).
        w_dt = jnp.transpose(x_proj[:dtr]) @ jnp.transpose(mp["dt_proj_w"])
        return [
            jnp.transpose(mp["in_proj_w"]).astype(bf16),          # (D, 2*din)
            jnp.transpose(mp["conv_w"]).astype(f32),              # (dc, din)
            mp["conv_b"].reshape(1, din).astype(f32),
            w_dt.astype(f32),                                     # (din, din)
            mp["dt_proj_b"].reshape(1, din).astype(f32),
            x_proj[dtr:dtr + S].astype(f32),                      # (S, din)  B proj
            x_proj[dtr + S:].astype(f32),                         # (S, din)  C proj
            jnp.transpose(-jnp.exp(mp["A_log"])).astype(f32),     # (S, din)
            mp["D"].reshape(1, din).astype(f32),
            jnp.transpose(mp["out_proj_w"]).astype(bf16),         # (din, D)
            ln_w.reshape(1, -1).astype(f32),
            ln_b.reshape(1, -1).astype(f32),
        ]

    g_ops = prep(params["mamba_g"], params["norm1_w"], params["norm1_b"])
    r_ops = prep(params["mamba_r"], params["norm2_w"], params["norm2_b"])
    packed = [jnp.stack([a, b], axis=0) for a, b in zip(g_ops, r_ops)]
    dims = dict(d_inner=params["mamba_g"]["d_inner"],
                d_state=params["mamba_g"]["d_state"],
                d_conv=params["mamba_g"]["d_conv"])
    return packed, dims


def _stream_spec(arr):
    n_rest = arr.ndim - 1

    def idx(s):
        return (s,) + (0,) * n_rest

    return pl.BlockSpec((None,) + tuple(arr.shape[1:]), idx)


def cobimamba_layer(g, r, packed, dims):
    """g, r: (B, T, d_model) -> (g_out, r_out), matching CoBiMambaLayer.forward."""
    B, T, D = g.shape
    M = B * T
    din, S, dconv = dims["d_inner"], dims["d_state"], dims["d_conv"]

    def to_tm(x):        # (B, T, D) -> (T*B, D), time-major rows (t*B + b)
        return jnp.transpose(x, (1, 0, 2)).reshape(M, D)

    xs = jnp.stack([to_tm(g), to_tm(r)], axis=0).astype(jnp.float32)

    kernel = functools.partial(_cobimamba_kernel, batch=B, seq_len=T,
                               d_inner=din, d_state=S, d_conv=dconv)

    out = pl.pallas_call(
        kernel,
        out_shape=jax.ShapeDtypeStruct((2, M, D), jnp.float32),
        grid=(2,),                                     # one grid step per stream
        in_specs=[_stream_spec(xs)] + [_stream_spec(a) for a in packed],
        out_specs=pl.BlockSpec((None, M, D), lambda s: (s, 0, 0)),
        scratch_shapes=[pltpu.VMEM((M, din), jnp.float32)],   # per-timestep y rows
        compiler_params=pltpu.CompilerParams(
            # TODO(synk): on v7x switch to pltpu.CORE_PARALLEL (or pl.core_map
            # over a 2-TensorCore mesh) to pin one stream per core; plain
            # "parallel" is the portable choice for v5e/v6e (single TC).
            dimension_semantics=("parallel",),
            vmem_limit_bytes=8 * 1024 * 1024),         # measured footprint ~4 MiB
    )(xs, *packed)

    def from_tm(y):      # (T*B, D) -> (B, T, D)
        return jnp.transpose(y.reshape(T, B, D), (1, 0, 2))

    return from_tm(out[0]), from_tm(out[1])


# ----------------------------------------------------------------------------
# Deterministic parameter initialization (PyTorch layouts)
# ----------------------------------------------------------------------------

def init_mamba_params(key, d_model, d_state=16, d_conv=4, expand=1):
    d_inner = expand * d_model
    dt_rank = math.ceil(d_model / 16)
    ks = jax.random.split(key, 7)

    def nrm(k, shape, s):
        return s * jax.random.normal(k, shape, jnp.float32)

    return {
        "d_inner": d_inner, "d_state": d_state, "d_conv": d_conv, "dt_rank": dt_rank,
        "in_proj_w": nrm(ks[0], (2 * d_inner, d_model), 0.05),
        "conv_w": nrm(ks[1], (d_inner, d_conv), 0.5),
        "conv_b": nrm(ks[2], (d_inner,), 0.1),
        "x_proj_w": nrm(ks[3], (dt_rank + 2 * d_state, d_inner), 0.05),
        "dt_proj_w": nrm(ks[4], (d_inner, dt_rank), 0.05),
        "dt_proj_b": nrm(ks[5], (d_inner,), 0.05),
        "A_log": jnp.log(jnp.broadcast_to(
            jnp.arange(1, d_state + 1, dtype=jnp.float32), (d_inner, d_state))),
        "D": jnp.ones((d_inner,), jnp.float32),
        "out_proj_w": nrm(ks[6], (d_model, d_inner), 0.05),
    }


def init_cobimamba_params(key, d_model, d_state=16, d_conv=4, expand=1):
    kg, kr = jax.random.split(key)
    return {
        "mamba_g": init_mamba_params(kg, d_model, d_state, d_conv, expand),
        "mamba_r": init_mamba_params(kr, d_model, d_state, d_conv, expand),
        "norm1_w": jnp.ones((d_model,), jnp.float32),
        "norm1_b": jnp.zeros((d_model,), jnp.float32),
        "norm2_w": jnp.ones((d_model,), jnp.float32),
        "norm2_b": jnp.zeros((d_model,), jnp.float32),
    }


# ----------------------------------------------------------------------------
# Pure-JAX f32 reference (unfused) for a correctness cross-check
# ----------------------------------------------------------------------------

def _mamba_ref(x, mp):
    B, T, _ = x.shape
    din, S, dc, dtr = mp["d_inner"], mp["d_state"], mp["d_conv"], mp["dt_rank"]
    xz = jnp.einsum("btd,ed->bte", x, mp["in_proj_w"])
    xi, z = xz[..., :din], xz[..., din:]
    xpad = jnp.pad(xi, ((0, 0), (dc - 1, 0), (0, 0)))
    xc = mp["conv_b"][None, None, :]
    for k in range(dc):
        xc = xc + mp["conv_w"][:, k][None, None, :] * xpad[:, k:k + T, :]
    xc = xc * jax.nn.sigmoid(xc)
    xdbl = jnp.einsum("btd,ed->bte", xc, mp["x_proj_w"])
    dt = jax.nn.softplus(
        jnp.einsum("btr,dr->btd", xdbl[..., :dtr], mp["dt_proj_w"]) + mp["dt_proj_b"])
    Bm, Cm = xdbl[..., dtr:dtr + S], xdbl[..., dtr + S:]
    A = -jnp.exp(mp["A_log"])                                    # (din, S)

    def scan_one(xc_b, dt_b, B_b, C_b):
        def step(h, inp):
            xct, dtt, Bt, Ct = inp
            h = jnp.exp(dtt[:, None] * A) * h + (dtt * xct)[:, None] * Bt[None, :]
            return h, jnp.sum(h * Ct[None, :], axis=-1)
        _, ys = jax.lax.scan(step, jnp.zeros((din, S), jnp.float32),
                             (xc_b, dt_b, B_b, C_b))
        return ys

    y = jax.vmap(scan_one)(xc, dt, Bm, Cm) + xc * mp["D"][None, None, :]
    y = y * (z * jax.nn.sigmoid(z))
    return jnp.einsum("btd,ed->bte", y, mp["out_proj_w"])


def _layernorm(v, w, b, eps=1e-6):
    mu = jnp.mean(v, axis=-1, keepdims=True)
    var = jnp.mean((v - mu) ** 2, axis=-1, keepdims=True)
    return (v - mu) * jax.lax.rsqrt(var + eps) * w + b


def cobimamba_ref(g, r, p):
    g_out = g + _layernorm(_mamba_ref(g, p["mamba_g"]), p["norm1_w"], p["norm1_b"])
    r_out = r + _layernorm(_mamba_ref(r, p["mamba_r"]), p["norm2_w"], p["norm2_b"])
    return g_out, r_out


# ----------------------------------------------------------------------------
# Main
# ----------------------------------------------------------------------------

if __name__ == "__main__":
    key = jax.random.PRNGKey(0)
    kg, kr, kp = jax.random.split(key, 3)
    B, T, D_MODEL = 2, 8, 256
    g = jax.random.normal(kg, (B, T, D_MODEL), jnp.float32)
    r = jax.random.normal(kr, (B, T, D_MODEL), jnp.float32)
    params = init_cobimamba_params(kp, D_MODEL)

    packed, dims = pack_cobimamba_params(params)
    g_out, r_out = cobimamba_layer(g, r, packed, dims)
    (g_out, r_out) = jax.block_until_ready((g_out, r_out))

    assert g_out.shape == (B, T, D_MODEL), g_out.shape
    assert r_out.shape == (B, T, D_MODEL), r_out.shape
    assert bool(jnp.all(jnp.isfinite(g_out))) and bool(jnp.all(jnp.isfinite(r_out)))

    # Cross-check against the unfused pure-JAX f32 reference.  Tolerance is
    # tighter than before (f32 dt weight, exact roll/mask/broadcast selection);
    # remaining error is the bf16 in_proj / out_proj MXU operands.
    g_ref, r_ref = cobimamba_ref(g, r, params)
    assert bool(jnp.allclose(g_out, g_ref, atol=0.08, rtol=0.05)), \
        float(jnp.max(jnp.abs(g_out - g_ref)))
    assert bool(jnp.allclose(r_out, r_ref, atol=0.08, rtol=0.05)), \
        float(jnp.max(jnp.abs(r_out - r_ref)))

    print("KERNEL_OK")
</pallas_src>

<mosaic_0001>
module attributes {stable_mosaic.version = 11 : i64} {
  func.func @_cobimamba_kernel(%arg0: i32, %arg1: memref<1x16x256xf32, #tpu.memory_space<vmem>>, %arg2: memref<1x256x512xbf16, #tpu.memory_space<vmem>>, %arg3: memref<1x4x256xf32, #tpu.memory_space<vmem>>, %arg4: memref<1x1x256xf32, #tpu.memory_space<vmem>>, %arg5: memref<1x256x256xf32, #tpu.memory_space<vmem>>, %arg6: memref<1x1x256xf32, #tpu.memory_space<vmem>>, %arg7: memref<1x16x256xf32, #tpu.memory_space<vmem>>, %arg8: memref<1x16x256xf32, #tpu.memory_space<vmem>>, %arg9: memref<1x16x256xf32, #tpu.memory_space<vmem>>, %arg10: memref<1x1x256xf32, #tpu.memory_space<vmem>>, %arg11: memref<1x256x256xbf16, #tpu.memory_space<vmem>>, %arg12: memref<1x1x256xf32, #tpu.memory_space<vmem>>, %arg13: memref<1x1x256xf32, #tpu.memory_space<vmem>>, %arg14: memref<1x16x256xf32, #tpu.memory_space<vmem>>, %arg15: memref<16x256xf32, #tpu.memory_space<vmem>>) attributes {dimension_semantics = [#tpu.dimension_semantics<parallel>], iteration_bounds = array<i64: 2>, scalar_prefetch = 0 : i64, scratch_operands = 1 : i64, tpu.core_type = #tpu.core_type<tc>, window_params = [{transform_indices = @transform_0, window_bounds = array<i64: 1, 16, 256>}, {transform_indices = @transform_1, window_bounds = array<i64: 1, 256, 512>}, {transform_indices = @transform_2, window_bounds = array<i64: 1, 4, 256>}, {transform_indices = @transform_3, window_bounds = array<i64: 1, 1, 256>}, {transform_indices = @transform_4, window_bounds = array<i64: 1, 256, 256>}, {transform_indices = @transform_5, window_bounds = array<i64: 1, 1, 256>}, {transform_indices = @transform_6, window_bounds = array<i64: 1, 16, 256>}, {transform_indices = @transform_7, window_bounds = array<i64: 1, 16, 256>}, {transform_indices = @transform_8, window_bounds = array<i64: 1, 16, 256>}, {transform_indices = @transform_9, window_bounds = array<i64: 1, 1, 256>}, {transform_indices = @transform_10, window_bounds = array<i64: 1, 256, 256>}, {transform_indices = @transform_11, window_bounds = array<i64: 1, 1, 256>}, {transform_indices = @transform_12, window_bounds = array<i64: 1, 1, 256>}, {transform_indices = @transform_13, window_bounds = array<i64: 1, 16, 256>}]} {
    %c0 = arith.constant 0 : index
    %c0_0 = arith.constant 0 : index
    %c0_1 = arith.constant 0 : index
    %0 = vector.load %arg1[%c0, %c0_0, %c0_1] : memref<1x16x256xf32, #tpu.memory_space<vmem>>, vector<1x16x256xf32>
    %1 = vector.shape_cast %0 : vector<1x16x256xf32> to vector<16x256xf32>
    %c0_2 = arith.constant 0 : index
    %c0_3 = arith.constant 0 : index
    %c0_4 = arith.constant 0 : index
    %2 = vector.load %arg4[%c0_2, %c0_3, %c0_4] : memref<1x1x256xf32, #tpu.memory_space<vmem>>, vector<1x1x256xf32>
    %3 = vector.shape_cast %2 : vector<1x1x256xf32> to vector<1x256xf32>
    %c0_5 = arith.constant 0 : index
    %c0_6 = arith.constant 0 : index
    %c0_7 = arith.constant 0 : index
    %4 = vector.load %arg6[%c0_5, %c0_6, %c0_7] : memref<1x1x256xf32, #tpu.memory_space<vmem>>, vector<1x1x256xf32>
    %5 = vector.shape_cast %4 : vector<1x1x256xf32> to vector<1x256xf32>
    %c0_8 = arith.constant 0 : index
    %c0_9 = arith.constant 0 : index
    %c0_10 = arith.constant 0 : index
    %6 = vector.load %arg10[%c0_8, %c0_9, %c0_10] : memref<1x1x256xf32, #tpu.memory_space<vmem>>, vector<1x1x256xf32>
    %7 = vector.shape_cast %6 : vector<1x1x256xf32> to vector<1x256xf32>
    %c0_11 = arith.constant 0 : index
    %c0_12 = arith.constant 0 : index
    %c0_13 = arith.constant 0 : index
    %8 = vector.load %arg12[%c0_11, %c0_12, %c0_13] : memref<1x1x256xf32, #tpu.memory_space<vmem>>, vector<1x1x256xf32>
    %9 = vector.shape_cast %8 : vector<1x1x256xf32> to vector<1x256xf32>
    %c0_14 = arith.constant 0 : index
    %c0_15 = arith.constant 0 : index
    %c0_16 = arith.constant 0 : index
    %10 = vector.load %arg13[%c0_14, %c0_15, %c0_16] : memref<1x1x256xf32, #tpu.memory_space<vmem>>, vector<1x1x256xf32>
    %11 = vector.shape_cast %10 : vector<1x1x256xf32> to vector<1x256xf32>
    %12 = arith.truncf %1 : vector<16x256xf32> to vector<16x256xbf16>
    %c0_17 = arith.constant 0 : index
    %c0_18 = arith.constant 0 : index
    %c0_19 = arith.constant 0 : index
    %13 = vector.load %arg2[%c0_17, %c0_18, %c0_19] : memref<1x256x512xbf16, #tpu.memory_space<vmem>>, vector<1x256x512xbf16>
    %14 = vector.shape_cast %13 : vector<1x256x512xbf16> to vector<256x512xbf16>
    %cst = arith.constant dense<0.000000e+00> : vector<16x512xf32>
    %15 = tpu.matmul %12, %14, %cst {dimension_numbers = #tpu.dot_dimension_numbers<[1], [0], [0], [1], [0, 0, 1, 1], [], []>} : vector<16x256xbf16>, vector<256x512xbf16>, vector<16x512xf32> -> vector<16x512xf32>
    %16 = vector.extract_strided_slice %15 {offsets = [0, 0], sizes = [16, 256], strides = [1, 1]} : vector<16x512xf32> to vector<16x256xf32>
    %17 = vector.extract_strided_slice %15 {offsets = [0, 256], sizes = [16, 256], strides = [1, 1]} : vector<16x512xf32> to vector<16x256xf32>
    %18 = tpu.iota {dimensions = array<i32: 0>} : vector<16x1xi32>
    %c0_20 = arith.constant 0 : index
    %c0_21 = arith.constant 0 : index
    %c0_22 = arith.constant 0 : index
    %19 = vector.load %arg3[%c0_20, %c0_21, %c0_22] : memref<1x4x256xf32, #tpu.memory_space<vmem>>, vector<1x1x256xf32>
    %20 = vector.shape_cast %19 : vector<1x1x256xf32> to vector<1x256xf32>
    %c6_i32 = arith.constant 6 : i32
    %21 = vector.broadcast %c6_i32 : i32 to vector<16x1xi32>
    %22 = arith.cmpi sge, %18, %21 : vector<16x1xi32>
    %c6_i32_23 = arith.constant 6 : i32
    %23 = tpu.dynamic_rotate %16 by %c6_i32_23 dim 0 : vector<16x256xf32>, i32 -> vector<16x256xf32>
    %cst_24 = arith.constant 0.000000e+00 : f32
    %24 = vector.shape_cast %22 : vector<16x1xi1> to vector<16x1xi1>
    %25 = vector.broadcast %24 : vector<16x1xi1> to vector<16x256xi1>
    %26 = vector.broadcast %cst_24 : f32 to vector<16x256xf32>
    %27 = arith.select %25, %23, %26 : vector<16x256xi1>, vector<16x256xf32>
    %28 = vector.broadcast %20 : vector<1x256xf32> to vector<16x256xf32>
    %29 = arith.mulf %28, %27 : vector<16x256xf32>
    %30 = vector.broadcast %3 : vector<1x256xf32> to vector<16x256xf32>
    %31 = arith.addf %30, %29 : vector<16x256xf32>
    %c0_25 = arith.constant 0 : index
    %c1 = arith.constant 1 : index
    %c0_26 = arith.constant 0 : index
    %32 = vector.load %arg3[%c0_25, %c1, %c0_26] : memref<1x4x256xf32, #tpu.memory_space<vmem>>, vector<1x1x256xf32>
    %33 = vector.shape_cast %32 : vector<1x1x256xf32> to vector<1x256xf32>
    %c4_i32 = arith.constant 4 : i32
    %34 = vector.broadcast %c4_i32 : i32 to vector<16x1xi32>
    %35 = arith.cmpi sge, %18, %34 : vector<16x1xi32>
    %c4_i32_27 = arith.constant 4 : i32
    %36 = tpu.dynamic_rotate %16 by %c4_i32_27 dim 0 : vector<16x256xf32>, i32 -> vector<16x256xf32>
    %cst_28 = arith.constant 0.000000e+00 : f32
    %37 = vector.shape_cast %35 : vector<16x1xi1> to vector<16x1xi1>
    %38 = vector.broadcast %37 : vector<16x1xi1> to vector<16x256xi1>
    %39 = vector.broadcast %cst_28 : f32 to vector<16x256xf32>
    %40 = arith.select %38, %36, %39 : vector<16x256xi1>, vector<16x256xf32>
    %41 = vector.broadcast %33 : vector<1x256xf32> to vector<16x256xf32>
    %42 = arith.mulf %41, %40 : vector<16x256xf32>
    %43 = arith.addf %31, %42 : vector<16x256xf32>
    %c0_29 = arith.constant 0 : index
    %c2 = arith.constant 2 : index
    %c0_30 = arith.constant 0 : index
    %44 = vector.load %arg3[%c0_29, %c2, %c0_30] : memref<1x4x256xf32, #tpu.memory_space<vmem>>, vector<1x1x256xf32>
    %45 = vector.shape_cast %44 : vector<1x1x256xf32> to vector<1x256xf32>
    %c2_i32 = arith.constant 2 : i32
    %46 = vector.broadcast %c2_i32 : i32 to vector<16x1xi32>
    %47 = arith.cmpi sge, %18, %46 : vector<16x1xi32>
    %c2_i32_31 = arith.constant 2 : i32
    %48 = tpu.dynamic_rotate %16 by %c2_i32_31 dim 0 : vector<16x256xf32>, i32 -> vector<16x256xf32>
    %cst_32 = arith.constant 0.000000e+00 : f32
    %49 = vector.shape_cast %47 : vector<16x1xi1> to vector<16x1xi1>
    %50 = vector.broadcast %49 : vector<16x1xi1> to vector<16x256xi1>
    %51 = vector.broadcast %cst_32 : f32 to vector<16x256xf32>
    %52 = arith.select %50, %48, %51 : vector<16x256xi1>, vector<16x256xf32>
    %53 = vector.broadcast %45 : vector<1x256xf32> to vector<16x256xf32>
    %54 = arith.mulf %53, %52 : vector<16x256xf32>
    %55 = arith.addf %43, %54 : vector<16x256xf32>
    %c0_33 = arith.constant 0 : index
    %c3 = arith.constant 3 : index
    %c0_34 = arith.constant 0 : index
    %56 = vector.load %arg3[%c0_33, %c3, %c0_34] : memref<1x4x256xf32, #tpu.memory_space<vmem>>, vector<1x1x256xf32>
    %57 = vector.shape_cast %56 : vector<1x1x256xf32> to vector<1x256xf32>
    %58 = vector.broadcast %57 : vector<1x256xf32> to vector<16x256xf32>
    %59 = arith.mulf %58, %16 : vector<16x256xf32>
    %60 = arith.addf %55, %59 : vector<16x256xf32>
    %cst_35 = arith.constant 0.000000e+00 : f32
    %61 = vector.broadcast %cst_35 : f32 to vector<16x256xf32>
    %62 = arith.subf %61, %60 : vector<16x256xf32>
    %63 = math.exp %62 : vector<16x256xf32>
    %cst_36 = arith.constant 1.000000e+00 : f32
    %64 = vector.broadcast %cst_36 : f32 to vector<16x256xf32>
    %65 = arith.addf %64, %63 : vector<16x256xf32>
    %66 = tpu.reciprocal %65 {approx = true} : vector<16x256xf32> -> vector<16x256xf32>
    %67 = arith.mulf %60, %66 : vector<16x256xf32>
    %c0_37 = arith.constant 0 : index
    %c0_38 = arith.constant 0 : index
    %c0_39 = arith.constant 0 : index
    %68 = vector.load %arg5[%c0_37, %c0_38, %c0_39] : memref<1x256x256xf32, #tpu.memory_space<vmem>>, vector<1x256x256xf32>
    %69 = vector.shape_cast %68 : vector<1x256x256xf32> to vector<256x256xf32>
    %cst_40 = arith.constant dense<0.000000e+00> : vector<16x256xf32>
    %70 = tpu.matmul %67, %69, %cst_40 {dimension_numbers = #tpu.dot_dimension_numbers<[1], [0], [0], [1], [0, 0, 1, 1], [], []>} : vector<16x256xf32>, vector<256x256xf32>, vector<16x256xf32> -> vector<16x256xf32>
    %71 = vector.broadcast %5 : vector<1x256xf32> to vector<16x256xf32>
    %72 = arith.addf %70, %71 : vector<16x256xf32>
    %cst_41 = arith.constant 2.000000e+01 : f32
    %73 = vector.broadcast %cst_41 : f32 to vector<16x256xf32>
    %74 = arith.cmpf ogt, %72, %73 : vector<16x256xf32>
    %cst_42 = arith.constant 2.000000e+01 : f32
    %75 = vector.broadcast %cst_42 : f32 to vector<16x256xf32>
    %76 = arith.minimumf %72, %75 : vector<16x256xf32>
    %77 = math.exp %76 : vector<16x256xf32>
    %cst_43 = arith.constant 1.000000e+00 : f32
    %78 = vector.broadcast %cst_43 : f32 to vector<16x256xf32>
    %79 = arith.addf %78, %77 : vector<16x256xf32>
    %80 = math.log %79 : vector<16x256xf32>
    %81 = arith.select %74, %72, %80 : vector<16x256xi1>, vector<16x256xf32>
    %82 = arith.mulf %81, %67 : vector<16x256xf32>
    %83 = vector.shape_cast %67 : vector<16x256xf32> to vector<16x1x256xf32>
    %84 = vector.shape_cast %83 : vector<16x1x256xf32> to vector<16x1x256xf32>
    %85 = vector.broadcast %84 : vector<16x1x256xf32> to vector<16x16x256xf32>
    %86 = vector.shape_cast %85 : vector<16x16x256xf32> to vector<256x256xf32>
    %c0_44 = arith.constant 0 : index
    %c0_45 = arith.constant 0 : index
    %c0_46 = arith.constant 0 : index
    %87 = vector.load %arg7[%c0_44, %c0_45, %c0_46] : memref<1x16x256xf32, #tpu.memory_space<vmem>>, vector<1x16x256xf32>
    %88 = vector.shape_cast %87 : vector<1x16x256xf32> to vector<16x256xf32>
    %89 = vector.shape_cast %88 : vector<16x256xf32> to vector<1x16x256xf32>
    %90 = vector.shape_cast %89 : vector<1x16x256xf32> to vector<1x16x256xf32>
    %91 = vector.broadcast %90 : vector<1x16x256xf32> to vector<16x16x256xf32>
    %92 = vector.shape_cast %91 : vector<16x16x256xf32> to vector<256x256xf32>
    %93 = arith.mulf %86, %92 : vector<256x256xf32>
    %cst_47 = arith.constant dense<0.000000e+00> : vector<256xf32>
    %94 = vector.multi_reduction <add>, %93, %cst_47 [1] : vector<256x256xf32> to vector<256xf32>
    %95 = vector.shape_cast %94 : vector<256xf32> to vector<256x1xf32>
    %c0_48 = arith.constant 0 : index
    %c0_49 = arith.constant 0 : index
    %c0_50 = arith.constant 0 : index
    %96 = vector.load %arg8[%c0_48, %c0_49, %c0_50] : memref<1x16x256xf32, #tpu.memory_space<vmem>>, vector<1x16x256xf32>
    %97 = vector.shape_cast %96 : vector<1x16x256xf32> to vector<16x256xf32>
    %98 = vector.shape_cast %97 : vector<16x256xf32> to vector<1x16x256xf32>
    %99 = vector.shape_cast %98 : vector<1x16x256xf32> to vector<1x16x256xf32>
    %100 = vector.broadcast %99 : vector<1x16x256xf32> to vector<16x16x256xf32>
    %101 = vector.shape_cast %100 : vector<16x16x256xf32> to vector<256x256xf32>
    %102 = arith.mulf %86, %101 : vector<256x256xf32>
    %cst_51 = arith.constant dense<0.000000e+00> : vector<256xf32>
    %103 = vector.multi_reduction <add>, %102, %cst_51 [1] : vector<256x256xf32> to vector<256xf32>
    %104 = vector.shape_cast %103 : vector<256xf32> to vector<256x1xf32>
    %105 = vector.shape_cast %81 : vector<16x256xf32> to vector<16x1x256xf32>
    %106 = vector.shape_cast %105 : vector<16x1x256xf32> to vector<16x1x256xf32>
    %107 = vector.broadcast %106 : vector<16x1x256xf32> to vector<16x16x256xf32>
    %108 = vector.shape_cast %107 : vector<16x16x256xf32> to vector<256x256xf32>
    %c0_52 = arith.constant 0 : index
    %c0_53 = arith.constant 0 : index
    %c0_54 = arith.constant 0 : index
    %109 = vector.load %arg9[%c0_52, %c0_53, %c0_54] : memref<1x16x256xf32, #tpu.memory_space<vmem>>, vector<1x16x256xf32>
    %110 = vector.shape_cast %109 : vector<1x16x256xf32> to vector<16x256xf32>
    %111 = vector.shape_cast %110 : vector<16x256xf32> to vector<1x16x256xf32>
    %112 = vector.shape_cast %111 : vector<1x16x256xf32> to vector<1x16x256xf32>
    %113 = vector.broadcast %112 : vector<1x16x256xf32> to vector<16x16x256xf32>
    %114 = vector.shape_cast %113 : vector<16x16x256xf32> to vector<256x256xf32>
    %115 = arith.mulf %108, %114 : vector<256x256xf32>
    %116 = math.exp %115 : vector<256x256xf32>
    %117 = vector.shape_cast %82 : vector<16x256xf32> to vector<16x1x256xf32>
    %118 = vector.shape_cast %117 : vector<16x1x256xf32> to vector<16x1x256xf32>
    %119 = vector.broadcast %118 : vector<16x1x256xf32> to vector<16x16x256xf32>
    %120 = vector.shape_cast %119 : vector<16x16x256xf32> to vector<256x256xf32>
    %121 = vector.broadcast %95 : vector<256x1xf32> to vector<256x256xf32>
    %122 = arith.mulf %121, %120 : vector<256x256xf32>
    %cst_55 = arith.constant 0.000000e+00 : f32
    %123 = vector.broadcast %cst_55 : f32 to vector<32x256xf32>
    %124 = vector.extract_strided_slice %116 {offsets = [0, 0], sizes = [32, 256], strides = [1, 1]} : vector<256x256xf32> to vector<32x256xf32>
    %125 = arith.mulf %124, %123 : vector<32x256xf32>
    %126 = vector.extract_strided_slice %122 {offsets = [0, 0], sizes = [32, 256], strides = [1, 1]} : vector<256x256xf32> to vector<32x256xf32>
    %127 = arith.addf %125, %126 : vector<32x256xf32>
    %128 = vector.extract_strided_slice %104 {offsets = [0, 0], sizes = [32, 1], strides = [1, 1]} : vector<256x1xf32> to vector<32x1xf32>
    %129 = vector.broadcast %128 : vector<32x1xf32> to vector<32x256xf32>
    %130 = arith.mulf %129, %127 : vector<32x256xf32>
    %131 = vector.extract_strided_slice %130 {offsets = [0, 0], sizes = [16, 256], strides = [1, 1]} : vector<32x256xf32> to vector<16x256xf32>
    %cst_56 = arith.constant dense<0.000000e+00> : vector<256xf32>
    %132 = vector.multi_reduction <add>, %131, %cst_56 [0] : vector<16x256xf32> to vector<256xf32>
    %133 = vector.shape_cast %132 : vector<256xf32> to vector<1x256xf32>
    %c0_57 = arith.constant 0 : index
    %c0_58 = arith.constant 0 : index
    %134 = vector.load %arg15[%c0_57, %c0_58] : memref<16x256xf32, #tpu.memory_space<vmem>>, vector<1x256xf32>
    tpu.vector_store %arg15[%c0_57, %c0_58], %133 {strides = array<i32>} : memref<16x256xf32, #tpu.memory_space<vmem>>, vector<1x256xf32>,
    %135 = vector.extract_strided_slice %130 {offsets = [16, 0], sizes = [16, 256], strides = [1, 1]} : vector<32x256xf32> to vector<16x256xf32>
    %cst_59 = arith.constant dense<0.000000e+00> : vector<256xf32>
    %136 = vector.multi_reduction <add>, %135, %cst_59 [0] : vector<16x256xf32> to vector<256xf32>
    %137 = vector.shape_cast %136 : vector<256xf32> to vector<1x256xf32>
    %c1_60 = arith.constant 1 : index
    %c0_61 = arith.constant 0 : index
    %138 = vector.load %arg15[%c1_60, %c0_61] : memref<16x256xf32, #tpu.memory_space<vmem>>, vector<1x256xf32>
    tpu.vector_store %arg15[%c1_60, %c0_61], %137 {strides = array<i32>} : memref<16x256xf32, #tpu.memory_space<vmem>>, vector<1x256xf32>,
    %139 = vector.extract_strided_slice %116 {offsets = [32, 0], sizes = [32, 256], strides = [1, 1]} : vector<256x256xf32> to vector<32x256xf32>
    %140 = arith.mulf %139, %127 : vector<32x256xf32>
    %141 = vector.extract_strided_slice %122 {offsets = [32, 0], sizes = [32, 256], strides = [1, 1]} : vector<256x256xf32> to vector<32x256xf32>
    %142 = arith.addf %140, %141 : vector<32x256xf32>
    %143 = vector.extract_strided_slice %104 {offsets = [32, 0], sizes = [32, 1], strides = [1, 1]} : vector<256x1xf32> to vector<32x1xf32>
    %144 = vector.broadcast %143 : vector<32x1xf32> to vector<32x256xf32>
    %145 = arith.mulf %144, %142 : vector<32x256xf32>
    %146 = vector.extract_strided_slice %145 {offsets = [0, 0], sizes = [16, 256], strides = [1, 1]} : vector<32x256xf32> to vector<16x256xf32>
    %cst_62 = arith.constant dense<0.000000e+00> : vector<256xf32>
    %147 = vector.multi_reduction <add>, %146, %cst_62 [0] : vector<16x256xf32> to vector<256xf32>
    %148 = vector.shape_cast %147 : vector<256xf32> to vector<1x256xf32>
    %c2_63 = arith.constant 2 : index
    %c0_64 = arith.constant 0 : index
    %149 = vector.load %arg15[%c2_63, %c0_64] : memref<16x256xf32, #tpu.memory_space<vmem>>, vector<1x256xf32>
    tpu.vector_store %arg15[%c2_63, %c0_64], %148 {strides = array<i32>} : memref<16x256xf32, #tpu.memory_space<vmem>>, vector<1x256xf32>,
    %150 = vector.extract_strided_slice %145 {offsets = [16, 0], sizes = [16, 256], strides = [1, 1]} : vector<32x256xf32> to vector<16x256xf32>
    %cst_65 = arith.constant dense<0.000000e+00> : vector<256xf32>
    %151 = vector.multi_reduction <add>, %150, %cst_65 [0] : vector<16x256xf32> to vector<256xf32>
    %152 = vector.shape_cast %151 : vector<256xf32> to vector<1x256xf32>
    %c3_66 = arith.constant 3 : index
    %c0_67 = arith.constant 0 : index
    %153 = vector.load %arg15[%c3_66, %c0_67] : memref<16x256xf32, #tpu.memory_space<vmem>>, vector<1x256xf32>
    tpu.vector_store %arg15[%c3_66, %c0_67], %152 {strides = array<i32>} : memref<16x256xf32, #tpu.memory_space<vmem>>, vector<1x256xf32>,
    %154 = vector.extract_strided_slice %116 {offsets = [64, 0], sizes = [32, 256], strides = [1, 1]} : vector<256x256xf32> to vector<32x256xf32>
    %155 = arith.mulf %154, %142 : vector<32x256xf32>
    %156 = vector.extract_strided_slice %122 {offsets = [64, 0], sizes = [32, 256], strides = [1, 1]} : vector<256x256xf32> to vector<32x256xf32>
    %157 = arith.addf %155, %156 : vector<32x256xf32>
    %158 = vector.extract_strided_slice %104 {offsets = [64, 0], sizes = [32, 1], strides = [1, 1]} : vector<256x1xf32> to vector<32x1xf32>
    %159 = vector.broadcast %158 : vector<32x1xf32> to vector<32x256xf32>
    %160 = arith.mulf %159, %157 : vector<32x256xf32>
    %161 = vector.extract_strided_slice %160 {offsets = [0, 0], sizes = [16, 256], strides = [1, 1]} : vector<32x256xf32> to vector<16x256xf32>
    %cst_68 = arith.constant dense<0.000000e+00> : vector<256xf32>
    %162 = vector.multi_reduction <add>, %161, %cst_68 [0] : vector<16x256xf32> to vector<256xf32>
    %163 = vector.shape_cast %162 : vector<256xf32> to vector<1x256xf32>
    %c4 = arith.constant 4 : index
    %c0_69 = arith.constant 0 : index
    %164 = vector.load %arg15[%c4, %c0_69] : memref<16x256xf32, #tpu.memory_space<vmem>>, vector<1x256xf32>
    tpu.vector_store %arg15[%c4, %c0_69], %163 {strides = array<i32>} : memref<16x256xf32, #tpu.memory_space<vmem>>, vector<1x256xf32>,
    %165 = vector.extract_strided_slice %160 {offsets = [16, 0], sizes = [16, 256], strides = [1, 1]} : vector<32x256xf32> to vector<16x256xf32>
    %cst_70 = arith.constant dense<0.000000e+00> : vector<256xf32>
    %166 = vector.multi_reduction <add>, %165, %cst_70 [0] : vector<16x256xf32> to vector<256xf32>
    %167 = vector.shape_cast %166 : vector<256xf32> to vector<1x256xf32>
    %c5 = arith.constant 5 : index
    %c0_71 = arith.constant 0 : index
    %168 = vector.load %arg15[%c5, %c0_71] : memref<16x256xf32, #tpu.memory_space<vmem>>, vector<1x256xf32>
    tpu.vector_store %arg15[%c5, %c0_71], %167 {strides = array<i32>} : memref<16x256xf32, #tpu.memory_space<vmem>>, vector<1x256xf32>,
    %169 = vector.extract_strided_slice %116 {offsets = [96, 0], sizes = [32, 256], strides = [1, 1]} : vector<256x256xf32> to vector<32x256xf32>
    %170 = arith.mulf %169, %157 : vector<32x256xf32>
    %171 = vector.extract_strided_slice %122 {offsets = [96, 0], sizes = [32, 256], strides = [1, 1]} : vector<256x256xf32> to vector<32x256xf32>
    %172 = arith.addf %170, %171 : vector<32x256xf32>
    %173 = vector.extract_strided_slice %104 {offsets = [96, 0], sizes = [32, 1], strides = [1, 1]} : vector<256x1xf32> to vector<32x1xf32>
    %174 = vector.broadcast %173 : vector<32x1xf32> to vector<32x256xf32>
    %175 = arith.mulf %174, %172 : vector<32x256xf32>
    %176 = vector.extract_strided_slice %175 {offsets = [0, 0], sizes = [16, 256], strides = [1, 1]} : vector<32x256xf32> to vector<16x256xf32>
    %cst_72 = arith.constant dense<0.000000e+00> : vector<256xf32>
    %177 = vector.multi_reduction <add>, %176, %cst_72 [0] : vector<16x256xf32> to vector<256xf32>
    %178 = vector.shape_cast %177 : vector<256xf32> to vector<1x256xf32>
    %c6 = arith.constant 6 : index
    %c0_73 = arith.constant 0 : index
    %179 = vector.load %arg15[%c6, %c0_73] : memref<16x256xf32, #tpu.memory_space<vmem>>, vector<1x256xf32>
    tpu.vector_store %arg15[%c6, %c0_73], %178 {strides = array<i32>} : memref<16x256xf32, #tpu.memory_space<vmem>>, vector<1x256xf32>,
    %180 = vector.extract_strided_slice %175 {offsets = [16, 0], sizes = [16, 256], strides = [1, 1]} : vector<32x256xf32> to vector<16x256xf32>
    %cst_74 = arith.constant dense<0.000000e+00> : vector<256xf32>
    %181 = vector.multi_reduction <add>, %180, %cst_74 [0] : vector<16x256xf32> to vector<256xf32>
    %182 = vector.shape_cast %181 : vector<256xf32> to vector<1x256xf32>
    %c7 = arith.constant 7 : index
    %c0_75 = arith.constant 0 : index
    %183 = vector.load %arg15[%c7, %c0_75] : memref<16x256xf32, #tpu.memory_space<vmem>>, vector<1x256xf32>
    tpu.vector_store %arg15[%c7, %c0_75], %182 {strides = array<i32>} : memref<16x256xf32, #tpu.memory_space<vmem>>, vector<1x256xf32>,
    %184 = vector.extract_strided_slice %116 {offsets = [128, 0], sizes = [32, 256], strides = [1, 1]} : vector<256x256xf32> to vector<32x256xf32>
    %185 = arith.mulf %184, %172 : vector<32x256xf32>
    %186 = vector.extract_strided_slice %122 {offsets = [128, 0], sizes = [32, 256], strides = [1, 1]} : vector<256x256xf32> to vector<32x256xf32>
    %187 = arith.addf %185, %186 : vector<32x256xf32>
    %188 = vector.extract_strided_slice %104 {offsets = [128, 0], sizes = [32, 1], strides = [1, 1]} : vector<256x1xf32> to vector<32x1xf32>
    %189 = vector.broadcast %188 : vector<32x1xf32> to vector<32x256xf32>
    %190 = arith.mulf %189, %187 : vector<32x256xf32>
    %191 = vector.extract_strided_slice %190 {offsets = [0, 0], sizes = [16, 256], strides = [1, 1]} : vector<32x256xf32> to vector<16x256xf32>
    %cst_76 = arith.constant dense<0.000000e+00> : vector<256xf32>
    %192 = vector.multi_reduction <add>, %191, %cst_76 [0] : vector<16x256xf32> to vector<256xf32>
    %193 = vector.shape_cast %192 : vector<256xf32> to vector<1x256xf32>
    %c8 = arith.constant 8 : index
    %c0_77 = arith.constant 0 : index
    %194 = vector.load %arg15[%c8, %c0_77] : memref<16x256xf32, #tpu.memory_space<vmem>>, vector<1x256xf32>
    tpu.vector_store %arg15[%c8, %c0_77], %193 {strides = array<i32>} : memref<16x256xf32, #tpu.memory_space<vmem>>, vector<1x256xf32>,
    %195 = vector.extract_strided_slice %190 {offsets = [16, 0], sizes = [16, 256], strides = [1, 1]} : vector<32x256xf32> to vector<16x256xf32>
    %cst_78 = arith.constant dense<0.000000e+00> : vector<256xf32>
    %196 = vector.multi_reduction <add>, %195, %cst_78 [0] : vector<16x256xf32> to vector<256xf32>
    %197 = vector.shape_cast %196 : vector<256xf32> to vector<1x256xf32>
    %c9 = arith.constant 9 : index
    %c0_79 = arith.constant 0 : index
    %198 = vector.load %arg15[%c9, %c0_79] : memref<16x256xf32, #tpu.memory_space<vmem>>, vector<1x256xf32>
    tpu.vector_store %arg15[%c9, %c0_79], %197 {strides = array<i32>} : memref<16x256xf32, #tpu.memory_space<vmem>>, vector<1x256xf32>,
    %199 = vector.extract_strided_slice %116 {offsets = [160, 0], sizes = [32, 256], strides = [1, 1]} : vector<256x256xf32> to vector<32x256xf32>
    %200 = arith.mulf %199, %187 : vector<32x256xf32>
    %201 = vector.extract_strided_slice %122 {offsets = [160, 0], sizes = [32, 256], strides = [1, 1]} : vector<256x256xf32> to vector<32x256xf32>
    %202 = arith.addf %200, %201 : vector<32x256xf32>
    %203 = vector.extract_strided_slice %104 {offsets = [160, 0], sizes = [32, 1], strides = [1, 1]} : vector<256x1xf32> to vector<32x1xf32>
    %204 = vector.broadcast %203 : vector<32x1xf32> to vector<32x256xf32>
    %205 = arith.mulf %204, %202 : vector<32x256xf32>
    %206 = vector.extract_strided_slice %205 {offsets = [0, 0], sizes = [16, 256], strides = [1, 1]} : vector<32x256xf32> to vector<16x256xf32>
    %cst_80 = arith.constant dense<0.000000e+00> : vector<256xf32>
    %207 = vector.multi_reduction <add>, %206, %cst_80 [0] : vector<16x256xf32> to vector<256xf32>
    %208 = vector.shape_cast %207 : vector<256xf32> to vector<1x256xf32>
    %c10 = arith.constant 10 : index
    %c0_81 = arith.constant 0 : index
    %209 = vector.load %arg15[%c10, %c0_81] : memref<16x256xf32, #tpu.memory_space<vmem>>, vector<1x256xf32>
    tpu.vector_store %arg15[%c10, %c0_81], %208 {strides = array<i32>} : memref<16x256xf32, #tpu.memory_space<vmem>>, vector<1x256xf32>,
    %210 = vector.extract_strided_slice %205 {offsets = [16, 0], sizes = [16, 256], strides = [1, 1]} : vector<32x256xf32> to vector<16x256xf32>
    %cst_82 = arith.constant dense<0.000000e+00> : vector<256xf32>
    %211 = vector.multi_reduction <add>, %210, %cst_82 [0] : vector<16x256xf32> to vector<256xf32>
    %212 = vector.shape_cast %211 : vector<256xf32> to vector<1x256xf32>
    %c11 = arith.constant 11 : index
    %c0_83 = arith.constant 0 : index
    %213 = vector.load %arg15[%c11, %c0_83] : memref<16x256xf32, #tpu.memory_space<vmem>>, vector<1x256xf32>
    tpu.vector_store %arg15[%c11, %c0_83], %212 {strides = array<i32>} : memref<16x256xf32, #tpu.memory_space<vmem>>, vector<1x256xf32>,
    %214 = vector.extract_strided_slice %116 {offsets = [192, 0], sizes = [32, 256], strides = [1, 1]} : vector<256x256xf32> to vector<32x256xf32>
    %215 = arith.mulf %214, %202 : vector<32x256xf32>
    %216 = vector.extract_strided_slice %122 {offsets = [192, 0], sizes = [32, 256], strides = [1, 1]} : vector<256x256xf32> to vector<32x256xf32>
    %217 = arith.addf %215, %216 : vector<32x256xf32>
    %218 = vector.extract_strided_slice %104 {offsets = [192, 0], sizes = [32, 1], strides = [1, 1]} : vector<256x1xf32> to vector<32x1xf32>
    %219 = vector.broadcast %218 : vector<32x1xf32> to vector<32x256xf32>
    %220 = arith.mulf %219, %217 : vector<32x256xf32>
    %221 = vector.extract_strided_slice %220 {offsets = [0, 0], sizes = [16, 256], strides = [1, 1]} : vector<32x256xf32> to vector<16x256xf32>
    %cst_84 = arith.constant dense<0.000000e+00> : vector<256xf32>
    %222 = vector.multi_reduction <add>, %221, %cst_84 [0] : vector<16x256xf32> to vector<256xf32>
    %223 = vector.shape_cast %222 : vector<256xf32> to vector<1x256xf32>
    %c12 = arith.constant 12 : index
    %c0_85 = arith.constant 0 : index
    %224 = vector.load %arg15[%c12, %c0_85] : memref<16x256xf32, #tpu.memory_space<vmem>>, vector<1x256xf32>
    tpu.vector_store %arg15[%c12, %c0_85], %223 {strides = array<i32>} : memref<16x256xf32, #tpu.memory_space<vmem>>, vector<1x256xf32>,
    %225 = vector.extract_strided_slice %220 {offsets = [16, 0], sizes = [16, 256], strides = [1, 1]} : vector<32x256xf32> to vector<16x256xf32>
    %cst_86 = arith.constant dense<0.000000e+00> : vector<256xf32>
    %226 = vector.multi_reduction <add>, %225, %cst_86 [0] : vector<16x256xf32> to vector<256xf32>
    %227 = vector.shape_cast %226 : vector<256xf32> to vector<1x256xf32>
    %c13 = arith.constant 13 : index
    %c0_87 = arith.constant 0 : index
    %228 = vector.load %arg15[%c13, %c0_87] : memref<16x256xf32, #tpu.memory_space<vmem>>, vector<1x256xf32>
    tpu.vector_store %arg15[%c13, %c0_87], %227 {strides = array<i32>} : memref<16x256xf32, #tpu.memory_space<vmem>>, vector<1x256xf32>,
    %229 = vector.extract_strided_slice %116 {offsets = [224, 0], sizes = [32, 256], strides = [1, 1]} : vector<256x256xf32> to vector<32x256xf32>
    %230 = arith.mulf %229, %217 : vector<32x256xf32>
    %231 = vector.extract_strided_slice %122 {offsets = [224, 0], sizes = [32, 256], strides = [1, 1]} : vector<256x256xf32> to vector<32x256xf32>
    %232 = arith.addf %230, %231 : vector<32x256xf32>
    %233 = vector.extract_strided_slice %104 {offsets = [224, 0], sizes = [32, 1], strides = [1, 1]} : vector<256x1xf32> to vector<32x1xf32>
    %234 = vector.broadcast %233 : vector<32x1xf32> to vector<32x256xf32>
    %235 = arith.mulf %234, %232 : vector<32x256xf32>
    %236 = vector.extract_strided_slice %235 {offsets = [0, 0], sizes = [16, 256], strides = [1, 1]} : vector<32x256xf32> to vector<16x256xf32>
    %cst_88 = arith.constant dense<0.000000e+00> : vector<256xf32>
    %237 = vector.multi_reduction <add>, %236, %cst_88 [0] : vector<16x256xf32> to vector<256xf32>
    %238 = vector.shape_cast %237 : vector<256xf32> to vector<1x256xf32>
    %c14 = arith.constant 14 : index
    %c0_89 = arith.constant 0 : index
    %239 = vector.load %arg15[%c14, %c0_89] : memref<16x256xf32, #tpu.memory_space<vmem>>, vector<1x256xf32>
    tpu.vector_store %arg15[%c14, %c0_89], %238 {strides = array<i32>} : memref<16x256xf32, #tpu.memory_space<vmem>>, vector<1x256xf32>,
    %240 = vector.extract_strided_slice %235 {offsets = [16, 0], sizes = [16, 256], strides = [1, 1]} : vector<32x256xf32> to vector<16x256xf32>
    %cst_90 = arith.constant dense<0.000000e+00> : vector<256xf32>
    %241 = vector.multi_reduction <add>, %240, %cst_90 [0] : vector<16x256xf32> to vector<256xf32>
    %242 = vector.shape_cast %241 : vector<256xf32> to vector<1x256xf32>
    %c15 = arith.constant 15 : index
    %c0_91 = arith.constant 0 : index
    %243 = vector.load %arg15[%c15, %c0_91] : memref<16x256xf32, #tpu.memory_space<vmem>>, vector<1x256xf32>
    tpu.vector_store %arg15[%c15, %c0_91], %242 {strides = array<i32>} : memref<16x256xf32, #tpu.memory_space<vmem>>, vector<1x256xf32>,
    %c0_92 = arith.constant 0 : index
    %c0_93 = arith.constant 0 : index
    %244 = vector.load %arg15[%c0_92, %c0_93] : memref<16x256xf32, #tpu.memory_space<vmem>>, vector<16x256xf32>
    %245 = vector.broadcast %7 : vector<1x256xf32> to vector<16x256xf32>
    %246 = arith.mulf %245, %67 : vector<16x256xf32>
    %247 = arith.addf %244, %246 : vector<16x256xf32>
    %cst_94 = arith.constant 0.000000e+00 : f32
    %248 = vector.broadcast %cst_94 : f32 to vector<16x256xf32>
    %249 = arith.subf %248, %17 : vector<16x256xf32>
    %250 = math.exp %249 : vector<16x256xf32>
    %cst_95 = arith.constant 1.000000e+00 : f32
    %251 = vector.broadcast %cst_95 : f32 to vector<16x256xf32>
    %252 = arith.addf %251, %250 : vector<16x256xf32>
    %253 = tpu.reciprocal %252 {approx = true} : vector<16x256xf32> -> vector<16x256xf32>
    %254 = arith.mulf %17, %253 : vector<16x256xf32>
    %255 = arith.mulf %247, %254 : vector<16x256xf32>
    %256 = arith.truncf %255 : vector<16x256xf32> to vector<16x256xbf16>
    %c0_96 = arith.constant 0 : index
    %c0_97 = arith.constant 0 : index
    %c0_98 = arith.constant 0 : index
    %257 = vector.load %arg11[%c0_96, %c0_97, %c0_98] : memref<1x256x256xbf16, #tpu.memory_space<vmem>>, vector<1x256x256xbf16>
    %258 = vector.shape_cast %257 : vector<1x256x256xbf16> to vector<256x256xbf16>
    %cst_99 = arith.constant dense<0.000000e+00> : vector<16x256xf32>
    %259 = tpu.matmul %256, %258, %cst_99 {dimension_numbers = #tpu.dot_dimension_numbers<[1], [0], [0], [1], [0, 0, 1, 1], [], []>} : vector<16x256xbf16>, vector<256x256xbf16>, vector<16x256xf32> -> vector<16x256xf32>
    %cst_100 = arith.constant dense<0.000000e+00> : vector<16xf32>
    %260 = vector.multi_reduction <add>, %259, %cst_100 [1] : vector<16x256xf32> to vector<16xf32>
    %261 = vector.shape_cast %260 : vector<16xf32> to vector<16x1xf32>
    %cst_101 = arith.constant 2.560000e+02 : f32
    %262 = vector.broadcast %cst_101 : f32 to vector<16x1xf32>
    %263 = arith.divf %261, %262 : vector<16x1xf32>
    %264 = vector.broadcast %263 : vector<16x1xf32> to vector<16x256xf32>
    %265 = arith.subf %259, %264 : vector<16x256xf32>
    %266 = arith.mulf %265, %265 : vector<16x256xf32>
    %cst_102 = arith.constant dense<0.000000e+00> : vector<16xf32>
    %267 = vector.multi_reduction <add>, %266, %cst_102 [1] : vector<16x256xf32> to vector<16xf32>
    %268 = vector.shape_cast %267 : vector<16xf32> to vector<16x1xf32>
    %cst_103 = arith.constant 2.560000e+02 : f32
    %269 = vector.broadcast %cst_103 : f32 to vector<16x1xf32>
    %270 = arith.divf %268, %269 : vector<16x1xf32>
    %cst_104 = arith.constant 9.99999997E-7 : f32
    %271 = vector.broadcast %cst_104 : f32 to vector<16x1xf32>
    %272 = arith.addf %270, %271 : vector<16x1xf32>
    %273 = math.rsqrt %272 : vector<16x1xf32>
    %274 = vector.broadcast %273 : vector<16x1xf32> to vector<16x256xf32>
    %275 = arith.mulf %265, %274 : vector<16x256xf32>
    %276 = vector.broadcast %9 : vector<1x256xf32> to vector<16x256xf32>
    %277 = arith.mulf %275, %276 : vector<16x256xf32>
    %278 = arith.addf %1, %277 : vector<16x256xf32>
    %279 = vector.broadcast %11 : vector<1x256xf32> to vector<16x256xf32>
    %280 = arith.addf %278, %279 : vector<16x256xf32>
    %c0_105 = arith.constant 0 : index
    %c0_106 = arith.constant 0 : index
    %c0_107 = arith.constant 0 : index
    %281 = vector.load %arg14[%c0_105, %c0_106, %c0_107] : memref<1x16x256xf32, #tpu.memory_space<vmem>>, vector<1x16x256xf32>
    %282 = vector.shape_cast %281 : vector<1x16x256xf32> to vector<16x256xf32>
    %283 = vector.shape_cast %280 : vector<16x256xf32> to vector<1x16x256xf32>
    tpu.vector_store %arg14[%c0_105, %c0_106, %c0_107], %283 {strides = array<i32>} : memref<1x16x256xf32, #tpu.memory_space<vmem>>, vector<1x16x256xf32>,
    return
  }
  func.func @transform_0(%arg0: i32) -> (i32, i32, i32) {
    %c0_i32 = arith.constant 0 : i32
    %c0_i32_0 = arith.constant 0 : i32
    %c0_i32_1 = arith.constant 0 : i32
    return %arg0, %c0_i32, %c0_i32_0 : i32, i32, i32
  }
  func.func @transform_1(%arg0: i32) -> (i32, i32, i32) {
    %c0_i32 = arith.constant 0 : i32
    %c0_i32_0 = arith.constant 0 : i32
    %c0_i32_1 = arith.constant 0 : i32
    return %arg0, %c0_i32, %c0_i32_0 : i32, i32, i32
  }
  func.func @transform_2(%arg0: i32) -> (i32, i32, i32) {
    %c0_i32 = arith.constant 0 : i32
    %c0_i32_0 = arith.constant 0 : i32
    %c0_i32_1 = arith.constant 0 : i32
    return %arg0, %c0_i32, %c0_i32_0 : i32, i32, i32
  }
  func.func @transform_3(%arg0: i32) -> (i32, i32, i32) {
    %c0_i32 = arith.constant 0 : i32
    %c0_i32_0 = arith.constant 0 : i32
    %c0_i32_1 = arith.constant 0 : i32
    return %arg0, %c0_i32, %c0_i32_0 : i32, i32, i32
  }
  func.func @transform_4(%arg0: i32) -> (i32, i32, i32) {
    %c0_i32 = arith.constant 0 : i32
    %c0_i32_0 = arith.constant 0 : i32
    %c0_i32_1 = arith.constant 0 : i32
    return %arg0, %c0_i32, %c0_i32_0 : i32, i32, i32
  }
  func.func @transform_5(%arg0: i32) -> (i32, i32, i32) {
    %c0_i32 = arith.constant 0 : i32
    %c0_i32_0 = arith.constant 0 : i32
    %c0_i32_1 = arith.constant 0 : i32
    return %arg0, %c0_i32, %c0_i32_0 : i32, i32, i32
  }
  func.func @transform_6(%arg0: i32) -> (i32, i32, i32) {
    %c0_i32 = arith.constant 0 : i32
    %c0_i32_0 = arith.constant 0 : i32
    %c0_i32_1 = arith.constant 0 : i32
    return %arg0, %c0_i32, %c0_i32_0 : i32, i32, i32
  }
  func.func @transform_7(%arg0: i32) -> (i32, i32, i32) {
    %c0_i32 = arith.constant 0 : i32
    %c0_i32_0 = arith.constant 0 : i32
    %c0_i32_1 = arith.constant 0 : i32
    return %arg0, %c0_i32, %c0_i32_0 : i32, i32, i32
  }
  func.func @transform_8(%arg0: i32) -> (i32, i32, i32) {
    %c0_i32 = arith.constant 0 : i32
    %c0_i32_0 = arith.constant 0 : i32
    %c0_i32_1 = arith.constant 0 : i32
    return %arg0, %c0_i32, %c0_i32_0 : i32, i32, i32
  }
  func.func @transform_9(%arg0: i32) -> (i32, i32, i32) {
    %c0_i32 = arith.constant 0 : i32
    %c0_i32_0 = arith.constant 0 : i32
    %c0_i32_1 = arith.constant 0 : i32
    return %arg0, %c0_i32, %c0_i32_0 : i32, i32, i32
  }
  func.func @transform_10(%arg0: i32) -> (i32, i32, i32) {
    %c0_i32 = arith.constant 0 : i32
    %c0_i32_0 = arith.constant 0 : i32
    %c0_i32_1 = arith.constant 0 : i32
    return %arg0, %c0_i32, %c0_i32_0 : i32, i32, i32
  }
  func.func @transform_11(%arg0: i32) -> (i32, i32, i32) {
    %c0_i32 = arith.constant 0 : i32
    %c0_i32_0 = arith.constant 0 : i32
    %c0_i32_1 = arith.constant 0 : i32
    return %arg0, %c0_i32, %c0_i32_0 : i32, i32, i32
  }
  func.func @transform_12(%arg0: i32) -> (i32, i32, i32) {
    %c0_i32 = arith.constant 0 : i32
    %c0_i32_0 = arith.constant 0 : i32
    %c0_i32_1 = arith.constant 0 : i32
    return %arg0, %c0_i32, %c0_i32_0 : i32, i32, i32
  }
  func.func @transform_13(%arg0: i32) -> (i32, i32, i32) {
    %c0_i32 = arith.constant 0 : i32
    %c0_i32_0 = arith.constant 0 : i32
    %c0_i32_1 = arith.constant 0 : i32
    return %arg0, %c0_i32, %c0_i32_0 : i32, i32, i32
  }
}

</mosaic_0001>

<bundles_post_ra>
// kernel: tpu_custom_call.1
= control target key start
LH: loop header
LB: loop body
LE: loop exit
PB: predicated region body
PF: predicated region fallthrough
CT: control target
= control target key end

     0   :  { %s7409_s0 = inlined_call_operand.hbm [shape: f32[2,16,256], index: 0, kind: input, shape index: {}]   ;;  %s7410_s1 = inlined_call_operand.hbm [shape: bf16[2,256,512], index: 1, kind: input, shape index: {}]   ;;  %s7411_s2 = inlined_call_operand.hbm [shape: f32[2,4,256], index: 2, kind: input, shape index: {}]   ;;  %s7412_s3 = inlined_call_operand.hbm [shape: f32[2,1,256], index: 3, kind: input, shape index: {}]   ;;  %s7413_s4 = inlined_call_operand.hbm [shape: f32[2,256,256], index: 4, kind: input, shape index: {}]   ;;  %s7414_s5 = inlined_call_operand.vmem [shape: f32[2,1,256], index: 5, kind: input, shape index: {}]   ;;  %s7415_s6 = inlined_call_operand.hbm [shape: f32[2,16,256], index: 6, kind: input, shape index: {}]   ;;  %s7416_s7 = inlined_call_operand.hbm [shape: f32[2,16,256], index: 7, kind: input, shape index: {}]   ;;  %s7417_s8 = inlined_call_operand.hbm [shape: f32[2,16,256], index: 8, kind: input, shape index: {}]   ;;  %s7418_s9 = inlined_call_operand.vmem [shape: f32[2,1,256], index: 9, kind: input, shape index: {}]   ;;  %s7419_s10 = inlined_call_operand.hbm [shape: bf16[2,256,256], index: 10, kind: input, shape index: {}]   ;;  %s7420_s11 = inlined_call_operand.hbm [shape: f32[2,1,256], index: 11, kind: input, shape index: {}]   ;;  %s7421_s12 = inlined_call_operand.hbm [shape: f32[2,1,256], index: 12, kind: input, shape index: {}]   ;;  %s7422_s13 = inlined_call_operand.hbm [shape: f32[2,16,256], index: 13, kind: output, shape index: {}]  }
   0x1   :  { %7488 = sst [smem:[#allocation105_spill]] %s7409_s0 }
   0x2   :  { %7489 = sst [smem:[#allocation106_spill]] %s7410_s1 }
   0x3   :  { %7490 = sst [smem:[#allocation107_spill]] %s7412_s3 }
   0x4   :  { %7491 = sst [smem:[#allocation108_spill]] %s7414_s5 }
   0x5   :  { %7492 = sst [smem:[#allocation109_spill]] %s7415_s6 }
   0x6   :  { %7493 = sst [smem:[#allocation110_spill]] %s7416_s7 }
   0x7   :  { %7494 = sst [smem:[#allocation111_spill]] %s7418_s9 }
   0x8   :  { %7495 = sst [smem:[#allocation112_spill]] %s7419_s10 }
   0x9   :  { %7496 = sst [smem:[#allocation113_spill]] %s7421_s12 }
   0xa   :  { %7497 = sst [smem:[#allocation114_spill]] %s7422_s13 }
   0xb   :  { %18 = vsyncpa [#allocation4], 0 }
   0xc   :  { %20 = vsyncpa [#allocation4 + $0x1], 0 }
   0xd   :  { %21 = vsyncpa [#allocation7], 0 }
   0xe   :  { %23 = vsyncpa [#allocation7 + $0x1], 0 }
   0xf   :  { %24 = vsyncpa [#allocation10], 0 }
  0x10   :  { %26 = vsyncpa [#allocation10 + $0x1], 0 }
  0x11   :  { %27 = vsyncpa [#allocation13], 0 }
  0x12   :  { %29 = vsyncpa [#allocation13 + $0x1], 0 }
  0x13   :  { %30 = vsyncpa [#allocation16], 0 }
  0x14   :  { %32 = vsyncpa [#allocation16 + $0x1], 0 }
  0x15   :  { %33 = vsyncpa [#allocation19], 0 }
  0x16   :  { %35 = vsyncpa [#allocation19 + $0x1], 0 }
  0x17   :  { %36 = vsyncpa [#allocation5], 0 }
  0x18   :  { %38 = vsyncpa [#allocation5 + $0x1], 0  ;;  %s5166_s25 = smov 0   ;;  %s5168_s26 = smov 0  }
  0x19   :  { %s5170_s27 = smov 0   ;;  %s5172_s28 = smov 0  }
  0x1a LB: > { %7498 = sst [smem:[#allocation29_spill]] %s5075_s25  ;;  %s5187_s29 = sadd.s32 4294967295, %s5087_s28   ;;  %s5087_s28 = sphi %s5172_s28, %s7699_s28   ;;  %s5083_s27 = sphi %s5170_s27, %s7702_s27   ;;  %s5079_s26 = sphi %s5168_s26, %s7701_s26   ;;  %s5075_s25 = sphi %s5166_s25, %s7700_s25  }
  0x1b   : > { %7499 = sst [smem:[#allocation30_spill]] %s5079_s26  ;;  %s3890_s30 = sadd.s32 4294967294, %s5087_s28  }
  0x1c   : > { %7500 = sst [smem:[#allocation31_spill]] %s5083_s27  ;;  %s5191_s14 = sadd.s32 1, %s5087_s28  }
  0x1d   : > { %7501 = sst [smem:[#allocation32_spill]] %s5187_s29  ;;  %s51_s15 = sadd.s32 1, %s5083_s27 }
  0x1e   : > { %7502 = sst [smem:[#allocation33_spill]] %s5191_s14  ;;  %s48_s16 = ssub.s32 %s5087_s28, %s5191_s14 }
  0x1f   : > { %p58_p0 = scmp.ne.s32.totalorder %s5083_s27, %s5079_s26  ;;  %p49_p1 = scmp.eq.s32.totalorder %s48_s16, 0 }
  0x20   : > { %p59_p2 = scmp.eq.s32.totalorder %s5087_s28, 0  ;;  %p64_p3 = scmp.ne.s32.totalorder %s5079_s26, %s5075_s25 }
  0x21   : > { %p65_p4 = scmp.eq.s32.totalorder %s5187_s29, 0  ;;  %p400_p7 = scmp.eq.s32.totalorder %s5187_s29, 1 }
  0x22   : > { %s5203_s17 = scalar_select %p49_p1, %s5083_s27, %s51_s15  }
  0x23   : > { %p5205_p5 = por %p59_p2, %p58_p0  ;;  %p5209_p6 = por %p65_p4, %p64_p3 }
  0x24   : > { %7503 = sst [smem:[#allocation34_spill]] %s5203_s17  ;;  %p406_p8 = scmp.eq.s32.totalorder %s3890_s30, 1 }
  0x25   : > { %s7505_s19 = scalar_select %p5209_p6, 1, 0 }
  0x26   : > { %p5214_p9 = por %p400_p7, %p58_p0  ;;  %p5218_p10 = por %p406_p8, %p64_p3 }
  0x27   : > { %7506 = sst [smem:[#allocation35_spill]] %s7505_s19  ;;  %p3892_p11 = scmp.ge.s32.totalorder %s5087_s28, 2 }
  0x28   : > { %s7507_s20 = scalar_select %p5214_p9, 1, 0 }
  0x29   : > { %s7509_s21 = scalar_select %p5218_p10, 1, 0 }
  0x2a   : > { %7508 = sst [smem:[#allocation36_spill]] %s7507_s20  ;;  %422 = sbr.rel (%p3892_p11) target bundleno = 247 (0xf7), region = 16 }
  0x2b   : > { %7510 = sst [smem:[#allocation37_spill]] %s7509_s21  ;;  %s5226_s22 = sand.u32 (!%p3892_p11), 1, %s5083_s27  }
  0x2c   : > { %s5229_s23 = sand.u32 (!%p3892_p11), 1, %s5087_s28   ;;  %s3896_s24 = sshll.u32 (!%p3892_p11), %s5226_s22, 9 }
  0x2d   : > { %s4331_s30 = sshll.u32 (!%p3892_p11), %s5087_s28, 9  ;;  %s7511_s1 = sld [smem:[#allocation106_spill]] (!%p3892_p11) }
  0x2e   : > { %s452_s14 = scalar_lea.vmem (!%p3892_p11), [#allocation6], %s3896_s24  ;;  %s7435_s20 = scalar_lea.sflag (!%p3892_p11), [#allocation7], %s5229_s23 }
  0x2f   : > { %s460_s21 = sshll.u32 %s452_s14, 4  ;;  %s461_s21 = int_to_ptr.vmem [resolvable:$true] %s460_s21 }
  0x33   : > { %s457_s17 = scalar_lea.hbm %s7511_s1, %s4331_s30  ;;  %s4699_s29 = scalar_lea.hbm %s7511_s1, 1024 }
  0x34   : > { %s458_s25 = sshll.u32 %s457_s17, 4  ;;  %s459_s25 = int_to_ptr.hbm [resolvable:$true] %s458_s25 }
  0x35   : > { %s4693_s13 = sshra.s32 %s459_s25, 4  ;;  %s4694_s13 = int_to_ptr.hbm [resolvable:$true] %s4693_s13 }
  0x36   : > { %s4695_s27 = scalar_lea.hbm %s4694_s13, 512  ;;  %p4700_p1 = scmp.lt.s32.totalorder %s4694_s13, %s7511_s1 }
  0x37   : > { %p4696_p12 = scmp.ne.s32.totalorder %s4694_s13, %s4695_s27  ;;  %p4701_p2 = scmp.lt.s32.totalorder %s4699_s29, %s4695_s27 }
  0x39   : > { %p4697_p13 = pnand %p4696_p12, %p5205_p5  ;;  %p4702_p3 = por %p4701_p2, %p4700_p1 }
  0x3b   : > { %p4698_p0 = pneg %p4697_p13 }
  0x3d   : > { %p4703_p4 = pnand %p4702_p3, %p4698_p0 }
  0x3f   : > { %4706 = shalt.err (!%p4703_p4)
}
  0x40   : > { %s7436_s14 = smov 256   ;;  %s7438_s17 = smov 16  }
  0x41   : > { %4436 = dma.hbm_to_vmem [thread:$0]  (%p5205_p5), %s459_s25, 8192, %s461_s21, %s7435_s20, %s7436_s14, %s7436_s14, %s7438_s17  }
  0x42   : > { %s5255_s13 = scalar_lea.hbm %s7413_s4, %s4331_s30  ;;  %s5257_s27 = scalar_lea.vmem [#allocation11], %s3896_s24 }
  0x43   : > { %s5262_s16 = sshll.u32 %s5226_s22, 1  ;;  %s5265_s15 = sshll.u32 %s5087_s28, 1 }
  0x44   : > { %s7512_s3 = sld [smem:[#allocation107_spill]]  ;;  %s494_s30 = scalar_lea.vmem [#allocation9], %s5262_s16 }
  0x45   : > { %s502_s9 = sshll.u32 %s494_s30, 4  ;;  %s7441_s24 = scalar_lea.sflag [#allocation10], %s5229_s23  ;;  %s503_s9 = int_to_ptr.vmem [resolvable:$true] %s502_s9 }
  0x4a   : > { %s498_s21 = scalar_lea.hbm %s7512_s3, %s5265_s15  ;;  %s4727_s17 = scalar_lea.hbm %s7512_s3, 4 }
  0x4b   : > { %s500_s5 = sshll.u32 %s498_s21, 4  ;;  %s501_s5 = int_to_ptr.hbm [resolvable:$true] %s500_s5 }
  0x4c   : > { %s4721_s20 = sshra.s32 %s501_s5, 4  ;;  %s4722_s20 = int_to_ptr.hbm [resolvable:$true] %s4721_s20 }
  0x4d   : > { %s4723_s29 = scalar_lea.hbm %s4722_s20, 2  ;;  %p4728_p13 = scmp.lt.s32.totalorder %s4722_s20, %s7512_s3 }
  0x4e   : > { %p4724_p7 = scmp.ne.s32.totalorder %s4722_s20, %s4723_s29  ;;  %p4729_p0 = scmp.lt.s32.totalorder %s4727_s17, %s4723_s29 }
  0x50   : > { %p4725_p8 = pnand %p4724_p7, %p5205_p5  ;;  %p4730_p1 = por %p4729_p0, %p4728_p13 }
  0x52   : > { %p4726_p12 = pneg %p4725_p8 }
  0x54   : > { %p4731_p2 = pnand %p4730_p1, %p4726_p12 }
  0x56   : > { %4734 = shalt.err (!%p4731_p2)
}
  0x57   : > { %4438 = dma.hbm_to_vmem [thread:$0]  (%p5205_p5), %s501_s5, 32, %s503_s9, %s7441_s24  }
  0x58   : > { %s5286_s25 = sshll.u32 %s5226_s22, 5  ;;  %s5289_s14 = sshll.u32 %s5087_s28, 5 }
  0x59   : > { %s7513_s6 = sld [smem:[#allocation109_spill]]  ;;  %s542_s29 = scalar_lea.vmem [#allocation12], %s5286_s25 }
  0x5a   : > { %s550_s19 = sshll.u32 %s542_s29, 4  ;;  %s7445_s30 = scalar_lea.sflag [#allocation13], %s5229_s23  ;;  %s551_s19 = int_to_ptr.vmem [resolvable:$true] %s550_s19 }
  0x5f   : > { %s547_s17 = scalar_lea.hbm %s7513_s6, %s5289_s14  ;;  %s4755_s24 = scalar_lea.hbm %s7513_s6, 64 }
  0x60   : > { %s548_s21 = sshll.u32 %s547_s17, 4  ;;  %s549_s21 = int_to_ptr.hbm [resolvable:$true] %s548_s21 }
  0x61   : > { %s4749_s1 = sshra.s32 %s549_s21, 4  ;;  %s4750_s1 = int_to_ptr.hbm [resolvable:$true] %s4749_s1 }
  0x62   : > { %s4751_s3 = scalar_lea.hbm %s4750_s1, 32  ;;  %p4756_p8 = scmp.lt.s32.totalorder %s4750_s1, %s7513_s6 }
  0x63   : > { %p4752_p3 = scmp.ne.s32.totalorder %s4750_s1, %s4751_s3  ;;  %p4757_p12 = scmp.lt.s32.totalorder %s4755_s24, %s4751_s3 }
  0x65   : > { %p4753_p4 = pnand %p4752_p3, %p5205_p5  ;;  %p4758_p13 = por %p4757_p12, %p4756_p8 }
  0x67   : > { %p4754_p7 = pneg %p4753_p4 }
  0x69   : > { %p4759_p0 = pnand %p4758_p13, %p4754_p7 }
  0x6b   : > { %4762 = shalt.err (!%p4759_p0)
}
  0x6c   : > { %s7514_s20 = smov 16   ;;  %s7515_s17 = smov 256  }
  0x6d   : > { %4440 = dma.hbm_to_vmem [thread:$0]  (%p5205_p5), %s549_s21, 512, %s551_s19, %s7445_s30, %s7515_s17, %s7515_s17, %s7514_s20  }
  0x6e   : > { %s591_s12 = scalar_lea.hbm %s7417_s8, %s5289_s14  ;;  %s586_s24 = scalar_lea.vmem [#allocation15], %s5286_s25 }
  0x6f   : > { %s592_s3 = sshll.u32 %s591_s12, 4  ;;  %s594_s1 = sshll.u32 %s586_s24, 4  ;;  %s593_s3 = int_to_ptr.hbm [resolvable:$true] %s592_s3  ;;  %s595_s1 = int_to_ptr.vmem [resolvable:$true] %s594_s1 }
  0x70   : > { %s7446_s9 = scalar_lea.sflag [#allocation16], %s5229_s23  ;;  %s4777_s26 = sshra.s32 %s593_s3, 4  ;;  %s4778_s26 = int_to_ptr.hbm [resolvable:$true] %s4777_s26 }
  0x71   : > { %s4779_s6 = scalar_lea.hbm %s4778_s26, 32  ;;  %s4783_s19 = scalar_lea.hbm %s7417_s8, 64 }
  0x72   : > { %p4780_p1 = scmp.ne.s32.totalorder %s4778_s26, %s4779_s6  ;;  %p4784_p4 = scmp.lt.s32.totalorder %s4778_s26, %s7417_s8 }
  0x73   : > { %p4785_p7 = scmp.lt.s32.totalorder %s4783_s19, %s4779_s6 }
  0x74   : > { %p4781_p2 = pnand %p4780_p1, %p5205_p5 }
  0x75   : > { %p4786_p8 = por %p4785_p7, %p4784_p4 }
  0x76   : > { %p4782_p3 = pneg %p4781_p2 }
  0x78   : > { %p4787_p12 = pnand %p4786_p8, %p4782_p3 }
  0x7a   : > { %4790 = shalt.err (!%p4787_p12)
}
  0x7b   : > { %4442 = dma.hbm_to_vmem [thread:$0]  (%p5205_p5), %s593_s3, 512, %s595_s1, %s7446_s9, %s7515_s17, %s7515_s17, %s7514_s20  }
  0x7c   : > { %s641_s5 = scalar_lea.hbm %s7420_s11, %s5265_s15  ;;  %s637_s6 = scalar_lea.vmem [#allocation18], %s5262_s16 }
  0x7d   : > { %s645_s12 = sshll.u32 %s637_s6, 4  ;;  %s643_s24 = sshll.u32 %s641_s5, 4  ;;  %s646_s12 = int_to_ptr.vmem [resolvable:$true] %s645_s12  ;;  %s644_s24 = int_to_ptr.hbm [resolvable:$true] %s643_s24 }
  0x7e   : > { %s7447_s26 = scalar_lea.sflag [#allocation19], %s5229_s23  ;;  %s4805_s19 = sshra.s32 %s644_s24, 4  ;;  %s4806_s19 = int_to_ptr.hbm [resolvable:$true] %s4805_s19 }
  0x7f   : > { %s4807_s21 = scalar_lea.hbm %s4806_s19, 2  ;;  %s4811_s3 = scalar_lea.hbm %s7420_s11, 4 }
  0x80   : > { %p4808_p13 = scmp.ne.s32.totalorder %s4806_s19, %s4807_s21  ;;  %p4812_p2 = scmp.lt.s32.totalorder %s4806_s19, %s7420_s11 }
  0x81   : > { %p4813_p3 = scmp.lt.s32.totalorder %s4811_s3, %s4807_s21 }
  0x82   : > { %p4809_p0 = pnand %p4808_p13, %p5205_p5 }
  0x83   : > { %p4814_p4 = por %p4813_p3, %p4812_p2 }
  0x84   : > { %p4810_p1 = pneg %p4809_p0 }
  0x86   : > { %p4815_p7 = pnand %p4814_p4, %p4810_p1 }
  0x88   : > { %4818 = shalt.err (!%p4815_p7)
}
  0x89   : > { %4444 = dma.hbm_to_vmem [thread:$0]  (%p5205_p5), %s644_s24, 32, %s646_s12, %s7447_s26  }
  0x8a   : > { %s7516_s0 = sld [smem:[#allocation105_spill]]  ;;  %s430_s29 = scalar_lea.vmem [#allocation3], %s5286_s25 }
  0x8b   : > { %s438_s19 = sshll.u32 %s430_s29, 4  ;;  %s427_s21 = scalar_lea.sflag [#allocation4], %s5226_s22  ;;  %s439_s19 = int_to_ptr.vmem [resolvable:$true] %s438_s19 }
  0x90   : > { %s435_s5 = scalar_lea.hbm %s7516_s0, %s5289_s14  ;;  %s4839_s12 = scalar_lea.hbm %s7516_s0, 64 }
  0x91   : > { %s436_s6 = sshll.u32 %s435_s5, 4  ;;  %s437_s6 = int_to_ptr.hbm [resolvable:$true] %s436_s6 }
  0x92   : > { %s4833_s3 = sshra.s32 %s437_s6, 4  ;;  %s4834_s3 = int_to_ptr.hbm [resolvable:$true] %s4833_s3 }
  0x93   : > { %s4835_s1 = scalar_lea.hbm %s4834_s3, 32  ;;  %p4840_p0 = scmp.lt.s32.totalorder %s4834_s3, %s7516_s0 }
  0x94   : > { %p4836_p8 = scmp.ne.s32.totalorder %s4834_s3, %s4835_s1  ;;  %p4841_p1 = scmp.lt.s32.totalorder %s4839_s12, %s4835_s1 }
  0x96   : > { %p4837_p12 = pnand %p4836_p8, %p5205_p5  ;;  %p4842_p2 = por %p4841_p1, %p4840_p0 }
  0x98   : > { %p4838_p13 = pneg %p4837_p12 }
  0x9a   : > { %p4843_p3 = pnand %p4842_p2, %p4838_p13 }
  0x9c   : > { %4846 = shalt.err (!%p4843_p3)
}
  0x9d   : > { %4435 = dma.hbm_to_vmem [thread:$0]  (%p5205_p5), %s437_s6, 512, %s439_s19, %s427_s21, %s7515_s17, %s7515_s17, %s7514_s20  }
  0x9e   : > { %s3899_s30 = sshll.u32 %s5226_s22, 3  ;;  %s4332_s9 = sshll.u32 %s5087_s28, 3 }
  0x9f   : > { %s479_s7 = scalar_lea.hbm %s7411_s2, %s4332_s9  ;;  %s474_s1 = scalar_lea.vmem [#allocation8], %s3899_s30 }
  0xa0   : > { %s481_s3 = sshll.u32 %s479_s7, 4  ;;  %s483_s12 = sshll.u32 %s474_s1, 4  ;;  %s482_s3 = int_to_ptr.hbm [resolvable:$true] %s481_s3  ;;  %s484_s12 = int_to_ptr.vmem [resolvable:$true] %s483_s12 }
  0xa1   : > { %s4861_s24 = sshra.s32 %s482_s3, 4  ;;  %s4867_s19 = scalar_lea.hbm %s7411_s2, 16  ;;  %s4862_s24 = int_to_ptr.hbm [resolvable:$true] %s4861_s24 }
  0xa2   : > { %s4863_s10 = scalar_lea.hbm %s4862_s24, 8  ;;  %p4868_p12 = scmp.lt.s32.totalorder %s4862_s24, %s7411_s2 }
  0xa3   : > { %p4864_p4 = scmp.ne.s32.totalorder %s4862_s24, %s4863_s10  ;;  %p4869_p13 = scmp.lt.s32.totalorder %s4867_s19, %s4863_s10 }
  0xa5   : > { %p4865_p7 = pnand %p4864_p4, %p5205_p5  ;;  %p4870_p0 = por %p4869_p13, %p4868_p12 }
  0xa7   : > { %p4866_p8 = pneg %p4865_p7 }
  0xa9   : > { %p4871_p1 = pnand %p4870_p0, %p4866_p8 }
  0xab   : > { %4874 = shalt.err (!%p4871_p1)
}
  0xac   : > { %s7517_s30 = scalar_lea.sflag [#allocation7], %s5229_s23  ;;  %s7518_s9 = sshll.u32 %s5255_s13, 4  ;;  %s520_s9 = int_to_ptr.hbm [resolvable:$true] %s7518_s9 }
  0xad   : > { %4437 = dma.hbm_to_vmem [thread:$0]  (%p5205_p5), %s482_s3, 128, %s484_s12, %s7517_s30  }
  0xae   : > { %s7519_s26 = sshll.u32 %s5257_s27, 4  ;;  %s4889_s5 = sshra.s32 %s520_s9, 4  ;;  %s522_s26 = int_to_ptr.vmem [resolvable:$true] %s7519_s26  ;;  %s4890_s5 = int_to_ptr.hbm [resolvable:$true] %s4889_s5 }
  0xaf   : > { %s4891_s0 = scalar_lea.hbm %s4890_s5, 512  ;;  %s4895_s1 = scalar_lea.hbm %s7413_s4, 1024 }
  0xb0   : > { %p4892_p2 = scmp.ne.s32.totalorder %s4890_s5, %s4891_s0  ;;  %p4896_p7 = scmp.lt.s32.totalorder %s4890_s5, %s7413_s4 }
  0xb1   : > { %p4897_p8 = scmp.lt.s32.totalorder %s4895_s1, %s4891_s0 }
  0xb2   : > { %p4893_p3 = pnand %p4892_p2, %p5205_p5 }
  0xb3   : > { %p4898_p12 = por %p4897_p8, %p4896_p7 }
  0xb4   : > { %p4894_p4 = pneg %p4893_p3 }
  0xb6   : > { %p4899_p13 = pnand %p4898_p12, %p4894_p4 }
  0xb8   : > { %4902 = shalt.err (!%p4899_p13)
}
  0xb9   : > { %s7520_s13 = scalar_lea.sflag [#allocation10], %s5229_s23  ;;  %s7521_s12 = sld [smem:[#allocation110_spill]] }
  0xba   : > { %4439 = dma.hbm_to_vmem [thread:$0]  (%p5205_p5), %s520_s9, 8192, %s522_s26, %s7520_s13, %s7515_s17, %s7515_s17, %s7514_s20  }
  0xbb   : > { %s564_s21 = scalar_lea.vmem [#allocation14], %s5286_s25 }
  0xbc   : > { %s572_s30 = sshll.u32 %s564_s21, 4  ;;  %s573_s30 = int_to_ptr.vmem [resolvable:$true] %s572_s30 }
  0xbf   : > { %s569_s6 = scalar_lea.hbm %s7521_s12, %s5289_s14  ;;  %s4923_s9 = scalar_lea.hbm %s7521_s12, 64 }
  0xc0   : > { %s570_s19 = sshll.u32 %s569_s6, 4  ;;  %s571_s19 = int_to_ptr.hbm [resolvable:$true] %s570_s19 }
  0xc1   : > { %s4917_s5 = sshra.s32 %s571_s19, 4  ;;  %s4918_s5 = int_to_ptr.hbm [resolvable:$true] %s4917_s5 }
  0xc2   : > { %s4919_s0 = scalar_lea.hbm %s4918_s5, 32  ;;  %p4924_p3 = scmp.lt.s32.totalorder %s4918_s5, %s7521_s12 }
  0xc3   : > { %p4920_p0 = scmp.ne.s32.totalorder %s4918_s5, %s4919_s0  ;;  %p4925_p4 = scmp.lt.s32.totalorder %s4923_s9, %s4919_s0 }
  0xc5   : > { %p4921_p1 = pnand %p4920_p0, %p5205_p5  ;;  %p4926_p7 = por %p4925_p4, %p4924_p3 }
  0xc7   : > { %p4922_p2 = pneg %p4921_p1 }
  0xc9   : > { %p4927_p8 = pnand %p4926_p7, %p4922_p2 }
  0xcb   : > { %4930 = shalt.err (!%p4927_p8)
}
  0xcc   : > { %s7522_s25 = scalar_lea.sflag [#allocation13], %s5229_s23  ;;  %s3916_s14 = sshll.u32 %s5226_s22, 8 }
  0xcd   : > { %4441 = dma.hbm_to_vmem [thread:$0]  (%p5205_p5), %s571_s19, 512, %s573_s30, %s7522_s25, %s7515_s17, %s7515_s17, %s7514_s20  }
  0xce   : > { %s4337_s24 = sshll.u32 %s5087_s28, 8  ;;  %s7523_s27 = sld [smem:[#allocation112_spill]] }
  0xcf   : > { %s615_s5 = scalar_lea.vmem [#allocation17], %s3916_s14 }
  0xd0   : > { %s623_s0 = sshll.u32 %s615_s5, 4  ;;  %s624_s0 = int_to_ptr.vmem [resolvable:$true] %s623_s0 }
  0xd4   : > { %s7524_s3 = smov %s7523_s27  ;;  %s620_s6 = scalar_lea.hbm %s7523_s27, %s4337_s24 }
  0xd5   : > { %s621_s21 = sshll.u32 %s620_s6, 4  ;;  %s4951_s22 = scalar_lea.hbm %s7524_s3, 512  ;;  %s622_s21 = int_to_ptr.hbm [resolvable:$true] %s621_s21 }
  0xd6   : > { %s4945_s29 = sshra.s32 %s622_s21, 4  ;;  %s4946_s29 = int_to_ptr.hbm [resolvable:$true] %s4945_s29 }
  0xd7   : > { %s4947_s7 = scalar_lea.hbm %s4946_s29, 256  ;;  %p4952_p1 = scmp.lt.s32.totalorder %s4946_s29, %s7524_s3 }
  0xd8   : > { %p4948_p12 = scmp.ne.s32.totalorder %s4946_s29, %s4947_s7  ;;  %p4953_p2 = scmp.lt.s32.totalorder %s4951_s22, %s4947_s7 }
  0xda   : > { %p4949_p13 = pnand %p4948_p12, %p5205_p5  ;;  %p4954_p3 = por %p4953_p2, %p4952_p1 }
  0xdc   : > { %p4950_p0 = pneg %p4949_p13 }
  0xde   : > { %p4955_p4 = pnand %p4954_p3, %p4950_p0 }
  0xe0   : > { %4958 = shalt.err (!%p4955_p4)
}
  0xe1   : > { %s5091_s30 = smov 128   ;;  %s5092_s26 = smov 8  }
  0xe2   : > { %s7525_s1 = scalar_lea.sflag [#allocation16], %s5229_s23  ;;  %s7526_s24 = sld [smem:[#allocation113_spill]] }
  0xe3   : > { %4443 = dma.hbm_to_vmem [thread:$0]  (%p5205_p5), %s622_s21, 4096, %s624_s0, %s7525_s1, %s5091_s30, %s5091_s30, %s5092_s26  }
  0xe4   : > { %s656_s27 = scalar_lea.vmem [#allocation20], %s5262_s16 }
  0xe5   : > { %s664_s6 = sshll.u32 %s656_s27, 4  ;;  %s665_s6 = int_to_ptr.vmem [resolvable:$true] %s664_s6 }
  0xe8   : > { %s660_s10 = scalar_lea.hbm %s7526_s24, %s5265_s15  ;;  %s4979_s21 = scalar_lea.hbm %s7526_s24, 4 }
  0xe9   : > { %s662_s13 = sshll.u32 %s660_s10, 4  ;;  %s663_s13 = int_to_ptr.hbm [resolvable:$true] %s662_s13 }
  0xea   : > { %s4973_s5 = sshra.s32 %s663_s13, 4  ;;  %s4974_s5 = int_to_ptr.hbm [resolvable:$true] %s4973_s5 }
  0xeb   : > { %s4975_s29 = scalar_lea.hbm %s4974_s5, 2  ;;  %p4980_p13 = scmp.lt.s32.totalorder %s4974_s5, %s7526_s24 }
  0xec   : > { %p4976_p7 = scmp.ne.s32.totalorder %s4974_s5, %s4975_s29  ;;  %p4981_p0 = scmp.lt.s32.totalorder %s4979_s21, %s4975_s29 }
  0xee   : > { %p4977_p8 = pnand %p4976_p7, %p5205_p5  ;;  %p4982_p1 = por %p4981_p0, %p4980_p13 }
  0xf0   : > { %p4978_p12 = pneg %p4977_p8 }
  0xf2   : > { %p4983_p2 = pnand %p4982_p1, %p4978_p12 }
  0xf4   : > { %4986 = shalt.err (!%p4983_p2)
}
  0xf5   : > { %s7527_s16 = scalar_lea.sflag [#allocation19], %s5229_s23 }
  0xf6   : > { %4445 = dma.hbm_to_vmem [thread:$0]  (%p5205_p5), %s663_s13, 32, %s665_s6, %s7527_s16  }
  0xf7 PF: > { %p3923_p3 = scmp.ge.s32.totalorder %s5087_s28, 1  ;;  %p669_p4 = scmp.lt.s32.totalorder %s5087_s28, 3 }
  0xf9   : > { %p670_p7 = pnand %p3923_p3, %p669_p4 }
  0xfb   : > { %673 = sbr.rel (%p670_p7) target bundleno = 1340 (0x53c), region = 72 }
 0x100   : > { %s7528_s15 = sld [smem:[#allocation30_spill]] }
 0x106   : > { %s5463_s17 = sand.u32 1, %s7528_s15  }
 0x107   : > { %s5466_s19 = sshll.u32 %s5463_s17, 5  ;;  %s676_s18 = scalar_lea.sflag [#allocation4], %s5463_s17 }
 0x108   : > { %s5470_s30 = scalar_lea.vmem [#allocation3], %s5466_s19 }
 0x109   : > { %5046 = dma.done.wait (%p5209_p6), %s676_s18, 512  }
 0x10a   : > { %5048 = vsyncadd (%p5209_p6), %s676_s18, 4294966784  ;;  %s7530_s23 = sld [smem:[#allocation32_spill]]  ;;  %s3925_s1 = sshll.u32 %s5463_s17, 9 }
 0x10b   : > { %s5478_s14 = scalar_lea.vmem [#allocation6], %s3925_s1 }
 0x110   : > { %s685_s26 = sand.u32 1, %s7530_s23  }
 0x111   : > { %s686_s25 = scalar_lea.sflag [#allocation7], %s685_s26 }
 0x112   : > { %5050 = dma.done.wait (%p5209_p6), %s686_s25, 8320  }
 0x113   : > { %5052 = vsyncadd (%p5209_p6), %s686_s25, 4294958976  ;;  %s3926_s10 = sshll.u32 %s5463_s17, 3  ;;  %s5486_s13 = sshll.u32 %s5463_s17, 1 }
 0x114   : > { %s5488_s27 = scalar_lea.vmem [#allocation8], %s3926_s10  ;;  %s706_s6 = scalar_lea.sflag [#allocation10], %s685_s26 }
 0x115   : > { %s709_s5 = scalar_lea.vmem [#allocation9], %s5486_s13 }
 0x116   : > { %5054 = dma.done.wait (%p5209_p6), %s706_s6, 8224  }
 0x117   : > { %5056 = vsyncadd (%p5209_p6), %s706_s6, 4294959072  ;;  %s5495_s29 = scalar_lea.vmem [#allocation11], %s3925_s1  ;;  %s726_s7 = scalar_lea.sflag [#allocation13], %s685_s26 }
 0x118   : > { %s5498_s9 = scalar_lea.vmem [#allocation12], %s5466_s19 }
 0x119   : > { %5058 = dma.done.wait (%p5209_p6), %s726_s7, 1024  }
 0x11a   : > { %5060 = vsyncadd (%p5209_p6), %s726_s7, 4294966272  ;;  %s5505_s21 = scalar_lea.vmem [#allocation14], %s5466_s19  ;;  %s746_s0 = scalar_lea.sflag [#allocation16], %s685_s26 }
 0x11b   : > { %s5508_s20 = scalar_lea.vmem [#allocation15], %s5466_s19 }
 0x11c   : > { %5062 = dma.done.wait (%p5209_p6), %s746_s0, 4608  }
 0x11d   : > { %5064 = vsyncadd (%p5209_p6), %s746_s0, 4294962688  ;;  %s3932_s16 = sshll.u32 %s5463_s17, 8  ;;  %s766_s18 = scalar_lea.sflag [#allocation19], %s685_s26 }
 0x11e   : > { %s5515_s15 = scalar_lea.vmem [#allocation17], %s3932_s16  ;;  %s769_s1 = scalar_lea.vmem [#allocation18], %s5486_s13 }
 0x11f   : > { %5066 = dma.done.wait (%p5209_p6), %s766_s18, 64  }
 0x120   : > { %5068 = vsyncadd (%p5209_p6), %s766_s18, 4294967232  ;;  %v4052_v0 = vld [vmem:[%s5478_s14 + $0xe0] sm:$0xf]  ;;  %v4368_v1 = vld [vmem:[%s5478_s14 + $0xec] sm:$0xf0]  ;;  %vm1747_vm6 = vcmask 1040384  }
 0x121   : > { %v4180_v2 = vld [vmem:[%s5478_s14 + $0x1e0] sm:$0xf]  ;;  %v4053_v3 = vor.u32 %v4368_v1, %v4052_v0  ;;  %v4400_v4 = vld [vmem:[%s5478_s14 + $0x1ec] sm:$0xf0]  ;;  %v4366_v5 = vld [vmem:[%s5478_s14 + $0xe4] sm:$0xf] }
 0x122   : > { %v4054_v6 = vld [vmem:[%s5478_s14 + $0xf0] sm:$0xf0]  ;;  %v4181_v7 = vor.u32 %v4400_v4, %v4180_v2  ;;  %v4398_v9 = vld [vmem:[%s5478_s14 + $0x1e4] sm:$0xf]  ;;  %v4036_v11 = vld [vmem:[%s5478_s14 + $0xc0] sm:$0xf] }
 0x123   : > { %v4057_v8 = vor.u32 %v4366_v5, %v4054_v6  ;;  %v4182_v10 = vld [vmem:[%s5478_s14 + $0x1f0] sm:$0xf0]  ;;  %1284 = vmatpush.bf16.msra.mxu0 %v4053_v3  ;;  %v4364_v13 = vld [vmem:[%s5478_s14 + $0xcc] sm:$0xf0]  ;;  %v4164_v14 = vld [vmem:[%s5478_s14 + $0x1c0] sm:$0xf] }
 0x124   : > { %v4185_v12 = vor.u32 %v4398_v9, %v4182_v10  ;;  %v4396_v15 = vld [vmem:[%s5478_s14 + $0x1cc] sm:$0xf0]  ;;  %1298 = vmatpush.bf16.msra.mxu1 %v4181_v7  ;;  %v4037_v16 = vor.u32 %v4364_v13, %v4036_v11  ;;  %v4362_v18 = vld [vmem:[%s5478_s14 + $0xc4] sm:$0xf]  ;;  %v4038_v19 = vld [vmem:[%s5478_s14 + $0xd0] sm:$0xf0] }
 0x125   : > { %1312 = vmatpush.bf16.msra.mxu2 %v4057_v8  ;;  %v4165_v17 = vor.u32 %v4396_v15, %v4164_v14  ;;  %v4394_v20 = vld [vmem:[%s5478_s14 + $0x1c4] sm:$0xf]  ;;  %v4041_v21 = vor.u32 %v4362_v18, %v4038_v19  ;;  %v4166_v22 = vld [vmem:[%s5478_s14 + $0x1d0] sm:$0xf0]  ;;  %v4020_v23 = vld [vmem:[%s5478_s14 + $0xa0] sm:$0xf] }
 0x126   : > { %1326 = vmatpush.bf16.msra.mxu3 %v4185_v12  ;;  %v4360_v24 = vld [vmem:[%s5478_s14 + $0xac] sm:$0xf0]  ;;  %v4169_v25 = vor.u32 %v4394_v20, %v4166_v22  ;;  %v4148_v26 = vld [vmem:[%s5478_s14 + $0x1a0] sm:$0xf]  ;;  %v4358_v28 = vld [vmem:[%s5478_s14 + $0xa4] sm:$0xf] }
 0x127   : > { %v4392_v27 = vld [vmem:[%s5478_s14 + $0x1ac] sm:$0xf0]  ;;  %1285 = vmatpush.bf16.msra.mxu0 %v4037_v16  ;;  %v4021_v29 = vor.u32 %v4360_v24, %v4020_v23  ;;  %v4022_v30 = vld [vmem:[%s5478_s14 + $0xb0] sm:$0xf0]  ;;  %v4390_v31 = vld [vmem:[%s5478_s14 + $0x1a4] sm:$0xf] }
 0x128   : > { %v4150_v32 = vld [vmem:[%s5478_s14 + $0x1b0] sm:$0xf0]  ;;  %1299 = vmatpush.bf16.msra.mxu1 %v4165_v17  ;;  %v4149_v33 = vor.u32 %v4392_v27, %v4148_v26  ;;  %v4025_v34 = vor.u32 %v4358_v28, %v4022_v30  ;;  %v4004_v35 = vld [vmem:[%s5478_s14 + $0x80] sm:$0xf]  ;;  %v4356_v36 = vld [vmem:[%s5478_s14 + $0x8c] sm:$0xf0] }
 0x129   : > { %1313 = vmatpush.bf16.msra.mxu2 %v4041_v21  ;;  %v4132_v37 = vld [vmem:[%s5478_s14 + $0x180] sm:$0xf]  ;;  %v4153_v38 = vor.u32 %v4390_v31, %v4150_v32  ;;  %v4388_v39 = vld [vmem:[%s5478_s14 + $0x18c] sm:$0xf0]  ;;  %v4354_v40 = vld [vmem:[%s5478_s14 + $0x84] sm:$0xf]  ;;  %v4005_v44 = vor.u32 %v4356_v36, %v4004_v35 }
 0x12a   : > { %1327 = vmatpush.bf16.msra.mxu3 %v4169_v25  ;;  %v4006_v41 = vld [vmem:[%s5478_s14 + $0x90] sm:$0xf0]  ;;  %v4386_v42 = vld [vmem:[%s5478_s14 + $0x184] sm:$0xf]  ;;  %v4133_v45 = vor.u32 %v4388_v39, %v4132_v37  ;;  %v3988_v47 = vld [vmem:[%s5478_s14 + $0x60] sm:$0xf] }
 0x12b   : > { %v4134_v43 = vld [vmem:[%s5478_s14 + $0x190] sm:$0xf0]  ;;  %1286 = vmatpush.bf16.msra.mxu0 %v4021_v29  ;;  %v4009_v46 = vor.u32 %v4354_v40, %v4006_v41  ;;  %v4352_v48 = vld [vmem:[%s5478_s14 + $0x6c] sm:$0xf0]  ;;  %v4116_v49 = vld [vmem:[%s5478_s14 + $0x160] sm:$0xf] }
 0x12c   : > { %1300 = vmatpush.bf16.msra.mxu1 %v4149_v33  ;;  %v4137_v50 = vor.u32 %v4386_v42, %v4134_v43  ;;  %v4384_v51 = vld [vmem:[%s5478_s14 + $0x16c] sm:$0xf0]  ;;  %v4350_v52 = vld [vmem:[%s5478_s14 + $0x64] sm:$0xf]  ;;  %v3990_v53 = vld [vmem:[%s5478_s14 + $0x70] sm:$0xf0]  ;;  %v3989_v56 = vor.u32 %v4352_v48, %v3988_v47 }
 0x12d   : > { %1314 = vmatpush.bf16.msra.mxu2 %v4025_v34  ;;  %v4382_v54 = vld [vmem:[%s5478_s14 + $0x164] sm:$0xf]  ;;  %v4118_v55 = vld [vmem:[%s5478_s14 + $0x170] sm:$0xf0]  ;;  %v4117_v57 = vor.u32 %v4384_v51, %v4116_v49  ;;  %v3993_v58 = vor.u32 %v4350_v52, %v3990_v53  ;;  %v3972_v59 = vld [vmem:[%s5478_s14 + $0x40] sm:$0xf] }
 0x12e   : > { %1328 = vmatpush.bf16.msra.mxu3 %v4153_v38  ;;  %v4348_v60 = vld [vmem:[%s5478_s14 + $0x4c] sm:$0xf0]  ;;  %v4100_v61 = vld [vmem:[%s5478_s14 + $0x140] sm:$0xf]  ;;  %v4121_v62 = vor.u32 %v4382_v54, %v4118_v55  ;;  %v4346_v0 = vld [vmem:[%s5478_s14 + $0x44] sm:$0xf] }
 0x12f   : > { %1287 = vmatpush.bf16.msra.mxu0 %v4005_v44  ;;  %v4380_v63 = vld [vmem:[%s5478_s14 + $0x14c] sm:$0xf0]  ;;  %v3974_v1 = vld [vmem:[%s5478_s14 + $0x50] sm:$0xf0]  ;;  %v4378_v2 = vld [vmem:[%s5478_s14 + $0x144] sm:$0xf]  ;;  %v3973_v4 = vor.u32 %v4348_v60, %v3972_v59 }
 0x130   : > { %1301 = vmatpush.bf16.msra.mxu1 %v4133_v45  ;;  %v4102_v3 = vld [vmem:[%s5478_s14 + $0x150] sm:$0xf0]  ;;  %v4101_v5 = vor.u32 %v4380_v63, %v4100_v61  ;;  %v3977_v6 = vor.u32 %v4346_v0, %v3974_v1  ;;  %v3956_v7 = vld [vmem:[%s5478_s14 + $0x20] sm:$0xf]  ;;  %v4344_v8 = vld [vmem:[%s5478_s14 + $0x2c] sm:$0xf0] }
 0x131   : > { %1315 = vmatpush.bf16.msra.mxu2 %v4009_v46  ;;  %v4084_v9 = vld [vmem:[%s5478_s14 + $0x120] sm:$0xf]  ;;  %v4105_v10 = vor.u32 %v4378_v2, %v4102_v3  ;;  %v4376_v11 = vld [vmem:[%s5478_s14 + $0x12c] sm:$0xf0]  ;;  %v4342_v12 = vld [vmem:[%s5478_s14 + $0x24] sm:$0xf]  ;;  %v3957_v16 = vor.u32 %v4344_v8, %v3956_v7 }
 0x132   : > { %1329 = vmatpush.bf16.msra.mxu3 %v4137_v50  ;;  %v3958_v13 = vld [vmem:[%s5478_s14 + $0x30] sm:$0xf0]  ;;  %v4374_v14 = vld [vmem:[%s5478_s14 + $0x124] sm:$0xf]  ;;  %v3940_v17 = vld [vmem:[%s5478_s14] sm:$0xf]  ;;  %v4085_v19 = vor.u32 %v4376_v11, %v4084_v9 }
 0x133   : > { %1288 = vmatpush.bf16.msra.mxu0 %v3989_v56  ;;  %v4086_v15 = vld [vmem:[%s5478_s14 + $0x130] sm:$0xf0]  ;;  %v4340_v18 = vld [vmem:[%s5478_s14 + $0xc] sm:$0xf0]  ;;  %v3961_v20 = vor.u32 %v4342_v12, %v3958_v13  ;;  %v4068_v21 = vld [vmem:[%s5478_s14 + $0x100] sm:$0xf] }
 0x134   : > { %1302 = vmatpush.bf16.msra.mxu1 %v4117_v57  ;;  %v4372_v22 = vld [vmem:[%s5478_s14 + $0x10c] sm:$0xf0]  ;;  %v4338_v23 = vld [vmem:[%s5478_s14 + $0x4] sm:$0xf]  ;;  %v4089_v24 = vor.u32 %v4374_v14, %v4086_v15  ;;  %v3942_v25 = vld [vmem:[%s5478_s14 + $0x10] sm:$0xf0]  ;;  %v3941_v31 = vor.u32 %v4340_v18, %v3940_v17 }
 0x135   : > { %1316 = vmatpush.bf16.msra.mxu2 %v3993_v58  ;;  %v4370_v26 = vld [vmem:[%s5478_s14 + $0x104] sm:$0xf]  ;;  %v4070_v27 = vld [vmem:[%s5478_s14 + $0x110] sm:$0xf0]  ;;  %v4060_v29 = vld [vmem:[%s5478_s14 + $0xe8] sm:$0xf]  ;;  %v4069_v35 = vor.u32 %v4372_v22, %v4068_v21  ;;  %v3945_v36 = vor.u32 %v4338_v23, %v3942_v25 }
 0x136   : > { %1330 = vmatpush.bf16.msra.mxu3 %v4121_v62  ;;  %v889_v28 = vld [vmem:[%s5470_s30] sm:$0xff]  ;;  %v4369_v30 = vld [vmem:[%s5478_s14 + $0xf4] sm:$0xf0]  ;;  %v891_v32 = vld [vmem:[%s5470_s30 + $0x10] sm:$0xff]  ;;  %v4073_v39 = vor.u32 %v4370_v26, %v4070_v27  ;;  %vm1752_vm7 = vcmask 1042434   ;;  %vm1749_vm8 = vcmask 1041409  }
 0x137   : > { %1289 = vmatpush.bf16.msra.mxu0 %v3973_v4  ;;  %v4367_v33 = vld [vmem:[%s5478_s14 + $0xec] sm:$0xf]  ;;  %v4062_v34 = vld [vmem:[%s5478_s14 + $0xf8] sm:$0xf0]  ;;  %v4061_v40 = vor.u32 %v4369_v30, %v4060_v29  ;;  %v4044_v41 = vld [vmem:[%s5478_s14 + $0xc8] sm:$0xf]  ;;  %v5597_v44 = vpack.c.bf16 %v891_v32, %v889_v28 }
 0x138   : > { %1303 = vmatpush.bf16.msra.mxu1 %v4101_v5  ;;  %v890_v37 = vld [vmem:[%s5470_s30 + $0x8] sm:$0xff]  ;;  %v892_v38 = vld [vmem:[%s5470_s30 + $0x18] sm:$0xff]  ;;  %v4065_v45 = vor.u32 %v4367_v33, %v4062_v34  ;;  %vm1755_vm9 = vcmask 1043459   ;;  %vm1761_vm10 = vcmask 1045509   ;;  %vm1758_vm11 = vcmask 1044484   ;;  %p881_p5 = scmp.lt.s32.totalorder %s7530_s23, 1 }
 0x139   : > { %1317 = vmatpush.bf16.msra.mxu2 %v3977_v6  ;;  %v4188_v42 = vld [vmem:[%s5478_s14 + $0x1e8] sm:$0xf]  ;;  %v4401_v43 = vld [vmem:[%s5478_s14 + $0x1f4] sm:$0xf0]  ;;  %v4399_v47 = vld [vmem:[%s5478_s14 + $0x1ec] sm:$0xf]  ;;  %v5602_v49 = vpack.c.bf16 %v892_v38, %v890_v37 }
 0x13a   : > { %1331 = vmatpush.bf16.msra.mxu3 %v4105_v10  ;;  %v4365_v46 = vld [vmem:[%s5478_s14 + $0xd4] sm:$0xf0]  ;;  %v4190_v48 = vld [vmem:[%s5478_s14 + $0x1f8] sm:$0xf0]  ;;  %v4363_v50 = vld [vmem:[%s5478_s14 + $0xcc] sm:$0xf]  ;;  %v4189_v52 = vor.u32 %v4401_v43, %v4188_v42 }
 0x13b   : > { %1290 = vmatpush.bf16.msra.mxu0 %v3957_v16  ;;  %v4046_v51 = vld [vmem:[%s5478_s14 + $0xd8] sm:$0xf0]  ;;  %v4045_v53 = vor.u32 %v4365_v46, %v4044_v41  ;;  %v4193_v54 = vor.u32 %v4399_v47, %v4190_v48  ;;  %v4028_v55 = vld [vmem:[%s5478_s14 + $0xa8] sm:$0xf]  ;;  %v4397_v57 = vld [vmem:[%s5478_s14 + $0x1d4] sm:$0xf0] }
 0x13c   : > { %1304 = vmatpush.bf16.msra.mxu1 %v4085_v19  ;;  %v4172_v56 = vld [vmem:[%s5478_s14 + $0x1c8] sm:$0xf]  ;;  %v4049_v58 = vor.u32 %v4363_v50, %v4046_v51  ;;  %v4361_v59 = vld [vmem:[%s5478_s14 + $0xb4] sm:$0xf0]  ;;  %v4395_v60 = vld [vmem:[%s5478_s14 + $0x1cc] sm:$0xf] }
 0x13d   : > { %1318 = vmatpush.bf16.msra.mxu2 %v3961_v20  ;;  %v4174_v61 = vld [vmem:[%s5478_s14 + $0x1d8] sm:$0xf0]  ;;  %v4359_v62 = vld [vmem:[%s5478_s14 + $0xac] sm:$0xf]  ;;  %v4173_v0 = vor.u32 %v4397_v57, %v4172_v56  ;;  %v4029_v1 = vor.u32 %v4361_v59, %v4028_v55  ;;  %v4012_v4 = vld [vmem:[%s5478_s14 + $0x88] sm:$0xf] }
 0x13e   : > { %1332 = vmatpush.bf16.msra.mxu3 %v4089_v24  ;;  %v4030_v63 = vld [vmem:[%s5478_s14 + $0xb8] sm:$0xf0]  ;;  %v4177_v2 = vor.u32 %v4395_v60, %v4174_v61  ;;  %v4357_v5 = vld [vmem:[%s5478_s14 + $0x94] sm:$0xf0]  ;;  %v4355_v6 = vld [vmem:[%s5478_s14 + $0x8c] sm:$0xf] }
 0x13f   : > { %1291 = vmatpush.bf16.msra.mxu0 %v3941_v31  ;;  %v4033_v3 = vor.u32 %v4359_v62, %v4030_v63  ;;  %v4014_v7 = vld [vmem:[%s5478_s14 + $0x98] sm:$0xf0]  ;;  %v4013_v8 = vor.u32 %v4357_v5, %v4012_v4  ;;  %v4156_v10 = vld [vmem:[%s5478_s14 + $0x1a8] sm:$0xf]  ;;  %v4393_v11 = vld [vmem:[%s5478_s14 + $0x1b4] sm:$0xf0] }
 0x140   : > { %1305 = vmatpush.bf16.msra.mxu1 %v4069_v35  ;;  %v4017_v9 = vor.u32 %v4355_v6, %v4014_v7  ;;  %v4391_v12 = vld [vmem:[%s5478_s14 + $0x1ac] sm:$0xf]  ;;  %v4157_v13 = vor.u32 %v4393_v11, %v4156_v10  ;;  %v4158_v14 = vld [vmem:[%s5478_s14 + $0x1b8] sm:$0xf0]  ;;  %v3996_v16 = vld [vmem:[%s5478_s14 + $0x68] sm:$0xf] }
 0x141   : > { %1319 = vmatpush.bf16.msra.mxu2 %v3945_v36  ;;  %v4161_v15 = vor.u32 %v4391_v12, %v4158_v14  ;;  %v4353_v17 = vld [vmem:[%s5478_s14 + $0x74] sm:$0xf0]  ;;  %v4351_v18 = vld [vmem:[%s5478_s14 + $0x6c] sm:$0xf]  ;;  %v3998_v20 = vld [vmem:[%s5478_s14 + $0x78] sm:$0xf0] }
 0x142   : > { %1333 = vmatpush.bf16.msra.mxu3 %v4073_v39  ;;  %1292 = vmatmul.bf16.vlgmr.msra.gmra.mxu0 %v5597_v44  ;;  %v3997_v19 = vor.u32 %v4353_v17, %v3996_v16  ;;  %v4001_v21 = vor.u32 %v4351_v18, %v3998_v20  ;;  %v4140_v22 = vld [vmem:[%s5478_s14 + $0x188] sm:$0xf]  ;;  %v4389_v23 = vld [vmem:[%s5478_s14 + $0x194] sm:$0xf0]  ;;  %v4387_v24 = vld [vmem:[%s5478_s14 + $0x18c] sm:$0xf] }
 0x143   : > { %1340 = vmatpush.bf16.msrb.mxu0 %v4061_v40  ;;  %1306 = vmatmul.bf16.vlgmr.msra.gmra.mxu1 %v5602_v49  ;;  %v4141_v25 = vor.u32 %v4389_v23, %v4140_v22  ;;  %v4142_v26 = vld [vmem:[%s5478_s14 + $0x198] sm:$0xf0]  ;;  %v3980_v27 = vld [vmem:[%s5478_s14 + $0x48] sm:$0xf]  ;;  %v4349_v28 = vld [vmem:[%s5478_s14 + $0x54] sm:$0xf0] }
 0x144   : > { %1320 = vmatmul.bf16.vlgmr.msra.gmra.mxu2 %v5597_v44  ;;  %1354 = vmatpush.bf16.msrb.mxu1 %v4189_v52  ;;  %v4145_v29 = vor.u32 %v4387_v24, %v4142_v26  ;;  %v3981_v30 = vor.u32 %v4349_v28, %v3980_v27  ;;  %v4347_v31 = vld [vmem:[%s5478_s14 + $0x4c] sm:$0xf]  ;;  %v3982_v32 = vld [vmem:[%s5478_s14 + $0x58] sm:$0xf0]  ;;  %v4124_v34 = vld [vmem:[%s5478_s14 + $0x168] sm:$0xf]  ;;  %v7448_v27 = vlaneseq }
 0x145   : > { %1368 = vmatpush.bf16.msrb.mxu2 %v4065_v45  ;;  %1334 = vmatmul.bf16.vlgmr.msra.gmra.mxu3 %v5602_v49  ;;  %v3985_v33 = vor.u32 %v4347_v31, %v3982_v32  ;;  %v4385_v35 = vld [vmem:[%s5478_s14 + $0x174] sm:$0xf0]  ;;  %v4383_v37 = vld [vmem:[%s5478_s14 + $0x16c] sm:$0xf]  ;;  %v4126_v38 = vld [vmem:[%s5478_s14 + $0x178] sm:$0xf0] }
 0x146   : > { %1382 = vmatpush.bf16.msrb.mxu3 %v4193_v54  ;;  %v4125_v36 = vor.u32 %v4385_v35, %v4124_v34  ;;  %v4129_v39 = vor.u32 %v4383_v37, %v4126_v38  ;;  %v3964_v40 = vld [vmem:[%s5478_s14 + $0x28] sm:$0xf]  ;;  %v4345_v41 = vld [vmem:[%s5478_s14 + $0x34] sm:$0xf0]  ;;  %v4343_v43 = vld [vmem:[%s5478_s14 + $0x2c] sm:$0xf] }
 0x147   : > { %1341 = vmatpush.bf16.msrb.mxu0 %v4045_v53  ;;  %v3965_v42 = vor.u32 %v4345_v41, %v3964_v40  ;;  %v3966_v45 = vld [vmem:[%s5478_s14 + $0x38] sm:$0xf0]  ;;  %v4108_v47 = vld [vmem:[%s5478_s14 + $0x148] sm:$0xf]  ;;  %v4381_v48 = vld [vmem:[%s5478_s14 + $0x154] sm:$0xf0] }
 0x148   : > { %1355 = vmatpush.bf16.msrb.mxu1 %v4173_v0  ;;  %v3969_v46 = vor.u32 %v4343_v43, %v3966_v45  ;;  %v4109_v50 = vor.u32 %v4381_v48, %v4108_v47  ;;  %v4379_v51 = vld [vmem:[%s5478_s14 + $0x14c] sm:$0xf]  ;;  %v4110_v52 = vld [vmem:[%s5478_s14 + $0x158] sm:$0xf0]  ;;  %v3948_v54 = vld [vmem:[%s5478_s14 + $0x8] sm:$0xf] }
 0x149   : > { %1369 = vmatpush.bf16.msrb.mxu2 %v4049_v58  ;;  %v4113_v53 = vor.u32 %v4379_v51, %v4110_v52  ;;  %v4341_v55 = vld [vmem:[%s5478_s14 + $0x14] sm:$0xf0]  ;;  %v4339_v56 = vld [vmem:[%s5478_s14 + $0xc] sm:$0xf]  ;;  %v3950_v58 = vld [vmem:[%s5478_s14 + $0x18] sm:$0xf0] }
 0x14a   : > { %1383 = vmatpush.bf16.msrb.mxu3 %v4177_v2  ;;  %v3949_v57 = vor.u32 %v4341_v55, %v3948_v54  ;;  %v3953_v59 = vor.u32 %v4339_v56, %v3950_v58  ;;  %v4092_v60 = vld [vmem:[%s5478_s14 + $0x128] sm:$0xf]  ;;  %v4377_v61 = vld [vmem:[%s5478_s14 + $0x134] sm:$0xf0]  ;;  %v1575_v63 = vld [vmem:[%s5495_s29 + $0xf8] sm:$0xff]  ;;  %v5692_v37 = vshrl.u32 %v7448_v27, 7 }
 0x14b   : > { %1342 = vmatpush.bf16.msrb.mxu0 %v4029_v1  ;;  %v1574_v62 = vld [vmem:[%s5495_s29 + $0xf0] sm:$0xff]  ;;  %v4093_v0 = vor.u32 %v4377_v61, %v4092_v60  ;;  %v4375_v1 = vld [vmem:[%s5478_s14 + $0x12c] sm:$0xf]  ;;  %v4094_v2 = vld [vmem:[%s5478_s14 + $0x138] sm:$0xf0]  ;;  %vm1764_vm12 = vcmask 1046534  }
 0x14c   : > { %1356 = vmatpush.bf16.msrb.mxu1 %v4157_v13  ;;  %v1572_v4 = vld [vmem:[%s5495_s29 + $0xe0] sm:$0xff]  ;;  %v1573_v5 = vld [vmem:[%s5495_s29 + $0xe8] sm:$0xff]  ;;  %v4076_v6 = vld [vmem:[%s5478_s14 + $0x108] sm:$0xf]  ;;  %vm1400_vm0 = vcmp.ge.s32.totalorder %v5692_v37, 6  ;;  %vm1406_vm1 = vcmp.lt.s32.totalorder %v5692_v37, 6 }
 0x14d   : > { %1370 = vmatpush.bf16.msrb.mxu2 %v4033_v3  ;;  %v4097_v3 = vor.u32 %v4375_v1, %v4094_v2  ;;  %v4373_v7 = vld [vmem:[%s5478_s14 + $0x114] sm:$0xf0]  ;;  %v4371_v11 = vld [vmem:[%s5478_s14 + $0x10c] sm:$0xf]  ;;  %v4078_v12 = vld [vmem:[%s5478_s14 + $0x118] sm:$0xf0] }
 0x14e   : > { %1384 = vmatpush.bf16.msrb.mxu3 %v4161_v15  ;;  %v4077_v10 = vor.u32 %v4373_v7, %v4076_v6  ;;  %v4081_v13 = vor.u32 %v4371_v11, %v4078_v12  ;;  %v1568_v14 = vld [vmem:[%s5495_s29 + $0xc0] sm:$0xff]  ;;  %v1606_v15 = vld [vmem:[%s5495_s29 + $0x1f0] sm:$0xff]  ;;  %v1569_v16 = vld [vmem:[%s5495_s29 + $0xc8] sm:$0xff]  ;;  %vm1445_vm2 = vcmp.lt.s32.totalorder %v5692_v37, 4  ;;  %vm1439_vm3 = vcmp.ge.s32.totalorder %v5692_v37, 4  ;;  %s6323_s22 = scalar_select %p881_p5, %s7530_s23, 1 }
 0x14f   : > { %1343 = vmatpush.bf16.msrb.mxu0 %v4013_v8  ;;  %v1570_v8 = vld [vmem:[%s5495_s29 + $0xd0] sm:$0xff]  ;;  %v1607_v17 = vld [vmem:[%s5495_s29 + $0x1f8] sm:$0xff]  ;;  %v1564_v23 = vld [vmem:[%s5495_s29 + $0xa0] sm:$0xff]  ;;  %vm1473_vm4 = vcmp.ge.s32.totalorder %v5692_v37, 2  ;;  %vm1479_vm5 = vcmp.lt.s32.totalorder %v5692_v37, 2  ;;  %vm1767_vm13 = vcmask 1046528  }
 0x150   : > { %1357 = vmatpush.bf16.msrb.mxu1 %v4141_v25  ;;  %v1566_v18 = vld [vmem:[%s5495_s29 + $0xb0] sm:$0xff]  ;;  %v1567_v20 = vld [vmem:[%s5495_s29 + $0xb8] sm:$0xff]  ;;  %v1565_v25 = vld [vmem:[%s5495_s29 + $0xa8] sm:$0xff]  ;;  %s3936_s26 = sshll.u32 %s6323_s22, 1  ;;  %s7546_s10 = sld [smem:[#allocation108_spill]] }
 0x151   : > { %1371 = vmatpush.bf16.msrb.mxu2 %v4017_v9  ;;  %v1571_v9 = vld [vmem:[%s5495_s29 + $0xd8] sm:$0xff]  ;;  %v1602_v24 = vld [vmem:[%s5495_s29 + $0x1d0] sm:$0xff]  ;;  %v1601_v32 = vld [vmem:[%s5495_s29 + $0x1c8] sm:$0xff]  ;;  %s7695_s16 = sld [smem:[#allocation114_spill]] }
 0x152   : > { %1385 = vmatpush.bf16.msrb.mxu3 %v4145_v29  ;;  %v1603_v28 = vld [vmem:[%s5495_s29 + $0x1d8] sm:$0xff]  ;;  %v1562_v29 = vld [vmem:[%s5495_s29 + $0x90] sm:$0xff]  ;;  %v1561_v35 = vld [vmem:[%s5495_s29 + $0x88] sm:$0xff] }
 0x153   : > { %1344 = vmatpush.bf16.msrb.mxu0 %v3997_v19  ;;  %v1604_v19 = vld [vmem:[%s5495_s29 + $0x1e0] sm:$0xff]  ;;  %v1563_v31 = vld [vmem:[%s5495_s29 + $0x98] sm:$0xff]  ;;  %v1598_v34 = vld [vmem:[%s5495_s29 + $0x1b0] sm:$0xff] }
 0x154   : > { %1358 = vmatpush.bf16.msrb.mxu1 %v4125_v36  ;;  %v5689_v36 = vld [vmem:[%s5488_s27 + $0x3] ss:$4 sm:$0x3]  ;;  %v5695_v38 = vld [vmem:[%s5488_s27] ss:$4 sm:$0x3] }
 0x155   : > { %1372 = vmatpush.bf16.msrb.mxu2 %v4001_v21  ;;  %v1605_v21 = vld [vmem:[%s5495_s29 + $0x1e8] sm:$0xff]  ;;  %v1558_v41 = vld [vmem:[%s5495_s29 + $0x70] sm:$0xff]  ;;  %v1559_v43 = vld [vmem:[%s5495_s29 + $0x78] sm:$0xff]  ;;  %v1508_v48 = vperm.slane %v5689_v36, 0 }
 0x156   : > { %1386 = vmatpush.bf16.msrb.mxu3 %v4129_v39  ;;  %v1599_v39 = vld [vmem:[%s5495_s29 + $0x1b8] sm:$0xff]  ;;  %v1597_v47 = vld [vmem:[%s5495_s29 + $0x1a8] sm:$0xff]  ;;  %v1594_v54 = vld [vmem:[%s5495_s29 + $0x190] sm:$0xff] }
 0x157   : > { %1345 = vmatpush.bf16.msrb.mxu0 %v3981_v30  ;;  %v1600_v30 = vld [vmem:[%s5495_s29 + $0x1c0] sm:$0xff]  ;;  %v5710_v52 = vld [vmem:[%s5488_s27 + $0x2] ss:$4 sm:$0x3]  ;;  %v5717_v56 = vld [vmem:[%s709_s5] sm:$0x3] }
 0x158   : > { %1359 = vmatpush.bf16.msrb.mxu1 %v4109_v50  ;;  %v1557_v55 = vld [vmem:[%s5495_s29 + $0x68] sm:$0xff]  ;;  %v1595_v58 = vld [vmem:[%s5495_s29 + $0x198] sm:$0xff]  ;;  %v1552_v7 = vld [vmem:[%s5495_s29 + $0x40] sm:$0xff] }
 0x159   : > { %1373 = vmatpush.bf16.msrb.mxu2 %v3985_v33  ;;  %v1560_v33 = vld [vmem:[%s5495_s29 + $0x80] sm:$0xff]  ;;  %v1593_v2 = vld [vmem:[%s5495_s29 + $0x188] sm:$0xff]  ;;  %v1590_v12 = vld [vmem:[%s5495_s29 + $0x170] sm:$0xff] }
 0x15a   : > { %1387 = vmatpush.bf16.msrb.mxu3 %v4113_v53  ;;  %v1556_v53 = vld [vmem:[%s5495_s29 + $0x60] sm:$0xff] }
 0x15b   : > { %1346 = vmatpush.bf16.msrb.mxu0 %v3965_v42  ;;  %v1596_v42 = vld [vmem:[%s5495_s29 + $0x1a0] sm:$0xff] }
 0x15c   : > { %1360 = vmatpush.bf16.msrb.mxu1 %v4093_v0  ;;  %v1555_v0 = vld [vmem:[%s5495_s29 + $0x58] sm:$0xff] }
 0x15d   : > { %1374 = vmatpush.bf16.msrb.mxu2 %v3969_v46  ;;  %v5704_v46 = vld [vmem:[%s5488_s27 + $0x1] ss:$4 sm:$0x3]  ;;  %s884_s27 = scalar_lea.vmem %s7546_s10, %s3936_s26  ;;  %s5021_s10 = scalar_lea.hbm %s7695_s16, 64 }
 0x15e   : > { %1388 = vmatpush.bf16.msrb.mxu3 %v4097_v3  ;;  %v1459_v1 = vperm.slane %v5704_v46, 0  ;;  %v1460_v11 = vperm.slane %v5704_v46, 1 }
 0x15f   : > { %1347 = vmatpush.bf16.msrb.mxu0 %v3949_v57  ;;  %v1420_v57 = vperm.slane %v5695_v38, 0 }
 0x160   : > { %1361 = vmatpush.bf16.msrb.mxu1 %v4077_v10  ;;  %v1421_v10 = vperm.slane %v5695_v38, 1 }
 0x161   : > { %1375 = vmatpush.bf16.msrb.mxu2 %v3953_v59 }
 0x162   : > { %1389 = vmatpush.bf16.msrb.mxu3 %v4081_v13  ;;  %1348 = vmatmul.bf16.vlgmr.msrb.gmra.mxu0 %v5597_v44 }
 0x163   : > { %1613 = vmatpush.msra.mxu0 %v1574_v62  ;;  %v1554_v62 = vld [vmem:[%s5495_s29 + $0x50] sm:$0xff]  ;;  %1362 = vmatmul.bf16.vlgmr.msrb.gmra.mxu1 %v5602_v49 }
 0x164   : > { %1376 = vmatmul.bf16.vlgmr.msrb.gmra.mxu2 %v5597_v44  ;;  %1636 = vmatpush.msra.mxu1 %v1606_v15 }
 0x165   : > { %1659 = vmatpush.msra.mxu2 %v1575_v63  ;;  %1614 = vmatpush.msra.mxu0 %v1572_v4  ;;  %v1592_v63 = vld [vmem:[%s5495_s29 + $0x180] sm:$0xff] }
 0x166   : > { %1682 = vmatpush.msra.mxu3 %v1607_v17  ;;  %1637 = vmatpush.msra.mxu1 %v1604_v19  ;;  %v1553_v17 = vld [vmem:[%s5495_s29 + $0x48] sm:$0xff] }
 0x167   : > { %1660 = vmatpush.msra.mxu2 %v1573_v5  ;;  %1615 = vmatpush.msra.mxu0 %v1570_v8  ;;  %v1429_v8 = vperm.slane %v5717_v56, 0 }
 0x168   : > { %1683 = vmatpush.msra.mxu3 %v1605_v21  ;;  %1638 = vmatpush.msra.mxu1 %v1602_v24  ;;  %v1550_v24 = vld [vmem:[%s5495_s29 + $0x30] sm:$0xff] }
 0x169   : > { %1661 = vmatpush.msra.mxu2 %v1571_v9  ;;  %1616 = vmatpush.msra.mxu0 %v1568_v14  ;;  %v1493_v9 = vperm.slane %v5710_v52, 0 }
 0x16a   : > { %1684 = vmatpush.msra.mxu3 %v1603_v28  ;;  %1639 = vmatpush.msra.mxu1 %v1600_v30 }
 0x16b   : > { %1662 = vmatpush.msra.mxu2 %v1569_v16  ;;  %1617 = vmatpush.msra.mxu0 %v1566_v18  ;;  %v1591_v18 = vld [vmem:[%s5495_s29 + $0x178] sm:$0xff] }
 0x16c   : > { %1685 = vmatpush.msra.mxu3 %v1601_v32  ;;  %1640 = vmatpush.msra.mxu1 %v1598_v34  ;;  %v1551_v32 = vld [vmem:[%s5495_s29 + $0x38] sm:$0xff] }
 0x16d   : > { %1663 = vmatpush.msra.mxu2 %v1567_v20  ;;  %1618 = vmatpush.msra.mxu0 %v1564_v23 }
 0x16e   : > { %1686 = vmatpush.msra.mxu3 %v1599_v39  ;;  %1641 = vmatpush.msra.mxu1 %v1596_v42  ;;  %v1586_v42 = vld [vmem:[%s5495_s29 + $0x150] sm:$0xff] }
 0x16f   : > { %1664 = vmatpush.msra.mxu2 %v1565_v25  ;;  %1619 = vmatpush.msra.mxu0 %v1562_v29  ;;  %v1588_v25 = vld [vmem:[%s5495_s29 + $0x160] sm:$0xff] }
 0x170   : > { %1687 = vmatpush.msra.mxu3 %v1597_v47  ;;  %1642 = vmatpush.msra.mxu1 %v1594_v54 }
 0x171   : > { %1665 = vmatpush.msra.mxu2 %v1563_v31  ;;  %1620 = vmatpush.msra.mxu0 %v1560_v33  ;;  %v1430_v31 = vperm.slane %v5717_v56, 1  ;;  %v1589_v33 = vld [vmem:[%s5495_s29 + $0x168] sm:$0xff]  ;;  %v1579_v56 = vld [vmem:[%s5495_s29 + $0x118] sm:$0xff] }
 0x172   : > { %1688 = vmatpush.msra.mxu3 %v1595_v58  ;;  %1643 = vmatpush.msra.mxu1 %v1592_v63  ;;  %v1584_v63 = vld [vmem:[%s5495_s29 + $0x140] sm:$0xff] }
 0x173   : > { %1666 = vmatpush.msra.mxu2 %v1561_v35  ;;  %1621 = vmatpush.msra.mxu0 %v1558_v41  ;;  %v1548_v41 = vld [vmem:[%s5495_s29 + $0x20] sm:$0xff] }
 0x174   : > { %1689 = vmatpush.msra.mxu3 %v1593_v2  ;;  %1644 = vmatpush.msra.mxu1 %v1590_v12 }
 0x175   : > { %1667 = vmatpush.msra.mxu2 %v1559_v43  ;;  %1622 = vmatpush.msra.mxu0 %v1556_v53 }
 0x176   : > { %1390 = vmatmul.bf16.vlgmr.msrb.gmra.mxu3 %v5602_v49  ;;  %1645 = vmatpush.msra.mxu1 %v1588_v25 }
 0x177   : > { %1668 = vmatpush.msra.mxu2 %v1557_v55  ;;  %1623 = vmatpush.msra.mxu0 %v1554_v62 }
 0x178   : > { %1690 = vmatpush.msra.mxu3 %v1591_v18  ;;  %1646 = vmatpush.msra.mxu1 %v1586_v42  ;;  %v1509_v18 = vperm.slane %v5689_v36, 1 }
 0x179   : > { %1669 = vmatpush.msra.mxu2 %v1555_v0  ;;  %1624 = vmatpush.msra.mxu0 %v1552_v7  ;;  %v1547_v0 = vld [vmem:[%s5495_s29 + $0x18] sm:$0xff] }
 0x17a   : > { %1691 = vmatpush.msra.mxu3 %v1589_v33  ;;  %1647 = vmatpush.msra.mxu1 %v1584_v63 }
 0x17b   : > { %1670 = vmatpush.msra.mxu2 %v1553_v17  ;;  %1625 = vmatpush.msra.mxu0 %v1550_v24  ;;  %v1583_v17 = vld [vmem:[%s5495_s29 + $0x138] sm:$0xff] }
 0x17d   : > { %1671 = vmatpush.msra.mxu2 %v1551_v32  ;;  %1626 = vmatpush.msra.mxu0 %v1548_v41  ;;  %v1578_v32 = vld [vmem:[%s5495_s29 + $0x110] sm:$0xff] }
 0x1bf   : > { %v1293_v22 = vpop.f32.mrf.mxu0 }
 0x1c0   : > { %v1307_v26 = vpop.f32.mrf.mxu1 }
 0x1c1   : > { %v5698_v40 = vadd.f32 %v1307_v26, %v1293_v22 }
 0x1c3   : > { %v1402_v59 = vrot.slane %v5698_v40, 2  ;;  %v1441_v60 = vrot.slane %v5698_v40, 4  ;;  %v1475_v3 = vrot.slane %v5698_v40, 6  ;;  %v1512_v49 = vmul.f32 %v1508_v48, %v5698_v40  ;;  %v1549_v40 = vld [vmem:[%s5495_s29 + $0x28] sm:$0xff] }
 0x1c4   : > { %1672 = vmatpush.msra.mxu2 %v1549_v40 }
 0x1c6   : > { %1673 = vmatpush.msra.mxu2 %v1547_v0 }
 0x1c7   : > { %v1321_v45 = vpop.f32.mrf.mxu2  ;;  %v1295_v51 = vpop.f32.mrf.mxu0 }
 0x1c8   : > { %v1335_v50 = vpop.f32.mrf.mxu3  ;;  %v1309_v44 = vpop.f32.mrf.mxu1 }
 0x1c9   : > { %v5725_v61 = vadd.f32 %v1309_v44, %v1295_v51  ;;  %v5757_v19 = vadd.f32 %v1335_v50, %v1321_v45  ;;  %v1494_v50 = vperm.slane %v5710_v52, 1  ;;  %v1587_v51 = vld [vmem:[%s5495_s29 + $0x158] sm:$0xff] }
 0x1ca   : > { %1692 = vmatpush.msra.mxu3 %v1587_v51 }
 0x1cb   : > { %v1404_v4 = vrot.slane %v5725_v61, 2  ;;  %v1443_v5 = vrot.slane %v5725_v61, 4  ;;  %v1477_v6 = vrot.slane %v5725_v61, 6  ;;  %v1403_v53 = vrot.slane %v5757_v19, 2 }
 0x1cc   : > { %v1442_v54 = vrot.slane %v5757_v19, 4  ;;  %v1513_v37 = vmul.f32 %v1509_v18, %v5757_v19 }
 0x1cd   : > { %v1407_v13 = vsel %vm1406_vm1, %v1402_v59, %v1404_v4  ;;  %v1409_v14 = vsel %vm1406_vm1, %v1404_v4, %v1402_v59  ;;  %v1446_v15 = vsel %vm1445_vm2, %v1441_v60, %v1443_v5  ;;  %v1448_v16 = vsel %vm1445_vm2, %v1443_v5, %v1441_v60  ;;  %v1585_v5 = vld [vmem:[%s5495_s29 + $0x148] sm:$0xff] }
 0x1ce   : > { %v1415_v20 = vsel %vm1400_vm0, %v1409_v14, 0.0  ;;  %v1426_v21 = vmul.f32 %v1420_v57, %v1407_v13  ;;  %v1454_v22 = vsel %vm1439_vm3, %v1448_v16, 0.0  ;;  %v1480_v28 = vsel %vm1479_vm5, %v1475_v3, %v1477_v6  ;;  %1693 = vmatpush.msra.mxu3 %v1585_v5 }
 0x1cf   : > { %v1323_v23 = vpop.f32.mrf.mxu2  ;;  %v1424_v26 = vmul.f32 %v1420_v57, %v1415_v20  ;;  %v1482_v29 = vsel %vm1479_vm5, %v1477_v6, %v1475_v3  ;;  %v1465_v35 = vmul.f32 %v1459_v1, %v1446_v15  ;;  %v1463_v45 = vmul.f32 %v1459_v1, %v1454_v22  ;;  %v1546_v57 = vld [vmem:[%s5495_s29 + $0x10] sm:$0xff]  ;;  %v1544_v6 = vld [vmem:[%s5495_s29] sm:$0xff] }
 0x1d0   : > { %v1337_v30 = vpop.f32.mrf.mxu3  ;;  %v1435_v34 = vadd.f32 %v1429_v8, %v1426_v21  ;;  %v1488_v39 = vsel %vm1473_vm4, %v1482_v29, 0.0  ;;  %v1499_v44 = vmul.f32 %v1493_v9, %v1480_v28  ;;  %v1476_v1 = vrot.slane %v5757_v19, 6  ;;  %1627 = vmatpush.msra.mxu0 %v1546_v57  ;;  %1694 = vmatpush.msra.mxu3 %v1583_v17  ;;  %v5891_v17 = vld [vmem:[%s5498_s9 + $0x8] sm:$0xff] }
 0x1d1   : > { %v1433_v43 = vadd.f32 %v1429_v8, %v1424_v26  ;;  %v5780_v47 = vadd.f32 %v1337_v30, %v1323_v23  ;;  %v1497_v59 = vmul.f32 %v1493_v9, %v1488_v39  ;;  %v1514_v3 = vmul.f32 %v1508_v48, %v5725_v61  ;;  %v1582_v48 = vld [vmem:[%s5495_s29 + $0x130] sm:$0xff]  ;;  %v1545_v61 = vld [vmem:[%s5495_s29 + $0x8] sm:$0xff]  ;;  %v1580_v23 = vld [vmem:[%s5495_s29 + $0x120] sm:$0xff] }
 0x1d2   : > { %v1469_v55 = vadd.f32 %v1465_v35, %v1435_v34  ;;  %1628 = vmatpush.msra.mxu0 %v1544_v6  ;;  %1648 = vmatpush.msra.mxu1 %v1582_v48  ;;  %v5877_v48 = vld [vmem:[%s5498_s9 + $0x18] sm:$0xff] }
 0x1d3   : > { %v1467_v58 = vadd.f32 %v1463_v45, %v1433_v43  ;;  %v1405_v60 = vrot.slane %v5780_v47, 2  ;;  %v1444_v62 = vrot.slane %v5780_v47, 4  ;;  %v1478_v4 = vrot.slane %v5780_v47, 6  ;;  %1674 = vmatpush.msra.mxu2 %v1545_v61  ;;  %v1577_v43 = vld [vmem:[%s5495_s29 + $0x108] sm:$0xff] }
 0x1d4   : > { %v1503_v2 = vadd.f32 %v1499_v44, %v1469_v55  ;;  %1649 = vmatpush.msra.mxu1 %v1580_v23  ;;  %v1515_v42 = vmul.f32 %v1509_v18, %v5780_v47 }
 0x1d5   : > { %v1501_v7 = vadd.f32 %v1497_v59, %v1467_v58  ;;  %v1408_v8 = vsel %vm1406_vm1, %v1403_v53, %v1405_v60  ;;  %v1410_v9 = vsel %vm1406_vm1, %v1405_v60, %v1403_v53  ;;  %v1447_v12 = vsel %vm1445_vm2, %v1442_v54, %v1444_v62 }
 0x1d6   : > { %v5807_v13 = vadd.f32 %v1514_v3, %v1503_v2  ;;  %v1416_v14 = vsel %vm1400_vm0, %v1410_v9, 0.0  ;;  %v1427_v15 = vmul.f32 %v1421_v10, %v1408_v8  ;;  %v1449_v16 = vsel %vm1445_vm2, %v1444_v62, %v1442_v54  ;;  %1650 = vmatpush.msra.mxu1 %v1578_v32  ;;  %v5871_v9 = vld [vmem:[%s5505_s21 + $0x8] sm:$0xff] }
 0x1d7   : > { %v1516_v20 = vadd.f32 %v1512_v49, %v1501_v7  ;;  %v1425_v21 = vmul.f32 %v1421_v10, %v1416_v14  ;;  %v1455_v22 = vsel %vm1439_vm3, %v1449_v16, 0.0  ;;  %v1466_v36 = vmul.f32 %v1460_v11, %v1447_v12  ;;  %v1581_v10 = vld [vmem:[%s5495_s29 + $0x128] sm:$0xff]  ;;  %v5865_v7 = vld [vmem:[%s5505_s21] sm:$0xff]  ;;  %v5874_v12 = vld [vmem:[%s5498_s9 + $0x10] sm:$0xff] }
 0x1d8   : > { %v1522_v24 = vsub.f32 0.0, %v5807_v13  ;;  %v1436_v25 = vadd.f32 %v1430_v31, %v1427_v15  ;;  %v1481_v38 = vsel %vm1479_vm5, %v1476_v1, %v1478_v4  ;;  %v1464_v29 = vmul.f32 %v1460_v11, %v1455_v22  ;;  %1695 = vmatpush.msra.mxu3 %v1581_v10  ;;  %v1576_v11 = vld [vmem:[%s5495_s29 + $0x100] sm:$0xff]  ;;  %s7684_s29 = sld [smem:[#allocation111_spill]] }
 0x1d9   : > { %v1520_v26 = vsub.f32 0.0, %v1516_v20  ;;  %v1434_v28 = vadd.f32 %v1430_v31, %v1425_v21  ;;  %v1483_v30 = vsel %vm1479_vm5, %v1478_v4, %v1476_v1  ;;  %v1500_v34 = vmul.f32 %v1494_v50, %v1481_v38  ;;  %1651 = vmatpush.msra.mxu1 %v1576_v11  ;;  %v5888_v16 = vld [vmem:[%s5498_s9] sm:$0xff]  ;;  %s779_s9 = scalar_lea.vmem [#allocation20], %s5486_s13  ;;  %s4434_s13 = sshll.u32 %s7530_s23, 5 }
 0x1da   : > { %v1470_v33 = vadd.f32 %v1466_v36, %v1436_v25  ;;  %v1489_v49 = vsel %vm1473_vm4, %v1483_v30, 0.0  ;;  %v1528_v31 = vmul.f32 1.442695, %v1522_v24  ;;  %1696 = vmatpush.msra.mxu3 %v1579_v56  ;;  %v5911_v56 = vld [vmem:[%s5505_s21 + $0x18] sm:$0xff] }
 0x1db   : > { %v1524_v35 = vmul.f32 1.442695, %v1520_v26  ;;  %v1468_v39 = vadd.f32 %v1464_v29, %v1434_v28  ;;  %v1498_v46 = vmul.f32 %v1494_v50, %v1489_v49 }
 0x1dc   : > { %v1504_v41 = vadd.f32 %v1500_v34, %v1470_v33  ;;  %1697 = vmatpush.msra.mxu3 %v1577_v43  ;;  %v5908_v34 = vld [vmem:[%s5505_s21 + $0x10] sm:$0xff]  ;;  %s880_s21 = scalar_lea.vmem [#allocation21], %s5466_s19  ;;  %s3563_s19 = scalar_lea.sflag [#allocation5], %s5463_s17 }
 0x1dd   : > { %4503 = vpow2.f32 %v1524_v35  ;;  %v1502_v45 = vadd.f32 %v1498_v46, %v1468_v39  ;;  %s3575_s18 = sshll.u32 %s880_s21, 4  ;;  %s3576_s18 = int_to_ptr.vmem [resolvable:$true] %s3575_s18 }
 0x1de   : > { %v1519_v40 = vadd.f32 %v1515_v42, %v1504_v41  ;;  %4505 = vpow2.f32 %v1528_v31  ;;  %s888_s7 = scalar_lea.vmem %s7684_s29, %s3936_s26 }
 0x1df   : > { %v1517_v51 = vadd.f32 %v1513_v37, %v1502_v45 }
 0x1e0   : > { %v1523_v53 = vsub.f32 0.0, %v1519_v40 }
 0x1e1   : > { %v1521_v52 = vsub.f32 0.0, %v1517_v51 }
 0x1e2   : > { %v1530_v50 = vmul.f32 1.442695, %v1523_v53 }
 0x1e3   : > { %v4504_v54 = vpop.eup %4503  ;;  %v1526_v55 = vmul.f32 1.442695, %v1521_v52 }
 0x1e4   : > { %v1532_v44 = vadd.f32 1.0, %v4504_v54  ;;  %4507 = vpow2.f32 %v1530_v50  ;;  %v4506_v47 = vpop.eup %4505 }
 0x1e5   : > { %v1534_v57 = vadd.f32 1.0, %v4506_v47 }
 0x1e6   : > { %4509 = vrcp.f32 %v1532_v44 }
 0x1e7   : > { %4511 = vpow2.f32 %v1526_v55 }
 0x1e8   : > { %4513 = vrcp.f32 %v1534_v57 }
 0x1ea   : > { %v4508_v19 = vpop.eup %4507 }
 0x1eb   : > { %v1535_v58 = vadd.f32 1.0, %v4508_v19 }
 0x1ec   : > { %v4510_v59 = vpop.eup %4509 }
 0x1ed   : > { %v4512_v60 = vpop.eup %4511  ;;  %v5848_v62 = vmul.f32 %v4510_v59, %v1516_v20  ;;  %4515 = vrcp.f32 %v1535_v58 }
 0x1ee   : > { %v1533_v63 = vadd.f32 1.0, %v4512_v60  ;;  %v4514_v0 = vpop.eup %4513 }
 0x1ef   : > { %7531 = vst [vmem:[#allocation38_spill] sm:$0xff] %v5848_v62  ;;  %1629 = vmatmul.f32.vlgmr.msra.gmra.mxu0 %v5848_v62  ;;  %1675 = vmatmul.f32.vlgmr.msra.gmra.mxu2 %v5848_v62  ;;  %v5855_v3 = vmul.f32 %v4514_v0, %v5807_v13 }
 0x1f0   : > { %4517 = vrcp.f32 %v1533_v63 }
 0x1f1   : > { %7533 = vst [vmem:[#allocation40_spill] sm:$0xff] %v5855_v3 }
 0x1f3   : > { %v4516_v1 = vpop.eup %4515 }
 0x1f4   : > { %v5852_v2 = vmul.f32 %v4516_v1, %v1519_v40 }
 0x1f6   : > { %7532 = vst [vmem:[#allocation39_spill] sm:$0xff] %v5852_v2  ;;  %v4518_v4 = vpop.eup %4517  ;;  %v5858_v5 = vrot.slane %v5852_v2, 7 }
 0x1f7   : > { %v5860_v6 = vmul.f32 %v4518_v4, %v1517_v51  ;;  %1632 = vmatmul.f32.gmra.mxu0 %v5855_v3  ;;  %1678 = vmatmul.f32.gmra.mxu2 %v5855_v3 }
 0x1f8   : > { %v1770_v8 = vsel %vm1747_vm6, %v5855_v3, %v5858_v5  ;;  %v1773_v61 = vsel %vm1752_vm7, %v5855_v3, %v5858_v5  ;;  %v1771_v18 = vsel %vm1749_vm8, %v5855_v3, %v5858_v5  ;;  %v1775_v31 = vsel %vm1755_vm9, %v5855_v3, %v5858_v5 }
 0x1f9   : > { %7534 = vst [vmem:[#allocation41_spill] sm:$0xff] %v5860_v6  ;;  %1652 = vmatmul.f32.vlgmr.msra.gmra.mxu1 %v5860_v6  ;;  %v5884_v13 = vrot.slane %v5860_v6, 7  ;;  %1698 = vmatmul.f32.vlgmr.msra.gmra.mxu3 %v5860_v6  ;;  %v1801_v14 = vperm.slane %v1770_v8, 0  ;;  %v1802_v15 = vperm.slane %v1770_v8, 1  ;;  %v1774_v20 = vrot.slane %v1773_v61, 2 }
 0x1fa   : > { %v1772_v10 = vrot.slane %v1771_v18, 1  ;;  %v1776_v45 = vrot.slane %v1775_v31, 3  ;;  %v1779_v40 = vsel %vm1761_vm10, %v5855_v3, %v5858_v5  ;;  %v1777_v50 = vsel %vm1758_vm11, %v5855_v3, %v5858_v5 }
 0x1fb   : > { %v2049_v21 = vmul.f32 %v5865_v7, %v1801_v14  ;;  %v2050_v22 = vmul.f32 %v5871_v9, %v1802_v15  ;;  %v1887_v23 = vmul.f32 %v5874_v12, %v1801_v14  ;;  %v1888_v24 = vmul.f32 %v5877_v48, %v1802_v15 }
 0x1fc   : > { %v1885_v25 = vmul.f32 %v5888_v16, %v1801_v14  ;;  %v1886_v36 = vmul.f32 %v5891_v17, %v1802_v15  ;;  %v1748_v38 = vsel %vm1747_vm6, %v5848_v62, %v5884_v13  ;;  %v5913_v35 = vperm.slane %v1774_v20, 0 }
 0x1fd   : > { %v2129_v26 = vadd.f32 %v2050_v22, %v2049_v21  ;;  %v1968_v28 = vadd.f32 %v1888_v24, %v1887_v23  ;;  %v1785_v29 = vperm.slane %v1748_v38, 0  ;;  %v1786_v30 = vperm.slane %v1748_v38, 1 }
 0x1fe   : > { %v1965_v32 = vadd.f32 %v1886_v36, %v1885_v25  ;;  %v5920_v11 = vperm.slane %v1774_v20, 1  ;;  %v5922_v41 = vperm.slane %v1772_v10, 0  ;;  %v5926_v42 = vperm.slane %v1772_v10, 1 }
 0x1ff   : > { %2130 = vadd.xlane.f32.xlu0 %v2129_v26  ;;  %1969 = vadd.xlane.f32.xlu2 %v1968_v28  ;;  %v1853_v33 = vmul.f32 %v5888_v16, %v1785_v29  ;;  %v1854_v49 = vmul.f32 %v5891_v17, %v1786_v30  ;;  %v2017_v39 = vmul.f32 %v5865_v7, %v1785_v29  ;;  %v1780_v59 = vrot.slane %v1779_v40, 5 }
 0x200   : > { %1966 = vadd.xlane.f32.xlu1 %v1965_v32  ;;  %v2018_v46 = vmul.f32 %v5871_v9, %v1786_v30  ;;  %v2051_v43 = vmul.f32 %v5908_v34, %v1801_v14  ;;  %v2052_v37 = vmul.f32 %v5911_v56, %v1802_v15  ;;  %v1855_v53 = vmul.f32 %v5874_v12, %v1785_v29 }
 0x201   : > { %1655 = vmatmul.f32.gmra.mxu1 %v5852_v2  ;;  %1701 = vmatmul.f32.gmra.mxu3 %v5852_v2  ;;  %v1917_v51 = vadd.f32 %v1854_v49, %v1853_v33  ;;  %v1856_v52 = vmul.f32 %v5877_v48, %v1786_v30  ;;  %v1893_v55 = vmul.f32 %v5888_v16, %v5913_v35  ;;  %v5948_v63 = vperm.slane %v1776_v45, 0 }
 0x202   : > { %v2081_v54 = vadd.f32 %v2018_v46, %v2017_v39  ;;  %v1894_v44 = vmul.f32 %v5891_v17, %v5920_v11  ;;  %v1891_v47 = vmul.f32 %v5874_v12, %v5922_v41  ;;  %v1892_v57 = vmul.f32 %v5877_v48, %v5926_v42 }
 0x203   : > { %v2019_v19 = vmul.f32 %v5908_v34, %v1785_v29  ;;  %v2020_v58 = vmul.f32 %v5911_v56, %v1786_v30  ;;  %v2132_v60 = vadd.f32 %v2052_v37, %v2051_v43  ;;  %v5950_v0 = vperm.slane %v1776_v45, 1 }
 0x204   : > { %v1778_v1 = vrot.slane %v1777_v50, 4  ;;  %v1920_v4 = vadd.f32 %v1856_v52, %v1855_v53  ;;  %v1889_v8 = vmul.f32 %v5888_v16, %v5922_v41  ;;  %v1890_v61 = vmul.f32 %v5891_v17, %v5926_v42 }
 0x205   : > { %v1781_v14 = vsel %vm1764_vm12, %v5855_v3, %v5858_v5  ;;  %v1977_v15 = vadd.f32 %v1894_v44, %v1893_v55  ;;  %v1974_v18 = vadd.f32 %v1892_v57, %v1891_v47  ;;  %v2084_v20 = vadd.f32 %v2020_v58, %v2019_v19 }
 0x206   : > { %v5959_v21 = vperm.slane %v1780_v59, 0  ;;  %v5961_v22 = vperm.slane %v1780_v59, 1  ;;  %v5963_v23 = vperm.slane %v1778_v1, 0  ;;  %v1782_v24 = vrot.slane %v1781_v14, 6 }
 0x207   : > { %1918 = vadd.xlane.f32.xlu0 %v1917_v51  ;;  %2082 = vadd.xlane.f32.xlu2 %v2081_v54  ;;  %v1783_v25 = vsel %vm1767_vm13, %v5858_v5, %v5855_v3  ;;  %v1899_v36 = vmul.f32 %v5874_v12, %v5948_v63  ;;  %v1900_v38 = vmul.f32 %v5877_v48, %v5950_v0  ;;  %v1810_v26 = vperm.slane %v1778_v1, 1 }
 0x208   : > { %2133 = vadd.xlane.f32.xlu1 %v2132_v60  ;;  %v1897_v10 = vmul.f32 %v5888_v16, %v5948_v63  ;;  %v1898_v28 = vmul.f32 %v5891_v17, %v5950_v0  ;;  %v5976_v29 = vadd.f32 %v1890_v61, %v1889_v8  ;;  %v5978_v30 = vperm.slane %v1782_v24, 0 }
 0x209   : > { %v5980_v32 = vperm.slane %v1782_v24, 1  ;;  %v1905_v5 = vmul.f32 %v5888_v16, %v5959_v21  ;;  %v1895_v33 = vmul.f32 %v5874_v12, %v5913_v35  ;;  %v1896_v49 = vmul.f32 %v5877_v48, %v5920_v11 }
 0x20a   : > { %v1784_v31 = vrot.slane %v1783_v25, 7  ;;  %v1906_v39 = vmul.f32 %v5891_v17, %v5961_v22  ;;  %v1903_v46 = vmul.f32 %v5874_v12, %v5963_v23  ;;  %v2053_v43 = vmul.f32 %v5865_v7, %v5922_v41 }
 0x20b   : > { %v2054_v37 = vmul.f32 %v5871_v9, %v5926_v42  ;;  %v1904_v45 = vmul.f32 %v5877_v48, %v1810_v26  ;;  %v1901_v40 = vmul.f32 %v5888_v16, %v5963_v23  ;;  %v1902_v51 = vmul.f32 %v5891_v17, %v1810_v26 }
 0x20c   : > { %v1911_v53 = vmul.f32 %v5874_v12, %v5978_v30  ;;  %v1912_v52 = vmul.f32 %v5877_v48, %v5980_v32  ;;  %v1907_v50 = vmul.f32 %v5874_v12, %v5959_v21  ;;  %v1908_v54 = vmul.f32 %v5877_v48, %v5961_v22 }
 0x20d   : > { %v1986_v55 = vadd.f32 %v1900_v38, %v1899_v36  ;;  %v1983_v44 = vadd.f32 %v1898_v28, %v1897_v10  ;;  %v6008_v47 = vadd.f32 %v1896_v49, %v1895_v33  ;;  %v6010_v57 = vperm.slane %v1784_v31, 0 }
 0x20e   : > { %v1995_v19 = vadd.f32 %v1906_v39, %v1905_v5  ;;  %v6012_v58 = vadd.f32 %v2054_v37, %v2053_v43  ;;  %v6014_v59 = vperm.slane %v1784_v31, 1  ;;  %v2065_v60 = vmul.f32 %v5865_v7, %v5963_v23 }
 0x20f   : > { %1921 = vadd.xlane.f32.xlu0 %v1920_v4  ;;  %1978 = vadd.xlane.f32.xlu2 %v1977_v15  ;;  %v1992_v1 = vadd.f32 %v1904_v45, %v1903_v46  ;;  %v1909_v4 = vmul.f32 %v5888_v16, %v5978_v30  ;;  %v1910_v8 = vmul.f32 %v5891_v17, %v5980_v32 }
 0x210   : > { %1975 = vadd.xlane.f32.xlu1 %v1974_v18  ;;  %v2066_v61 = vmul.f32 %v5871_v9, %v1810_v26  ;;  %v6023_v14 = vadd.f32 %v1912_v52, %v1911_v53  ;;  %v6025_v15 = vadd.f32 %v1902_v51, %v1901_v40  ;;  %v6027_v18 = vadd.f32 %v1908_v54, %v1907_v50 }
 0x211   : > { %v2059_v24 = vmul.f32 %v5908_v34, %v5913_v35  ;;  %v1915_v25 = vmul.f32 %v5874_v12, %v6010_v57  ;;  %v2060_v36 = vmul.f32 %v5911_v56, %v5920_v11  ;;  %v2069_v10 = vmul.f32 %v5865_v7, %v5959_v21 }
 0x212   : > { %v6035_v38 = vadd.f32 %v2066_v61, %v2065_v60  ;;  %v1916_v28 = vmul.f32 %v5877_v48, %v6014_v59  ;;  %v2057_v5 = vmul.f32 %v5865_v7, %v5913_v35  ;;  %v2070_v33 = vmul.f32 %v5871_v9, %v5961_v22 }
 0x213   : > { %v2061_v49 = vmul.f32 %v5865_v7, %v5948_v63  ;;  %v2058_v31 = vmul.f32 %v5871_v9, %v5920_v11  ;;  %v2062_v39 = vmul.f32 %v5871_v9, %v5950_v0  ;;  %v1753_v46 = vsel %vm1752_vm7, %v5848_v62, %v5884_v13 }
 0x214   : > { %v6054_v35 = vadd.f32 %v2070_v33, %v2069_v10  ;;  %v1754_v43 = vrot.slane %v1753_v46, 2  ;;  %v1750_v37 = vsel %vm1749_vm8, %v5848_v62, %v5884_v13  ;;  %v2068_v40 = vmul.f32 %v5911_v56, %v1810_v26 }
 0x215   : > { %v6061_v45 = vadd.f32 %v2062_v39, %v2061_v49  ;;  %v1751_v11 = vrot.slane %v1750_v37, 1  ;;  %v2073_v51 = vmul.f32 %v5865_v7, %v5978_v30  ;;  %v2074_v50 = vmul.f32 %v5871_v9, %v5980_v32 }
 0x216   : > { %v6066_v53 = vperm.slane %v1754_v43, 0  ;;  %v6068_v52 = vperm.slane %v1754_v43, 1  ;;  %v1759_v54 = vsel %vm1758_vm11, %v5848_v62, %v5884_v13  ;;  %v1768_v2 = vsel %vm1767_vm13, %v5884_v13, %v5848_v62 }
 0x217   : > { %2085 = vadd.xlane.f32.xlu0 %v2084_v20  ;;  %1987 = vadd.xlane.f32.xlu2 %v1986_v55  ;;  %v2067_v20 = vmul.f32 %v5908_v34, %v5963_v23  ;;  %v1787_v23 = vperm.slane %v1751_v11, 0  ;;  %v6075_v55 = vperm.slane %v1751_v11, 1  ;;  %v1760_v26 = vrot.slane %v1759_v54, 4 }
 0x218   : > { %1984 = vadd.xlane.f32.xlu1 %v1983_v44  ;;  %v1861_v60 = vmul.f32 %v5888_v16, %v6066_v53  ;;  %v1862_v61 = vmul.f32 %v5891_v17, %v6068_v52  ;;  %v1863_v10 = vmul.f32 %v5874_v12, %v6066_v53  ;;  %v1864_v33 = vmul.f32 %v5877_v48, %v6068_v52 }
 0x219   : > { %v6077_v44 = vadd.f32 %v2068_v40, %v2067_v20  ;;  %v1857_v49 = vmul.f32 %v5888_v16, %v1787_v23  ;;  %v1858_v39 = vmul.f32 %v5891_v17, %v6075_v55  ;;  %v1859_v46 = vmul.f32 %v5874_v12, %v1787_v23 }
 0x21a   : > { %v1860_v43 = vmul.f32 %v5877_v48, %v6075_v55  ;;  %v6093_v37 = vadd.f32 %v1862_v61, %v1861_v60  ;;  %v6095_v20 = vadd.f32 %v1864_v33, %v1863_v10  ;;  %v6097_v11 = vadd.f32 %v2074_v50, %v2073_v51 }
 0x21b   : > { %v6099_v40 = vperm.slane %v1760_v26, 0  ;;  %v6102_v54 = vadd.f32 %v1858_v39, %v1857_v49  ;;  %v6106_v3 = vperm.slane %v1760_v26, 1  ;;  %v1756_v60 = vsel %vm1755_vm9, %v5848_v62, %v5884_v13 }
 0x21c   : > { %7535 = vst [vmem:[#allocation42_spill] sm:$0xff] %v6097_v11  ;;  %v6104_v27 = vadd.f32 %v1860_v43, %v1859_v46  ;;  %v2001_v61 = vadd.f32 %v1910_v8, %v1909_v4  ;;  %v1757_v50 = vrot.slane %v1756_v60, 3  ;;  %v6118_v10 = vadd.f32 %v2060_v36, %v2059_v24 }
 0x21d   : > { %v1869_v51 = vmul.f32 %v5888_v16, %v6099_v40  ;;  %v1870_v26 = vmul.f32 %v5891_v17, %v6106_v3  ;;  %v6122_v49 = vadd.f32 %v2058_v31, %v2057_v5  ;;  %v1871_v8 = vmul.f32 %v5874_v12, %v6099_v40 }
 0x21e   : > { %v6126_v4 = vperm.slane %v1757_v50, 1  ;;  %v1872_v24 = vmul.f32 %v5877_v48, %v6106_v3  ;;  %v1769_v11 = vrot.slane %v1768_v2, 7 }
 0x21f   : > { %1972 = vadd.xlane.f32.xlu0 %v5976_v29  ;;  %1996 = vadd.xlane.f32.xlu2 %v1995_v19  ;;  %v1762_v29 = vsel %vm1761_vm10, %v5848_v62, %v5884_v13  ;;  %v6116_v19 = vadd.f32 %v1916_v28, %v1915_v25  ;;  %v6130_v39 = vadd.f32 %v1870_v26, %v1869_v51 }
 0x220   : > { %1993 = vadd.xlane.f32.xlu1 %v1992_v1  ;;  %v1763_v33 = vrot.slane %v1762_v29, 5  ;;  %v6124_v1 = vperm.slane %v1757_v50, 0  ;;  %v1868_v28 = vmul.f32 %v5877_v48, %v6126_v4  ;;  %v1866_v31 = vmul.f32 %v5891_v17, %v6126_v4 }
 0x221   : > { %7536 = vst [vmem:[#allocation43_spill] sm:$0xff] %v6130_v39 }
 0x222   : > { %v6132_v46 = vperm.slane %v1763_v33, 0  ;;  %v6134_v25 = vperm.slane %v1763_v33, 1  ;;  %v1867_v36 = vmul.f32 %v5874_v12, %v6124_v1  ;;  %v1865_v5 = vmul.f32 %v5888_v16, %v6124_v1 }
 0x223   : > { %v6158_v33 = vadd.f32 %v1872_v24, %v1871_v8  ;;  %v2023_v24 = vmul.f32 %v5908_v34, %v1787_v23  ;;  %v2029_v2 = vmul.f32 %v5865_v7, %v6124_v1 }
 0x224   : > { %v1875_v43 = vmul.f32 %v5874_v12, %v6132_v46  ;;  %v1876_v60 = vmul.f32 %v5877_v48, %v6134_v25  ;;  %v1873_v51 = vmul.f32 %v5888_v16, %v6132_v46  ;;  %v1874_v50 = vmul.f32 %v5891_v17, %v6134_v25 }
 0x225   : > { %v6154_v29 = vadd.f32 %v1868_v28, %v1867_v36  ;;  %v6156_v26 = vadd.f32 %v1866_v31, %v1865_v5  ;;  %7537 = vst [vmem:[#allocation44_spill] sm:$0xff] %v6158_v33  ;;  %v1765_v36 = vsel %vm1764_vm12, %v5848_v62, %v5884_v13  ;;  %v2024_v28 = vmul.f32 %v5911_v56, %v6075_v55 }
 0x226   : > { %v6165_v6 = vadd.f32 %v1876_v60, %v1875_v43  ;;  %v6167_v39 = vadd.f32 %v1874_v50, %v1873_v51  ;;  %v1766_v8 = vrot.slane %v1765_v36, 6  ;;  %v1799_v5 = vperm.slane %v1769_v11, 0 }
 0x227   : > { %1981 = vadd.xlane.f32.xlu0 %v6008_v47  ;;  %2005 = vadd.xlane.f32.xlu2 %v6023_v14  ;;  %v2021_v47 = vmul.f32 %v5865_v7, %v1787_v23  ;;  %v1800_v14 = vperm.slane %v1769_v11, 1  ;;  %v2022_v31 = vmul.f32 %v5871_v9, %v6075_v55  ;;  %v6180_v13 = vadd.f32 %v2024_v28, %v2023_v24 }
 0x228   : > { %2002 = vadd.xlane.f32.xlu1 %v2001_v61  ;;  %v1797_v43 = vperm.slane %v1766_v8, 0  ;;  %v1798_v60 = vperm.slane %v1766_v8, 1  ;;  %v2030_v61 = vmul.f32 %v5871_v9, %v6126_v4  ;;  %v1881_v51 = vmul.f32 %v5888_v16, %v1799_v5 }
 0x229   : > { %7538 = vst [vmem:[#allocation45_spill] sm:$0xff] %v6180_v13  ;;  %v1882_v50 = vmul.f32 %v5891_v17, %v1800_v14  ;;  %v6186_v23 = vadd.f32 %v2022_v31, %v2021_v47  ;;  %v1883_v11 = vmul.f32 %v5874_v12, %v1799_v5  ;;  %v1884_v28 = vmul.f32 %v5877_v48, %v1800_v14 }
 0x22a   : > { %v1879_v55 = vmul.f32 %v5874_v12, %v1797_v43  ;;  %v1880_v36 = vmul.f32 %v5877_v48, %v1798_v60  ;;  %v1877_v62 = vmul.f32 %v5888_v16, %v1797_v43  ;;  %v1878_v8 = vmul.f32 %v5891_v17, %v1798_v60 }
 0x22b   : > { %7539 = vst [vmem:[#allocation46_spill] sm:$0xff] %v6186_v23  ;;  %v6193_v24 = vadd.f32 %v1882_v50, %v1881_v51  ;;  %v6196_v13 = vadd.f32 %v2030_v61, %v2029_v2  ;;  %v2027_v47 = vmul.f32 %v5908_v34, %v6066_v53  ;;  %v2028_v12 = vmul.f32 %v5911_v56, %v6068_v52 }
 0x22c   : > { %v6200_v31 = vadd.f32 %v1880_v36, %v1879_v55  ;;  %v6202_v23 = vadd.f32 %v1878_v8, %v1877_v62  ;;  %v2025_v33 = vmul.f32 %v5865_v7, %v6066_v53  ;;  %v6210_v48 = vadd.f32 %v1884_v28, %v1883_v11 }
 0x22d   : > { %v2026_v2 = vmul.f32 %v5871_v9, %v6068_v52  ;;  %v2035_v61 = vmul.f32 %v5908_v34, %v6099_v40  ;;  %v6217_v62 = vadd.f32 %v2028_v12, %v2027_v47  ;;  %v2036_v51 = vmul.f32 %v5911_v56, %v6106_v3 }
 0x22e   : > { %v2031_v52 = vmul.f32 %v5908_v34, %v6124_v1  ;;  %v2032_v50 = vmul.f32 %v5911_v56, %v6126_v4  ;;  %v2042_v36 = vmul.f32 %v5871_v9, %v1798_v60  ;;  %v2037_v1 = vmul.f32 %v5865_v7, %v6132_v46 }
 0x22f   : > { %1990 = vadd.xlane.f32.xlu0 %v6025_v15  ;;  %2136 = vadd.xlane.f32.xlu2 %v6012_v58  ;;  %v2033_v15 = vmul.f32 %v5865_v7, %v6099_v40  ;;  %v2034_v58 = vmul.f32 %v5871_v9, %v6106_v3  ;;  %v6225_v53 = vadd.f32 %v2026_v2, %v2025_v33 }
 0x230   : > { %2011 = vadd.xlane.f32.xlu1 %v6116_v19  ;;  %v2041_v19 = vmul.f32 %v5865_v7, %v1797_v43  ;;  %v6232_v11 = vadd.f32 %v2036_v51, %v2035_v61  ;;  %v2039_v40 = vmul.f32 %v5908_v34, %v6132_v46  ;;  %v6239_v3 = vadd.f32 %v2032_v50, %v2031_v52 }
 0x231   : > { %v6234_v55 = vadd.f32 %v2034_v58, %v2033_v15  ;;  %v2040_v33 = vmul.f32 %v5911_v56, %v6134_v25  ;;  %v2038_v4 = vmul.f32 %v5871_v9, %v6134_v25  ;;  %v2047_v28 = vmul.f32 %v5908_v34, %v1799_v5 }
 0x232   : > { %v6247_v8 = vadd.f32 %v2042_v36, %v2041_v19  ;;  %v2048_v47 = vmul.f32 %v5911_v56, %v1800_v14  ;;  %v2045_v12 = vmul.f32 %v5865_v7, %v1799_v5  ;;  %v2046_v51 = vmul.f32 %v5871_v9, %v1800_v14 }
 0x233   : > { %v6252_v2 = vadd.f32 %v2040_v33, %v2039_v40  ;;  %v6254_v61 = vadd.f32 %v2038_v4, %v2037_v1  ;;  %v2043_v15 = vmul.f32 %v5908_v34, %v1797_v43  ;;  %v2044_v25 = vmul.f32 %v5911_v56, %v1798_v60  ;;  %v1363_v33 = vpop.f32.mrf.mxu1  ;;  %v7544_v4 = vld [vmem:[#allocation42_spill] sm:$0xff] }
 0x234   : > { %v6258_v46 = vadd.f32 %v2048_v47, %v2047_v28  ;;  %v2077_v58 = vmul.f32 %v5865_v7, %v6010_v57  ;;  %v2078_v52 = vmul.f32 %v5871_v9, %v6014_v59  ;;  %v6267_v5 = vadd.f32 %v2046_v51, %v2045_v12  ;;  %v7549_v51 = vld [vmem:[#allocation46_spill] sm:$0xff] }
 0x235   : > { %v2075_v14 = vmul.f32 %v5908_v34, %v5978_v30  ;;  %v2076_v43 = vmul.f32 %v5911_v56, %v5980_v32  ;;  %v6274_v60 = vadd.f32 %v2044_v25, %v2043_v15  ;;  %v2079_v9 = vmul.f32 %v5908_v34, %v6010_v57 }
 0x236   : > { %v6276_v7 = vadd.f32 %v2078_v52, %v2077_v58  ;;  %v1914_v30 = vmul.f32 %v5891_v17, %v6014_v59  ;;  %v2063_v32 = vmul.f32 %v5908_v34, %v5948_v63  ;;  %v2056_v17 = vmul.f32 %v5911_v56, %v5926_v42 }
 0x237   : > { %1999 = vadd.xlane.f32.xlu0 %v6027_v18  ;;  %2145 = vadd.xlane.f32.xlu2 %v6118_v10  ;;  %v2080_v18 = vmul.f32 %v5911_v56, %v6014_v59  ;;  %v1913_v10 = vmul.f32 %v5888_v16, %v6010_v57  ;;  %v6286_v50 = vadd.f32 %v2076_v43, %v2075_v14 }
 0x238   : > { %2142 = vadd.xlane.f32.xlu1 %v6122_v49  ;;  %v2064_v49 = vmul.f32 %v5911_v56, %v5950_v0  ;;  %v2055_v16 = vmul.f32 %v5908_v34, %v5922_v41  ;;  %v2071_v63 = vmul.f32 %v5908_v34, %v5959_v21  ;;  %v2072_v0 = vmul.f32 %v5911_v56, %v5961_v22  ;;  %v1377_v41 = vpop.f32.mrf.mxu2  ;;  %v1391_v34 = vpop.f32.mrf.mxu3 }
 0x239   : > { %v6292_v19 = vadd.f32 %v2080_v18, %v2079_v9  ;;  %v2007_v36 = vadd.f32 %v1914_v30, %v1913_v10  ;;  %v6309_v42 = vadd.f32 %v1391_v34, %v1377_v41 }
 0x23a   : > { %v2150_v40 = vadd.f32 %v2064_v49, %v2063_v32  ;;  %v2138_v57 = vadd.f32 %v2056_v17, %v2055_v16  ;;  %v2162_v59 = vadd.f32 %v2072_v0, %v2071_v63 }
 0x23b   : > { %7541 = vst [vmem:[#allocation48_spill] sm:$0xff] %v6309_v42  ;;  %v1365_v21 = vpop.f32.mrf.mxu1 }
 0x23f   : > { %2008 = vadd.xlane.f32.xlu0 %v2007_v36  ;;  %2154 = vadd.xlane.f32.xlu2 %v6035_v38  ;;  %v1349_v38 = vpop.f32.mrf.mxu0 }
 0x240   : > { %2151 = vadd.xlane.f32.xlu1 %v2150_v40  ;;  %v6304_v1 = vadd.f32 %v1363_v33, %v1349_v38 }
 0x242   : > { %7540 = vst [vmem:[#allocation47_spill] sm:$0xff] %v6304_v1 }
 0x247   : > { %2139 = vadd.xlane.f32.xlu0 %v2138_v57  ;;  %2163 = vadd.xlane.f32.xlu2 %v2162_v59  ;;  %v1351_v56 = vpop.f32.mrf.mxu0 }
 0x248   : > { %2160 = vadd.xlane.f32.xlu1 %v6054_v35  ;;  %v6311_v22 = vadd.f32 %v1365_v21, %v1351_v56  ;;  %v1379_v35 = vpop.f32.mrf.mxu2 }
 0x24a   : > { %7542 = vst [vmem:[#allocation49_spill] sm:$0xff] %v6311_v22 }
 0x24f   : > { %2148 = vadd.xlane.f32.xlu0 %v6061_v45  ;;  %1930 = vadd.xlane.f32.xlu2 %v6093_v37  ;;  %v1393_v45 = vpop.f32.mrf.mxu3 }
 0x250   : > { %1924 = vadd.xlane.f32.xlu1 %v6102_v54  ;;  %v6316_v37 = vadd.f32 %v1393_v45, %v1379_v35  ;;  %v7545_v54 = vld [vmem:[#allocation43_spill] sm:$0xff]  ;;  %v7553_v45 = vld [vmem:[#allocation41_spill] sm:$0xff] }
 0x252   : > { %7543 = vst [vmem:[#allocation50_spill] sm:$0xff] %v6316_v37 }
 0x257   : > { %2157 = vadd.xlane.f32.xlu0 %v6077_v44  ;;  %1933 = vadd.xlane.f32.xlu2 %v6095_v20  ;;  %v7547_v44 = vld [vmem:[#allocation44_spill] sm:$0xff] }
 0x258   : > { %1927 = vadd.xlane.f32.xlu1 %v6104_v27  ;;  %v894_v27 = vld [vmem:[%s884_s27] sm:$0x3] }
 0x259   : > { %v1609_v20 = vperm.slane %v894_v27, 0  ;;  %v1610_v47 = vperm.slane %v894_v27, 1 }
 0x25f   : > { %2166 = vadd.xlane.f32.xlu0 %v7544_v4  ;;  %1942 = vadd.xlane.f32.xlu2 %v7545_v54 }
 0x260   : > { %1939 = vadd.xlane.f32.xlu1 %v6154_v29 }
 0x267   : > { %1936 = vadd.xlane.f32.xlu0 %v6156_v26  ;;  %1951 = vadd.xlane.f32.xlu2 %v6165_v6 }
 0x268   : > { %1948 = vadd.xlane.f32.xlu1 %v6167_v39  ;;  %v7548_v39 = vld [vmem:[#allocation45_spill] sm:$0xff] }
 0x26c   : > { %v1630_v29 = vpop.f32.mrf.mxu0 }
 0x26d   : > { %v1631_v26 = vadd.f32 %v1630_v29, %v1609_v20  ;;  %v6389_v29 = vld [vmem:[%s5508_s20 + $0x8] sm:$0xff] }
 0x26f   : > { %1945 = vadd.xlane.f32.xlu0 %v7547_v44  ;;  %1960 = vadd.xlane.f32.xlu2 %v6193_v24 }
 0x270   : > { %1957 = vadd.xlane.f32.xlu1 %v6200_v31 }
 0x272   : > { %v1676_v12 = vpop.f32.mrf.mxu2  ;;  %v6340_v15 = vpop.xlane.xlu0 %2130 }
 0x273   : > { %7550 = vst [vmem:[#allocation42_spill] sm:$0xff] %v6340_v15  ;;  %v1677_v24 = vadd.f32 %v1676_v12, %v1610_v47  ;;  %v6342_v14 = vpop.xlane.xlu2 %1969 }
 0x274   : > { %7551 = vst [vmem:[#allocation43_spill] sm:$0xff] %v6342_v14  ;;  %v1633_v32 = vpop.f32.mrf.mxu0 }
 0x276   : > { %v1653_v28 = vpop.f32.mrf.mxu1 }
 0x277   : > { %v1654_v6 = vadd.f32 %v1653_v28, %v1631_v26  ;;  %1954 = vadd.xlane.f32.xlu0 %v6202_v23  ;;  %2091 = vadd.xlane.f32.xlu2 %v7548_v39  ;;  %v6347_v23 = vpop.xlane.xlu1 %1966  ;;  %v6396_v39 = vld [vmem:[%s5508_s20 + $0x18] sm:$0xff] }
 0x278   : > { %2088 = vadd.xlane.f32.xlu1 %v7549_v51 }
 0x279   : > { %v1709_v25 = vmin.f32 %v1654_v6, 20.0  ;;  %vm1705_vm15 = vcmp.gt.f32.partialorder %v1654_v6, 20.0 }
 0x27a   : > { %v6349_v10 = vpop.xlane.xlu0 %1918  ;;  %v1679_v17 = vpop.f32.mrf.mxu2 }
 0x27b   : > { %v1713_v58 = vmul.f32 1.442695, %v1709_v25  ;;  %v6354_v49 = vpop.xlane.xlu2 %2082  ;;  %v1680_v0 = vadd.f32 %v1679_v17, %v1610_v47  ;;  %v6393_v47 = vld [vmem:[%s5508_s20 + $0x10] sm:$0xff]  ;;  %v3203_v17 = vsub.f32 0.0, %v6311_v22 }
 0x27c   : > { %v1699_v52 = vpop.f32.mrf.mxu3 }
 0x27d   : > { %4519 = vpow2.f32 %v1713_v58  ;;  %v1700_v31 = vadd.f32 %v1699_v52, %v1677_v24 }
 0x27e   : > { %v1656_v40 = vpop.f32.mrf.mxu1 }
 0x27f   : > { %v1710_v43 = vmin.f32 %v1700_v31, 20.0  ;;  %1963 = vadd.xlane.f32.xlu0 %v6210_v48  ;;  %2100 = vadd.xlane.f32.xlu2 %v6196_v13  ;;  %v1634_v13 = vadd.f32 %v1633_v32, %v1609_v20  ;;  %v6356_v36 = vpop.xlane.xlu1 %2133  ;;  %vm1706_vm14 = vcmp.gt.f32.partialorder %v1700_v31, 20.0  ;;  %v6386_v20 = vld [vmem:[%s5508_s20] sm:$0xff] }
 0x280   : > { %2097 = vadd.xlane.f32.xlu1 %v6217_v62  ;;  %7552 = vst [vmem:[#allocation44_spill] sm:$0xff] %v6356_v36 }
 0x281   : > { %v1715_v9 = vmul.f32 1.442695, %v1710_v43  ;;  %v6358_v16 = vadd.f32 %v1656_v40, %v1634_v13  ;;  %v7554_v43 = vld [vmem:[#allocation38_spill] sm:$0xff] }
 0x283   : > { %v4520_v18 = vpop.eup %4519  ;;  %4521 = vpow2.f32 %v1715_v9  ;;  %v6369_v41 = vpop.xlane.xlu2 %1978  ;;  %vm1707_vm0 = vcmp.gt.f32.partialorder %v6358_v16, 20.0 }
 0x284   : > { %v1721_v30 = vadd.f32 1.0, %v4520_v18  ;;  %v1702_v63 = vpop.f32.mrf.mxu3 }
 0x286   : > { %4523 = vlog2.f32 %v1721_v30 }
 0x287   : > { %2094 = vadd.xlane.f32.xlu0 %v6225_v53  ;;  %2109 = vadd.xlane.f32.xlu2 %v6232_v11  ;;  %v6360_v53 = vpop.xlane.xlu0 %1921  ;;  %v1711_v11 = vmin.f32 %v6358_v16, 20.0  ;;  %v6371_v35 = vpop.xlane.xlu1 %1975 }
 0x288   : > { %2106 = vadd.xlane.f32.xlu1 %v6234_v55  ;;  %v6363_v55 = vadd.f32 %v1702_v63, %v1680_v0 }
 0x289   : > { %v4522_v48 = vpop.eup %4521  ;;  %v1717_v59 = vmul.f32 1.442695, %v1711_v11 }
 0x28a   : > { %v1722_v62 = vadd.f32 1.0, %v4522_v48  ;;  %v1712_v38 = vmin.f32 %v6363_v55, 20.0  ;;  %vm1708_vm1 = vcmp.gt.f32.partialorder %v6363_v55, 20.0 }
 0x28b   : > { %v6404_v24 = vpop.xlane.xlu2 %1987 }
 0x28c   : > { %4525 = vlog2.f32 %v1722_v62  ;;  %v4524_v57 = vpop.eup %4523  ;;  %v1719_v21 = vmul.f32 1.442695, %v1712_v38  ;;  %v3202_v62 = vsub.f32 0.0, %v6309_v42 }
 0x28d   : > { %4527 = vpow2.f32 %v1717_v59  ;;  %v1726_v34 = vmul.f32 0.6931472, %v4524_v57 }
 0x28e   : > { %4529 = vpow2.f32 %v1719_v21 }
 0x28f   : > { %2103 = vadd.xlane.f32.xlu0 %v6239_v3  ;;  %2118 = vadd.xlane.f32.xlu2 %v6247_v8  ;;  %v6378_v54 = vpop.xlane.xlu0 %2085  ;;  %v6406_v52 = vpop.xlane.xlu1 %1984 }
 0x290   : > { %2115 = vadd.xlane.f32.xlu1 %v6252_v2  ;;  %v6375_v2 = vsel %vm1705_vm15, %v1654_v6, %v1726_v34 }
 0x291   : > { %v6411_v9 = vmul.f32 %v6375_v2, %v7554_v43 }
 0x292   : > { %v4526_v33 = vpop.eup %4525 }
 0x293   : > { %v1728_v56 = vmul.f32 0.6931472, %v4526_v33  ;;  %v4528_v27 = vpop.eup %4527  ;;  %v6423_v33 = vpop.xlane.xlu2 %1996 }
 0x294   : > { %v1723_v6 = vadd.f32 1.0, %v4528_v27 }
 0x295   : > { %v1734_v3 = vsel %vm1706_vm14, %v1700_v31, %v1728_v56  ;;  %v3201_v31 = vsub.f32 0.0, %v6304_v1  ;;  %v3204_v56 = vsub.f32 0.0, %v6316_v37 }
 0x296   : > { %v6373_v8 = vrot.slane %v1734_v3, 7  ;;  %v1738_v4 = vmul.f32 %v1734_v3, %v7553_v45  ;;  %4531 = vlog2.f32 %v1723_v6 }
 0x297   : > { %2112 = vadd.xlane.f32.xlu0 %v6254_v61  ;;  %2127 = vadd.xlane.f32.xlu2 %v6258_v46  ;;  %v4530_v61 = vpop.eup %4529  ;;  %v3205_v40 = vmul.f32 1.442695, %v3201_v31  ;;  %v6421_v63 = vpop.xlane.xlu0 %1972 }
 0x298   : > { %v2183_v44 = vsel %vm1747_vm6, %v6375_v2, %v6373_v8  ;;  %2124 = vadd.xlane.f32.xlu1 %v6267_v5  ;;  %v6398_v46 = vrot.slane %v1738_v4, 7  ;;  %v1724_v25 = vadd.f32 1.0, %v4530_v61 }
 0x299   : > { %v2213_v26 = vperm.slane %v2183_v44, 0  ;;  %v2214_v28 = vperm.slane %v2183_v44, 1 }
 0x29a   : > { %4533 = vlog2.f32 %v1724_v25  ;;  %v2479_v48 = vsel %vm1747_vm6, %v6411_v9, %v6398_v46  ;;  %v7556_v25 = vld [vmem:[#allocation39_spill] sm:$0xff] }
 0x29b   : > { %v2281_v12 = vmul.f32 %v6386_v20, %v2213_v26  ;;  %v2282_v51 = vmul.f32 %v6389_v29, %v2214_v28  ;;  %v2283_v58 = vmul.f32 %v6393_v47, %v2213_v26  ;;  %v2284_v5 = vmul.f32 %v6396_v39, %v2214_v28 }
 0x29c   : > { %v4532_v0 = vpop.eup %4531  ;;  %v2509_v11 = vperm.slane %v2479_v48, 0  ;;  %v2510_v57 = vperm.slane %v2479_v48, 1 }
 0x29d   : > { %v2345_v18 = vmul.f32 1.442695, %v2281_v12  ;;  %v2347_v30 = vmul.f32 1.442695, %v2282_v51  ;;  %v2349_v32 = vmul.f32 1.442695, %v2283_v58 }
 0x29e   : > { %v2351_v13 = vmul.f32 1.442695, %v2284_v5  ;;  %v1730_v59 = vmul.f32 0.6931472, %v4532_v0  ;;  %v2573_v4 = vmul.f32 %v2509_v11, %v6349_v10  ;;  %v2574_v26 = vmul.f32 %v2510_v57, %v6349_v10 }
 0x29f   : > { %4535 = vpow2.f32 %v2345_v18  ;;  %2121 = vadd.xlane.f32.xlu0 %v6274_v60  ;;  %2172 = vadd.xlane.f32.xlu2 %v6276_v7  ;;  %v3207_v60 = vmul.f32 1.442695, %v3202_v62  ;;  %v6425_v7 = vpop.xlane.xlu1 %1993  ;;  %v2575_v5 = vmul.f32 %v2509_v11, %v6360_v53 }
 0x2a0   : > { %4537 = vpow2.f32 %v2347_v30  ;;  %2169 = vadd.xlane.f32.xlu1 %v6286_v50  ;;  %v4534_v38 = vpop.eup %4533  ;;  %v3209_v50 = vmul.f32 1.442695, %v3203_v17  ;;  %v6433_v6 = vsel %vm1707_vm0, %v6358_v16, %v1730_v59  ;;  %v2576_v16 = vmul.f32 %v2510_v57, %v6360_v53  ;;  %v1982_v30 = vpop.xlane.xlu0 %1981 }
 0x2a1   : > { %4539 = vpow2.f32 %v2349_v32  ;;  %v1732_v21 = vmul.f32 0.6931472, %v4534_v38  ;;  %7555 = vst [vmem:[#allocation45_spill] sm:$0xff] %v6433_v6  ;;  %v2006_v38 = vpop.xlane.xlu2 %2005 }
 0x2a2   : > { %4541 = vpow2.f32 %v2351_v13 }
 0x2a3   : > { %4543 = vpow2.f32 %v3205_v40  ;;  %v6436_v61 = vsel %vm1708_vm1, %v6363_v55, %v1732_v21  ;;  %v6459_v40 = vmul.f32 1.442695, %v3204_v56 }
 0x2a4   : > { %v1740_v58 = vmul.f32 %v6436_v61, %v7556_v25  ;;  %4545 = vpow2.f32 %v3207_v60 }
 0x2a5   : > { %v4536_v34 = vpop.eup %4535  ;;  %4547 = vpow2.f32 %v3209_v50  ;;  %7559 = vst [vmem:[#allocation51_spill] sm:$0xff] %v6459_v40 }
 0x2a6   : > { %v4538_v3 = vpop.eup %4537  ;;  %v2637_v27 = vmul.f32 0.0, %v4536_v34  ;;  %v6453_v48 = vrot.slane %v1740_v58, 7 }
 0x2a7   : > { %v4540_v44 = vpop.eup %4539  ;;  %v2638_v28 = vmul.f32 0.0, %v4538_v3  ;;  %2175 = vadd.xlane.f32.xlu0 %v6292_v19  ;;  %v7557_v19 = vld [vmem:[#allocation40_spill] sm:$0xff]  ;;  %v6476_v60 = vpop.xlane.xlu1 %2002 }
 0x2a8   : > { %v4542_v12 = vpop.eup %4541  ;;  %v6439_v51 = vadd.f32 %v2637_v27, %v2573_v4  ;;  %v2639_v31 = vmul.f32 0.0, %v4540_v44  ;;  %v6451_v32 = vmul.f32 %v6433_v6, %v7557_v19 }
 0x2a9   : > { %v6444_v10 = vadd.f32 %v2638_v28, %v2574_v26  ;;  %v2640_v18 = vmul.f32 0.0, %v4542_v12  ;;  %v6457_v62 = vpop.eup %4543  ;;  %v6523_v1 = vpop.xlane.xlu2 %2136 }
 0x2aa   : > { %v2653_v55 = vmul.f32 %v6439_v51, %v6354_v49  ;;  %v6455_v13 = vadd.f32 %v2639_v31, %v2575_v5  ;;  %7558 = vst [vmem:[#allocation46_spill] sm:$0xff] %v6457_v62  ;;  %v2497_v0 = vsel %vm1752_vm7, %v6451_v32, %v6453_v48  ;;  %v2495_v11 = vsel %vm1749_vm8, %v6451_v32, %v6453_v48  ;;  %v6489_v44 = vpop.eup %4545 }
 0x2ab   : > { %v2654_v53 = vmul.f32 %v6444_v10, %v6354_v49  ;;  %v6463_v17 = vadd.f32 %v2640_v18, %v2576_v16  ;;  %v2499_v59 = vsel %vm1755_vm9, %v6451_v32, %v6453_v48  ;;  %v2498_v49 = vrot.slane %v2497_v0, 2  ;;  %7560 = vst [vmem:[#allocation52_spill] sm:$0xff] %v6489_v44  ;;  %v6491_v18 = vpop.eup %4547 }
 0x2ac   : > { %v2655_v57 = vmul.f32 %v6455_v13, %v6378_v54  ;;  %v2496_v34 = vrot.slane %v2495_v11, 1  ;;  %v2500_v56 = vrot.slane %v2499_v59, 3  ;;  %v2503_v3 = vsel %vm1761_vm10, %v6451_v32, %v6453_v48  ;;  %7561 = vst [vmem:[#allocation53_spill] sm:$0xff] %v6491_v18  ;;  %v1991_v59 = vpop.xlane.xlu0 %1990 }
 0x2ad   : > { %v2656_v50 = vmul.f32 %v6463_v17, %v6378_v54  ;;  %v2501_v4 = vsel %vm1758_vm11, %v6451_v32, %v6453_v48  ;;  %v2505_v27 = vsel %vm1764_vm12, %v6451_v32, %v6453_v48  ;;  %v2529_v26 = vperm.slane %v2498_v49, 0  ;;  %7572 = vst [vmem:[#allocation64_spill] sm:$0xff] %v6523_v1 }
 0x2ae   : > { %v2661_v21 = vadd.f32 %v2655_v57, %v2653_v55  ;;  %v2530_v28 = vperm.slane %v2498_v49, 1  ;;  %v2527_v12 = vperm.slane %v2496_v34, 0  ;;  %v2528_v54 = vperm.slane %v2496_v34, 1 }
 0x2af   : > { %v2668_v5 = vadd.f32 %v2656_v50, %v2654_v53  ;;  %v2531_v31 = vperm.slane %v2500_v56, 0  ;;  %v2532_v16 = vperm.slane %v2500_v56, 1  ;;  %v6494_v55 = vmul.f32 %v2529_v26, %v6369_v41 }
 0x2b0   : > { %v2662_v58 = vrot.slane %v2661_v21, 4  ;;  %v6497_v0 = vmul.f32 %v2530_v28, %v6369_v41  ;;  %v6500_v11 = vmul.f32 %v2527_v12, %v6371_v35  ;;  %v6503_v57 = vmul.f32 %v2528_v54, %v6371_v35 }
 0x2b1   : > { %7562 = vst [vmem:[#allocation54_spill] sm:$0xff] %v6494_v55  ;;  %v2669_v34 = vrot.slane %v2668_v5, 4  ;;  %v6506_v53 = vmul.f32 %v2531_v31, %v6404_v24  ;;  %v6509_v50 = vmul.f32 %v2532_v16, %v6404_v24  ;;  %v6512_v56 = vmul.f32 %v2531_v31, %v6406_v52  ;;  %v2012_v24 = vpop.xlane.xlu1 %2011 }
 0x2b2   : > { %7563 = vst [vmem:[#allocation55_spill] sm:$0xff] %v6497_v0  ;;  %v2663_v49 = vadd.f32 %v2662_v58, %v2661_v21  ;;  %v6515_v41 = vmul.f32 %v2532_v16, %v6406_v52  ;;  %v6518_v37 = vmul.f32 %v2527_v12, %v6421_v63  ;;  %v6521_v35 = vmul.f32 %v2528_v54, %v6421_v63 }
 0x2b3   : > { %7564 = vst [vmem:[#allocation56_spill] sm:$0xff] %v6500_v11  ;;  %v2670_v58 = vadd.f32 %v2669_v34, %v2668_v5  ;;  %v2504_v22 = vrot.slane %v2503_v3, 5  ;;  %v2502_v42 = vrot.slane %v2501_v4, 4  ;;  %v6525_v25 = vmul.f32 %v2529_v26, %v1982_v30 }
 0x2b4   : > { %7565 = vst [vmem:[#allocation57_spill] sm:$0xff] %v6503_v57  ;;  %v2664_v21 = vrot.slane %v2663_v49, 2  ;;  %v6527_v31 = vmul.f32 %v2530_v28, %v1982_v30  ;;  %v2506_v19 = vrot.slane %v2505_v27, 6  ;;  %v2507_v52 = vsel %vm1767_vm13, %v6453_v48, %v6451_v32 }
 0x2b5   : > { %7566 = vst [vmem:[#allocation58_spill] sm:$0xff] %v6506_v53  ;;  %v7575_v12 = vlaneseq  ;;  %v7576_v63 = vmov 0  ;;  %v2671_v3 = vrot.slane %v2670_v58, 2  ;;  %v2535_v4 = vperm.slane %v2504_v22, 0 }
 0x2b6   : > { %7567 = vst [vmem:[#allocation59_spill] sm:$0xff] %v6509_v50  ;;  %v2665_v54 = vadd.f32 %v2664_v21, %v2663_v49  ;;  %v2536_v5 = vperm.slane %v2504_v22, 1  ;;  %v2533_v16 = vperm.slane %v2502_v42, 0  ;;  %v2534_v34 = vperm.slane %v2502_v42, 1  ;;  %v2000_v42 = vpop.xlane.xlu0 %1999 }
 0x2b7   : > { %7568 = vst [vmem:[#allocation60_spill] sm:$0xff] %v6512_v56  ;;  %vm6533_vm2 = vcmp.lt.s32.totalorder %v7575_v12, 256  ;;  %v2537_v26 = vperm.slane %v2506_v19, 0  ;;  %v2538_v45 = vperm.slane %v2506_v19, 1  ;;  %v2672_v28 = vadd.f32 %v2671_v3, %v2670_v58 }
 0x2b8   : > { %7569 = vst [vmem:[#allocation61_spill] sm:$0xff] %v6515_v41  ;;  %v7577_v63 = vsel %vm6533_vm2, 4294967295, %v7576_v63  ;;  %v2666_v30 = vrot.slane %v2665_v54, 1  ;;  %v6538_v27 = vmul.f32 %v2535_v4, %v6423_v33  ;;  %v6541_v43 = vmul.f32 %v2536_v5, %v6423_v33 }
 0x2b9   : > { %7570 = vst [vmem:[#allocation62_spill] sm:$0xff] %v6518_v37  ;;  %v6544_v12 = vmul.f32 %v2533_v16, %v6425_v7  ;;  %v6547_v49 = vmul.f32 %v2534_v34, %v6425_v7  ;;  %v6549_v21 = vmul.f32 %v2537_v26, %v2006_v38  ;;  %v6551_v22 = vmul.f32 %v2538_v45, %v2006_v38  ;;  %v6567_v38 = vpop.xlane.xlu2 %2145 }
 0x2ba   : > { %7571 = vst [vmem:[#allocation63_spill] sm:$0xff] %v6521_v35  ;;  %v2667_v19 = vadd.f32 %v2666_v30, %v2665_v54  ;;  %v2673_v18 = vrot.slane %v2672_v28, 1  ;;  %v6554_v58 = vmul.f32 %v2537_v26, %v6476_v60  ;;  %v6557_v3 = vmul.f32 %v2538_v45, %v6476_v60  ;;  %v6569_v54 = vpop.xlane.xlu1 %2142 }
 0x2bb   : > { %7573 = vst [vmem:[#allocation65_spill] sm:$0xff] %v6525_v25  ;;  %v6559_v33 = vmul.f32 %v2533_v16, %v1991_v59  ;;  %v6561_v44 = vmul.f32 %v2534_v34, %v1991_v59  ;;  %v2508_v62 = vrot.slane %v2507_v52, 7  ;;  %v6563_v7 = vmul.f32 %v2535_v4, %v2000_v42 }
 0x2bc   : > { %7574 = vst [vmem:[#allocation66_spill] sm:$0xff] %v6527_v31  ;;  %v2674_v40 = vadd.f32 %v2673_v18, %v2672_v28  ;;  %v6565_v50 = vmul.f32 %v2536_v5, %v2000_v42  ;;  %v2482_v26 = vsel %vm1752_vm7, %v6411_v9, %v6398_v46  ;;  %v2480_v45 = vsel %vm1749_vm8, %v6411_v9, %v6398_v46 }
 0x2bd   : > { %7578 = vst [vmem:[#allocation67_spill] sm:$0xff] %v7577_v63  ;;  %v2539_v60 = vperm.slane %v2508_v62, 0  ;;  %v2540_v59 = vperm.slane %v2508_v62, 1  ;;  %v2483_v52 = vrot.slane %v2482_v26, 2  ;;  %v2481_v4 = vrot.slane %v2480_v45, 1 }
 0x2be   : > { %7579 = vst [vmem:[#allocation68_spill] sm:$0xff] %v6538_v27  ;;  %v2677_v16 = vrot.slane %v2674_v40, 7  ;;  %v2486_v18 = vsel %vm1758_vm11, %v6411_v9, %v6398_v46  ;;  %v2484_v5 = vsel %vm1755_vm9, %v6411_v9, %v6398_v46  ;;  %v2488_v34 = vsel %vm1761_vm10, %v6411_v9, %v6398_v46 }
 0x2bf   : > { %7580 = vst [vmem:[#allocation69_spill] sm:$0xff] %v6541_v43  ;;  %v6587_v30 = vrot.slane %v6436_v61, 7  ;;  %v6589_v28 = vmul.f32 %v2539_v60, %v2012_v24  ;;  %v6591_v62 = vmul.f32 %v2540_v59, %v2012_v24  ;;  %v6593_v40 = vperm.slane %v2483_v52, 0 }
 0x2c0   : > { %7581 = vst [vmem:[#allocation70_spill] sm:$0xff] %v6544_v12  ;;  %v2678_v42 = vsel %vm1747_vm6, %v2667_v19, %v2677_v16  ;;  %v6596_v26 = vperm.slane %v2483_v52, 1  ;;  %v6598_v45 = vperm.slane %v2481_v4, 0  ;;  %v2485_v53 = vrot.slane %v2484_v5, 3 }
 0x2c1   : > { %7582 = vst [vmem:[#allocation71_spill] sm:$0xff] %v6547_v49  ;;  %v2489_v61 = vrot.slane %v2488_v34, 5  ;;  %v2492_v24 = vsel %vm1767_vm13, %v6398_v46, %v6411_v9  ;;  %v6612_v16 = vperm.slane %v2481_v4, 1  ;;  %v2190_v4 = vsel %vm1758_vm11, %v6375_v2, %v6373_v8 }
 0x2c2   : > { %7583 = vst [vmem:[#allocation72_spill] sm:$0xff] %v6549_v21  ;;  %v6618_v5 = vperm.slane %v2485_v53, 0  ;;  %v6620_v34 = vperm.slane %v2485_v53, 1  ;;  %v6626_v21 = vpop.xlane.xlu1 %2151  ;;  %v2186_v53 = vsel %vm1752_vm7, %v6375_v2, %v6373_v8  ;;  %v6666_v31 = vsel %vm1747_vm6, %v6433_v6, %v6587_v30 }
 0x2c3   : > { %7584 = vst [vmem:[#allocation73_spill] sm:$0xff] %v6551_v22  ;;  %v6624_v22 = vpop.xlane.xlu2 %2154  ;;  %v2187_v12 = vrot.slane %v2186_v53, 2 }
 0x2c4   : > { %7585 = vst [vmem:[#allocation74_spill] sm:$0xff] %v6554_v58 }
 0x2c5   : > { %7586 = vst [vmem:[#allocation75_spill] sm:$0xff] %v6557_v3  ;;  %v2217_v53 = vperm.slane %v2187_v12, 0 }
 0x2c6   : > { %7587 = vst [vmem:[#allocation76_spill] sm:$0xff] %v6559_v33  ;;  %v6653_v33 = vsel %vm1764_vm12, %v6375_v2, %v6373_v8 }
 0x2c7   : > { %7588 = vst [vmem:[#allocation77_spill] sm:$0xff] %v6561_v44  ;;  %v2191_v44 = vrot.slane %v2190_v4, 4  ;;  %v2218_v4 = vperm.slane %v2187_v12, 1  ;;  %v2291_v56 = vmul.f32 %v6393_v47, %v2217_v53 }
 0x2c8   : > { %7589 = vst [vmem:[#allocation78_spill] sm:$0xff] %v6563_v7  ;;  %v2009_v7 = vpop.xlane.xlu0 %2008 }
 0x2c9   : > { %7590 = vst [vmem:[#allocation79_spill] sm:$0xff] %v6565_v50  ;;  %v2487_v50 = vrot.slane %v2486_v18, 4  ;;  %v6608_v19 = vmul.f32 %v2539_v60, %v2009_v7  ;;  %v6610_v52 = vmul.f32 %v2540_v59, %v2009_v7  ;;  %v2184_v7 = vsel %vm1749_vm8, %v6375_v2, %v6373_v8 }
 0x2ca   : > { %7591 = vst [vmem:[#allocation80_spill] sm:$0xff] %v6567_v38  ;;  %v2185_v60 = vrot.slane %v2184_v7, 1  ;;  %v6670_v41 = vpop.xlane.xlu1 %2160  ;;  %v2292_v12 = vmul.f32 %v6396_v39, %v2218_v4  ;;  %v2221_v1 = vperm.slane %v2191_v44, 0  ;;  %v2222_v35 = vperm.slane %v2191_v44, 1 }
 0x2cb   : > { %7592 = vst [vmem:[#allocation81_spill] sm:$0xff] %v6569_v54  ;;  %v6614_v18 = vperm.slane %v2487_v50, 0  ;;  %v6668_v25 = vpop.xlane.xlu2 %2163  ;;  %v7604_v54 = vperm.slane %v6666_v31, 0 }
 0x2cc   : > { %7593 = vst [vmem:[#allocation82_spill] sm:$0xff] %v6587_v30  ;;  %v2215_v58 = vperm.slane %v2185_v60, 0  ;;  %v2216_v49 = vperm.slane %v2185_v60, 1 }
 0x2cd   : > { %7594 = vst [vmem:[#allocation83_spill] sm:$0xff] %v6589_v28  ;;  %v6622_v28 = vperm.slane %v2489_v61, 0 }
 0x2ce   : > { %7595 = vst [vmem:[#allocation84_spill] sm:$0xff] %v6591_v62  ;;  %v2490_v62 = vsel %vm1764_vm12, %v6411_v9, %v6398_v46  ;;  %v2493_v46 = vrot.slane %v2492_v24, 7  ;;  %v6640_v24 = vperm.slane %v2489_v61, 1  ;;  %v2286_v60 = vmul.f32 %v6389_v29, %v2216_v49 }
 0x2cf   : > { %2684 = vst.msk [vmem:[#allocation2] ss:$8 sm:$0x3] %vm6533_vm2, %v2678_v42  ;;  %v6616_v42 = vperm.slane %v2487_v50, 1  ;;  %v2491_v9 = vrot.slane %v2490_v62, 6  ;;  %v2188_v50 = vsel %vm1755_vm9, %v6375_v2, %v6373_v8 }
 0x2d0   : > { %7596 = vst [vmem:[#allocation85_spill] sm:$0xff] %v6608_v19  ;;  %v2189_v59 = vrot.slane %v2188_v50, 3  ;;  %v6642_v62 = vperm.slane %v2493_v46, 0  ;;  %v6655_v61 = vpop.xlane.xlu0 %2139  ;;  %v2285_v19 = vmul.f32 %v6386_v20, %v2215_v58 }
 0x2d1   : > { %7597 = vst [vmem:[#allocation86_spill] sm:$0xff] %v6610_v52  ;;  %v6646_v3 = vperm.slane %v2491_v9, 0  ;;  %v2288_v52 = vmul.f32 %v6396_v39, %v2216_v49 }
 0x2d2   : > { %7598 = vst [vmem:[#allocation87_spill] sm:$0xff] %v6624_v22  ;;  %v2219_v7 = vperm.slane %v2189_v59, 0  ;;  %v2220_v50 = vperm.slane %v2189_v59, 1  ;;  %v6648_v22 = vperm.slane %v2491_v9, 1  ;;  %v2353_v38 = vmul.f32 1.442695, %v2285_v19  ;;  %v1925_v57 = vpop.xlane.xlu1 %1924 }
 0x2d3   : > { %7599 = vst [vmem:[#allocation88_spill] sm:$0xff] %v6626_v21  ;;  %v6644_v21 = vperm.slane %v2493_v46, 1  ;;  %v2287_v46 = vmul.f32 %v6393_v47, %v2215_v58  ;;  %v2359_v27 = vmul.f32 1.442695, %v2288_v52  ;;  %v2355_v58 = vmul.f32 1.442695, %v2286_v60 }
 0x2d4   : > { %7600 = vst [vmem:[#allocation89_spill] sm:$0xff] %v6655_v61  ;;  %v2293_v9 = vmul.f32 %v6386_v20, %v2219_v7  ;;  %v2294_v59 = vmul.f32 %v6389_v29, %v2220_v50  ;;  %v2295_v36 = vmul.f32 %v6393_v47, %v2219_v7  ;;  %v2289_v19 = vmul.f32 %v6386_v20, %v2217_v53 }
 0x2d5   : > { %v2357_v43 = vmul.f32 1.442695, %v2287_v46  ;;  %7601 = vst [vmem:[#allocation90_spill] sm:$0xff] %v6668_v25  ;;  %v2290_v52 = vmul.f32 %v6389_v29, %v2218_v4  ;;  %v2365_v25 = vmul.f32 1.442695, %v2291_v56  ;;  %v2300_v7 = vmul.f32 %v6396_v39, %v2222_v35 }
 0x2d6   : > { %7602 = vst [vmem:[#allocation91_spill] sm:$0xff] %v6670_v41  ;;  %v2369_v49 = vmul.f32 1.442695, %v2293_v9  ;;  %v2371_v46 = vmul.f32 1.442695, %v2294_v59  ;;  %v2299_v9 = vmul.f32 %v6393_v47, %v2221_v1  ;;  %v2296_v59 = vmul.f32 %v6396_v39, %v2220_v50 }
 0x2d7   : > { %4549 = vpow2.f32 %v2357_v43  ;;  %v2367_v41 = vmul.f32 1.442695, %v2292_v12  ;;  %v2361_v60 = vmul.f32 1.442695, %v2289_v19  ;;  %v2297_v43 = vmul.f32 %v6386_v20, %v2221_v1  ;;  %v1931_v1 = vpop.xlane.xlu2 %1930 }
 0x2d8   : > { %4551 = vpow2.f32 %v2359_v27  ;;  %v6680_v37 = vpop.xlane.xlu0 %2148  ;;  %v2363_v53 = vmul.f32 1.442695, %v2290_v52  ;;  %v2298_v27 = vmul.f32 %v6389_v29, %v2222_v35  ;;  %v2381_v44 = vmul.f32 1.442695, %v2299_v9 }
 0x2d9   : > { %4553 = vpow2.f32 %v2353_v38  ;;  %7603 = vst [vmem:[#allocation92_spill] sm:$0xff] %v6680_v37  ;;  %v2383_v56 = vmul.f32 1.442695, %v2300_v7  ;;  %v2373_v38 = vmul.f32 1.442695, %v2295_v36  ;;  %v2195_v19 = vrot.slane %v6653_v33, 6 }
 0x2da   : > { %4555 = vpow2.f32 %v2355_v58  ;;  %v2377_v58 = vmul.f32 1.442695, %v2297_v43  ;;  %v2379_v12 = vmul.f32 1.442695, %v2298_v27  ;;  %v2201_v35 = vsel %vm1752_vm7, %v6433_v6, %v6587_v30 }
 0x2db   : > { %4557 = vpow2.f32 %v2369_v49  ;;  %v2375_v49 = vmul.f32 1.442695, %v2296_v59  ;;  %v2581_v36 = vmul.f32 %v6593_v40, %v1931_v1  ;;  %v2578_v7 = vmul.f32 %v6612_v16, %v1925_v57 }
 0x2dc   : > { %4559 = vpow2.f32 %v2371_v46  ;;  %v2577_v46 = vmul.f32 %v6598_v45, %v1925_v57  ;;  %v6695_v37 = vperm.slane %v2195_v19, 1  ;;  %v2202_v50 = vrot.slane %v2201_v35, 2 }
 0x2dd   : > { %v4550_v4 = vpop.eup %4549  ;;  %4561 = vpow2.f32 %v2365_v25  ;;  %v2582_v25 = vmul.f32 %v6596_v26, %v1931_v1  ;;  %v2313_v57 = vmul.f32 %v6386_v20, %v7604_v54 }
 0x2de   : > { %v4552_v61 = vpop.eup %4551  ;;  %4563 = vpow2.f32 %v2367_v41  ;;  %v2643_v9 = vmul.f32 0.0, %v4550_v4  ;;  %v6693_v41 = vperm.slane %v2195_v19, 0  ;;  %v7475_v4 = vperm.slane %v6666_v31, 1 }
 0x2df   : > { %v4554_v52 = vpop.eup %4553  ;;  %v2644_v43 = vmul.f32 0.0, %v4552_v61  ;;  %4565 = vpow2.f32 %v2361_v60  ;;  %v6707_v19 = vperm.slane %v2202_v50, 0  ;;  %v6709_v35 = vperm.slane %v2202_v50, 1  ;;  %v1934_v15 = vpop.xlane.xlu2 %1933 }
 0x2e0   : > { %v4556_v33 = vpop.eup %4555  ;;  %v2641_v59 = vmul.f32 0.0, %v4554_v52  ;;  %4567 = vpow2.f32 %v2363_v53  ;;  %v2305_v1 = vmul.f32 %v6386_v20, %v6693_v41  ;;  %v6703_v60 = vpop.xlane.xlu0 %2157  ;;  %v2306_v53 = vmul.f32 %v6389_v29, %v6695_v37 }
 0x2e1   : > { %v4558_v27 = vpop.eup %4557  ;;  %4569 = vpow2.f32 %v2381_v44  ;;  %7605 = vst [vmem:[#allocation93_spill] sm:$0xff] %v6703_v60  ;;  %v2642_v52 = vmul.f32 0.0, %v4556_v33  ;;  %v2314_v54 = vmul.f32 %v6389_v29, %v7475_v4  ;;  %v1928_v50 = vpop.xlane.xlu1 %1927  ;;  %v2321_v33 = vmul.f32 %v6386_v20, %v6707_v19 }
 0x2e2   : > { %v4560_v11 = vpop.eup %4559  ;;  %4571 = vpow2.f32 %v2383_v56  ;;  %7606 = vst [vmem:[#allocation94_spill] sm:$0xff] %v6707_v19  ;;  %v2393_v56 = vmul.f32 1.442695, %v2305_v1  ;;  %v2395_v55 = vmul.f32 1.442695, %v2306_v53  ;;  %v2583_v4 = vmul.f32 %v6593_v40, %v1934_v15 }
 0x2e3   : > { %v4562_v61 = vpop.eup %4561  ;;  %7607 = vst [vmem:[#allocation95_spill] sm:$0xff] %v6709_v35  ;;  %4573 = vpow2.f32 %v2377_v58  ;;  %v2409_v58 = vmul.f32 1.442695, %v2313_v57  ;;  %v2411_v1 = vmul.f32 1.442695, %v2314_v54 }
 0x2e4   : > { %v4564_v44 = vpop.eup %4563  ;;  %v6712_v0 = vmul.f32 %v4562_v61, %v6455_v13  ;;  %4575 = vpow2.f32 %v2379_v12  ;;  %v2322_v13 = vmul.f32 %v6389_v29, %v6709_v35  ;;  %v2580_v12 = vmul.f32 %v6612_v16, %v1928_v50 }
 0x2e5   : > { %v6718_v60 = vmul.f32 %v4564_v44, %v6463_v17  ;;  %v4566_v63 = vpop.eup %4565  ;;  %4577 = vpow2.f32 %v2373_v38  ;;  %v2579_v17 = vmul.f32 %v6598_v45, %v1928_v50  ;;  %v2584_v44 = vmul.f32 %v6596_v26, %v1934_v15 }
 0x2e6   : > { %v4568_v61 = vpop.eup %4567  ;;  %v6730_v38 = vadd.f32 %v2641_v59, %v2577_v46  ;;  %v2708_v14 = vmul.f32 %v4566_v63, %v6439_v51  ;;  %v6738_v40 = vadd.f32 %v2644_v43, %v2580_v12  ;;  %v6740_v45 = vadd.f32 %v2642_v52, %v2578_v7 }
 0x2e7   : > { %v6727_v53 = vpop.eup %4569  ;;  %v2709_v19 = vmul.f32 %v4568_v61, %v6444_v10  ;;  %v6736_v57 = vadd.f32 %v2643_v9, %v2579_v17  ;;  %4579 = vpow2.f32 %v2375_v49  ;;  %v2425_v15 = vmul.f32 1.442695, %v2321_v33  ;;  %v1943_v9 = vpop.xlane.xlu2 %1942 }
 0x2e8   : > { %v6734_v35 = vpop.eup %4571  ;;  %v6742_v54 = vadd.f32 %v2708_v14, %v2581_v36  ;;  %4581 = vpow2.f32 %v2393_v56  ;;  %v6746_v51 = vpop.xlane.xlu0 %2166  ;;  %v6751_v10 = vsel %vm1747_vm6, %v6451_v32, %v6453_v48  ;;  %v2192_v63 = vsel %vm1761_vm10, %v6375_v2, %v6373_v8 }
 0x2e9   : > { %v4574_v16 = vpop.eup %4573  ;;  %v6744_v50 = vadd.f32 %v2709_v19, %v2582_v25  ;;  %7610 = vst [vmem:[#allocation98_spill] sm:$0xff] %v6746_v51  ;;  %4583 = vpow2.f32 %v2395_v55  ;;  %v2196_v14 = vsel %vm1767_vm13, %v6373_v8, %v6375_v2  ;;  %v6762_v36 = vmul.f32 %v4558_v27, %v6730_v38  ;;  %v1940_v8 = vpop.xlane.xlu1 %1939 }
 0x2ea   : > { %7608 = vst [vmem:[#allocation96_spill] sm:$0xff] %v6742_v54  ;;  %v4576_v26 = vpop.eup %4575  ;;  %4585 = vpow2.f32 %v2409_v58  ;;  %v2427_v55 = vmul.f32 1.442695, %v2322_v13  ;;  %v7480_v25 = vperm.slane %v6751_v10, 0  ;;  %v6766_v32 = vmul.f32 %v4560_v11, %v6740_v45 }
 0x2eb   : > { %7609 = vst [vmem:[#allocation97_spill] sm:$0xff] %v6744_v50  ;;  %v6759_v49 = vpop.eup %4577  ;;  %v6769_v48 = vmul.f32 %v4574_v16, %v6742_v54  ;;  %4587 = vpow2.f32 %v2411_v1  ;;  %v7479_v46 = vperm.slane %v6751_v10, 1  ;;  %v6773_v2 = vmul.f32 %v4576_v26, %v6744_v50 }
 0x2ec   : > { %4589 = vpow2.f32 %v2425_v15  ;;  %v2193_v7 = vrot.slane %v2192_v63, 5  ;;  %v2197_v43 = vrot.slane %v2196_v14, 7  ;;  %v2589_v59 = vmul.f32 %v6614_v18, %v1943_v9 }
 0x2ed   : > { %v4580_v27 = vpop.eup %4579  ;;  %v2590_v11 = vmul.f32 %v6616_v42, %v1943_v9  ;;  %v6778_v19 = vmul.f32 %v6618_v5, %v1940_v8  ;;  %v6783_v52 = vmul.f32 %v7480_v25, %v6347_v23  ;;  %v6788_v33 = vmul.f32 %v6620_v34, %v1940_v8 }
 0x2ee   : > { %v6785_v56 = vpop.eup %4581  ;;  %4591 = vpow2.f32 %v2427_v55  ;;  %v2223_v13 = vperm.slane %v2193_v7, 0  ;;  %v2224_v58 = vperm.slane %v2193_v7, 1  ;;  %v6795_v17 = vmul.f32 %v7479_v46, %v6347_v23 }
 0x2ef   : > { %7611 = vst [vmem:[#allocation99_spill] sm:$0xff] %v6783_v52  ;;  %v6790_v61 = vpop.eup %4583  ;;  %v2227_v12 = vperm.slane %v2197_v43, 0  ;;  %v2228_v1 = vperm.slane %v2197_v43, 1  ;;  %v2199_v16 = vsel %vm1749_vm8, %v6433_v6, %v6587_v30  ;;  %v6803_v26 = vadd.f32 %v6712_v0, %v2583_v4 }
 0x2f0   : > { %7612 = vst [vmem:[#allocation100_spill] sm:$0xff] %v6795_v17  ;;  %v6800_v15 = vpop.eup %4585  ;;  %v6806_v63 = vadd.f32 %v6718_v60, %v2584_v44  ;;  %v2303_v14 = vmul.f32 %v6393_v47, %v2223_v13  ;;  %v2304_v55 = vmul.f32 %v6396_v39, %v2224_v58  ;;  %v1937_v9 = vpop.xlane.xlu0 %1936  ;;  %v2301_v8 = vmul.f32 %v6386_v20, %v2223_v13 }
 0x2f1   : > { %v6810_v23 = vpop.eup %4587  ;;  %v2302_v7 = vmul.f32 %v6389_v29, %v2224_v58  ;;  %v2311_v43 = vmul.f32 %v6393_v47, %v2227_v12  ;;  %v2312_v46 = vmul.f32 %v6396_v39, %v2228_v1  ;;  %v2585_v4 = vmul.f32 %v6618_v5, %v1937_v9  ;;  %v1949_v50 = vpop.xlane.xlu1 %1948 }
 0x2f2   : > { %v6816_v0 = vpop.eup %4589  ;;  %v2586_v60 = vmul.f32 %v6620_v34, %v1937_v9  ;;  %v6822_v44 = vmul.f32 %v6727_v53, %v6803_v26  ;;  %v2203_v13 = vsel %vm1755_vm9, %v6433_v6, %v6587_v30  ;;  %v2389_v25 = vmul.f32 1.442695, %v2303_v14 }
 0x2f3   : > { %7613 = vst [vmem:[#allocation101_spill] sm:$0xff] %v6816_v0  ;;  %v2391_v58 = vmul.f32 1.442695, %v2304_v55  ;;  %v2385_v51 = vmul.f32 1.442695, %v2301_v8  ;;  %v2309_v17 = vmul.f32 %v6386_v20, %v2227_v12  ;;  %v1952_v0 = vpop.xlane.xlu2 %1951  ;;  %v6832_v5 = vmul.f32 %v6734_v35, %v6806_v63 }
 0x2f4   : > { %v6828_v52 = vpop.eup %4591  ;;  %v2387_v34 = vmul.f32 1.442695, %v2302_v7  ;;  %v2405_v53 = vmul.f32 1.442695, %v2311_v43  ;;  %v2407_v9 = vmul.f32 1.442695, %v2312_v46  ;;  %v6835_v54 = vmul.f32 %v6622_v28, %v1952_v0 }
 0x2f5   : > { %7614 = vst [vmem:[#allocation102_spill] sm:$0xff] %v6828_v52  ;;  %v6838_v14 = vmul.f32 %v6640_v24, %v1952_v0  ;;  %v6841_v55 = vmul.f32 %v6622_v28, %v1949_v50  ;;  %v2310_v12 = vmul.f32 %v6389_v29, %v2228_v1  ;;  %v6845_v8 = vmul.f32 %v6640_v24, %v1949_v50 }
 0x2f6   : > { %4593 = vpow2.f32 %v2389_v25  ;;  %v2200_v35 = vrot.slane %v2199_v16, 1  ;;  %v2204_v52 = vrot.slane %v2203_v13, 3  ;;  %v2714_v46 = vmul.f32 %v6759_v49, %v6736_v57 }
 0x2f7   : > { %v2715_v7 = vmul.f32 %v4580_v27, %v6738_v40  ;;  %4595 = vpow2.f32 %v2391_v58  ;;  %v2401_v43 = vmul.f32 1.442695, %v2309_v17  ;;  %v6851_v0 = vadd.f32 %v6762_v36, %v2585_v4 }
 0x2f8   : > { %v6854_v28 = vadd.f32 %v6766_v32, %v2586_v60  ;;  %4597 = vpow2.f32 %v2385_v51  ;;  %v2231_v1 = vperm.slane %v2200_v35, 0  ;;  %v1946_v24 = vpop.xlane.xlu0 %1945  ;;  %v6857_v50 = vadd.f32 %v6769_v48, %v2589_v59 }
 0x2f9   : > { %v6860_v25 = vadd.f32 %v6773_v2, %v2590_v11  ;;  %4599 = vpow2.f32 %v2387_v34  ;;  %v2232_v49 = vperm.slane %v2200_v35, 1  ;;  %v2591_v27 = vmul.f32 %v6614_v18, %v1946_v24  ;;  %v1958_v2 = vpop.xlane.xlu1 %1957 }
 0x2fa   : > { %4601 = vpow2.f32 %v2405_v53  ;;  %v2235_v17 = vperm.slane %v2204_v52, 0  ;;  %v2403_v36 = vmul.f32 1.442695, %v2310_v12  ;;  %v2236_v16 = vperm.slane %v2204_v52, 1 }
 0x2fb   : > { %4603 = vpow2.f32 %v2407_v9  ;;  %v2319_v32 = vmul.f32 %v6393_v47, %v2231_v1  ;;  %v2320_v51 = vmul.f32 %v6396_v39, %v2232_v49  ;;  %v2592_v48 = vmul.f32 %v6616_v42, %v1946_v24  ;;  %v1961_v59 = vpop.xlane.xlu2 %1960 }
 0x2fc   : > { %v6865_v4 = vpop.eup %4593  ;;  %v2327_v11 = vmul.f32 %v6393_v47, %v2235_v17  ;;  %4605 = vpow2.f32 %v2401_v43  ;;  %v2317_v18 = vmul.f32 %v6386_v20, %v2231_v1  ;;  %v6873_v13 = vmul.f32 %v6642_v62, %v1961_v59 }
 0x2fd   : > { %v6870_v60 = vpop.eup %4595  ;;  %v6876_v52 = vmul.f32 %v6644_v21, %v1961_v59  ;;  %v6879_v58 = vmul.f32 %v6646_v3, %v1958_v2  ;;  %v2318_v42 = vmul.f32 %v6389_v29, %v2232_v49  ;;  %v6885_v53 = vadd.f32 %v2714_v46, %v6778_v19 }
 0x2fe   : > { %v6882_v34 = vpop.eup %4597  ;;  %v6888_v9 = vadd.f32 %v2715_v7, %v6788_v33  ;;  %v2328_v12 = vmul.f32 %v6396_v39, %v2236_v16  ;;  %v2421_v35 = vmul.f32 1.442695, %v2319_v32  ;;  %v2423_v1 = vmul.f32 1.442695, %v2320_v51 }
 0x2ff   : > { %7615 = vst [vmem:[#allocation103_spill] sm:$0xff] %v6876_v52  ;;  %v6891_v43 = vpop.eup %4599  ;;  %v2437_v24 = vmul.f32 1.442695, %v2327_v11  ;;  %4607 = vpow2.f32 %v2403_v36  ;;  %v2325_v59 = vmul.f32 %v6386_v20, %v2235_v17  ;;  %v2326_v19 = vmul.f32 %v6389_v29, %v2236_v16 }
 0x300   : > { %7616 = vst [vmem:[#allocation104_spill] sm:$0xff] %v6879_v58  ;;  %v6894_v58 = vpop.eup %4601  ;;  %4609 = vpow2.f32 %v2421_v35  ;;  %v2439_v49 = vmul.f32 1.442695, %v2328_v12  ;;  %v2417_v46 = vmul.f32 1.442695, %v2317_v18  ;;  %v6900_v33 = vmul.f32 %v6648_v22, %v1958_v2  ;;  %v1955_v7 = vpop.xlane.xlu0 %1954  ;;  %v7619_v35 = vld [vmem:[#allocation94_spill] sm:$0xff] }
 0x301   : > { %v6897_v52 = vpop.eup %4603  ;;  %v6904_v32 = vmul.f32 %v6785_v56, %v6857_v50  ;;  %v6908_v20 = vmul.f32 %v6790_v61, %v6860_v25  ;;  %4611 = vpow2.f32 %v2423_v1  ;;  %v6913_v29 = vmul.f32 %v6646_v3, %v1955_v7  ;;  %v2089_v61 = vpop.xlane.xlu1 %2088 }
 0x302   : > { %v6910_v17 = vpop.eup %4605  ;;  %4613 = vpow2.f32 %v2437_v24  ;;  %v2419_v36 = vmul.f32 1.442695, %v2318_v42  ;;  %v2433_v16 = vmul.f32 1.442695, %v2325_v59  ;;  %v2435_v51 = vmul.f32 1.442695, %v2326_v19 }
 0x303   : > { %4615 = vpow2.f32 %v2439_v49  ;;  %v2307_v2 = vmul.f32 %v6393_v47, %v6693_v41  ;;  %v2308_v56 = vmul.f32 %v6396_v39, %v6695_v37  ;;  %v2092_v11 = vpop.xlane.xlu2 %2091  ;;  %v7617_v18 = vperm.slane %v6666_v31, 0 }
 0x304   : > { %4617 = vpow2.f32 %v2417_v46  ;;  %v7618_v3 = vperm.slane %v6666_v31, 1  ;;  %v2323_v1 = vmul.f32 %v6393_v47, %v7619_v35  ;;  %v2659_v41 = vmul.f32 %v6736_v57, %v2092_v11 }
 0x305   : > { %v2315_v12 = vmul.f32 %v6393_v47, %v7617_v18  ;;  %v6927_v24 = vpop.eup %4607  ;;  %v2660_v37 = vmul.f32 %v6738_v40, %v2092_v11  ;;  %v2657_v59 = vmul.f32 %v6730_v38, %v2089_v61  ;;  %v2658_v49 = vmul.f32 %v6740_v45, %v2089_v61  ;;  %v7620_v38 = vld [vmem:[#allocation95_spill] sm:$0xff] }
 0x306   : > { %v2316_v42 = vmul.f32 %v6396_v39, %v7618_v3  ;;  %v6933_v19 = vpop.eup %4609  ;;  %v6936_v46 = vadd.f32 %v6822_v44, %v2591_v27  ;;  %v6939_v31 = vadd.f32 %v6832_v5, %v2592_v48  ;;  %4619 = vpow2.f32 %v2419_v36 }
 0x307   : > { %v2397_v47 = vmul.f32 1.442695, %v2307_v2  ;;  %v6941_v18 = vpop.eup %4611  ;;  %v2686_v3 = vadd.f32 %v2659_v41, %v2657_v59  ;;  %v2693_v57 = vadd.f32 %v2660_v37, %v2658_v49  ;;  %4621 = vpow2.f32 %v2433_v16  ;;  %v7621_v37 = vld [vmem:[#allocation43_spill] sm:$0xff] }
 0x308   : > { %v2399_v40 = vmul.f32 1.442695, %v2308_v56  ;;  %v6943_v11 = vpop.eup %4613  ;;  %4623 = vpow2.f32 %v2435_v51  ;;  %v2324_v45 = vmul.f32 %v6396_v39, %v7620_v38  ;;  %v2413_v61 = vmul.f32 1.442695, %v2315_v12  ;;  %v1964_v2 = vpop.xlane.xlu0 %1963 }
 0x309   : > { %v2415_v44 = vmul.f32 1.442695, %v2316_v42  ;;  %v6947_v27 = vpop.eup %4615  ;;  %v2598_v5 = vmul.f32 %v6648_v22, %v1955_v7  ;;  %v2687_v48 = vrot.slane %v2686_v3, 4  ;;  %v2694_v36 = vrot.slane %v2693_v57, 4  ;;  %v2098_v41 = vpop.xlane.xlu1 %2097 }
 0x30a   : > { %4625 = vpow2.f32 %v2397_v47  ;;  %v6950_v35 = vpop.eup %4617  ;;  %v6953_v16 = vmul.f32 %v6642_v62, %v1964_v2  ;;  %v6956_v51 = vmul.f32 %v6644_v21, %v1964_v2  ;;  %v6958_v39 = vmul.f32 1.442695, %v2323_v1 }
 0x30b   : > { %4627 = vpow2.f32 %v2399_v40  ;;  %v2688_v56 = vadd.f32 %v2687_v48, %v2686_v3  ;;  %v2695_v12 = vadd.f32 %v2694_v36, %v2693_v57  ;;  %v6960_v42 = vmul.f32 1.442695, %v2324_v45  ;;  %v2101_v7 = vpop.xlane.xlu2 %2100 }
 0x30c   : > { %4629 = vpow2.f32 %v2413_v61  ;;  %v6962_v22 = vpop.eup %4619  ;;  %v7622_v62 = vperm.slane %v6751_v10, 0  ;;  %v7624_v21 = vperm.slane %v6751_v10, 1  ;;  %v6977_v49 = vsel %vm1761_vm10, %v6433_v6, %v6587_v30 }
 0x30d   : > { %4631 = vpow2.f32 %v2415_v44  ;;  %7626 = vst [vmem:[#allocation43_spill] sm:$0xff] %v6977_v49  ;;  %v6979_v47 = vpop.eup %4621  ;;  %v2689_v3 = vrot.slane %v2688_v56, 2  ;;  %v2696_v57 = vrot.slane %v2695_v12, 2  ;;  %v6982_v40 = vmul.f32 %v6851_v0, %v2101_v7 }
 0x30e   : > { %v6967_v59 = vmul.f32 %v7622_v62, %v7621_v37  ;;  %v6972_v1 = vmul.f32 %v7624_v21, %v7621_v37  ;;  %v6985_v38 = vmul.f32 %v6854_v28, %v2101_v7  ;;  %v6987_v45 = vpop.eup %4623  ;;  %v2726_v10 = vmul.f32 %v6803_v26, %v2098_v41 }
 0x30f   : > { %v2727_v61 = vmul.f32 %v6806_v63, %v2098_v41  ;;  %v6993_v44 = vadd.f32 %v6904_v32, %v6913_v29  ;;  %v6996_v48 = vadd.f32 %v6908_v20, %v2598_v5  ;;  %v2690_v2 = vadd.f32 %v2689_v3, %v2688_v56  ;;  %v7628_v3 = vld [vmem:[#allocation97_spill] sm:$0xff] }
 0x310   : > { %7623 = vst [vmem:[#allocation94_spill] sm:$0xff] %v6967_v59  ;;  %v6998_v36 = vpop.eup %4625  ;;  %v2697_v37 = vadd.f32 %v2696_v57, %v2695_v12  ;;  %v2782_v7 = vmul.f32 %v6865_v4, %v6885_v53  ;;  %v2783_v62 = vmul.f32 %v6870_v60, %v6888_v9  ;;  %v2780_v20 = vmul.f32 %v6882_v34, %v6851_v0  ;;  %v2095_v12 = vpop.xlane.xlu0 %2094  ;;  %v7629_v34 = vld [vmem:[#allocation99_spill] sm:$0xff]  ;;  %v7631_v59 = vld [vmem:[#allocation42_spill] sm:$0xff] }
 0x311   : > { %7625 = vst [vmem:[#allocation95_spill] sm:$0xff] %v6972_v1  ;;  %v7004_v26 = vpop.eup %4627  ;;  %v2912_v63 = vmul.f32 %v6800_v15, %v6993_v44  ;;  %v2913_v32 = vmul.f32 %v6810_v23, %v6996_v48  ;;  %v2781_v29 = vmul.f32 %v6891_v43, %v6854_v28  ;;  %v2691_v4 = vrot.slane %v2690_v2, 1  ;;  %v7627_v23 = vld [vmem:[#allocation96_spill] sm:$0xff]  ;;  %v2107_v1 = vpop.xlane.xlu1 %2106 }
 0x312   : > { %v7014_v5 = vpop.eup %4629  ;;  %v2698_v56 = vrot.slane %v2697_v37, 1  ;;  %v7017_v60 = vadd.f32 %v2782_v7, %v6835_v54  ;;  %v7020_v41 = vadd.f32 %v2783_v62, %v6838_v14  ;;  %v2724_v21 = vmul.f32 %v7627_v23, %v2095_v12  ;;  %v7630_v28 = vld [vmem:[#allocation100_spill] sm:$0xff] }
 0x313   : > { %v7022_v15 = vpop.eup %4631  ;;  %v2725_v0 = vmul.f32 %v7628_v3, %v2095_v12  ;;  %v2920_v57 = vadd.f32 %v2912_v63, %v7629_v34  ;;  %v2921_v43 = vadd.f32 %v2913_v32, %v7630_v28  ;;  %v2692_v30 = vadd.f32 %v2691_v4, %v2690_v2  ;;  %v2110_v62 = vpop.xlane.xlu2 %2109  ;;  %v7635_v34 = vld [vmem:[#allocation54_spill] sm:$0xff] }
 0x314   : > { %v2699_v6 = vadd.f32 %v2698_v56, %v2697_v37  ;;  %v7029_v49 = vadd.f32 %v2780_v20, %v6841_v55  ;;  %v7032_v54 = vadd.f32 %v2781_v29, %v6845_v8  ;;  %v2732_v14 = vadd.f32 %v2726_v10, %v2724_v21  ;;  %v7633_v56 = vld [vmem:[#allocation102_spill] sm:$0xff] }
 0x315   : > { %v2739_v7 = vadd.f32 %v2727_v61, %v2725_v0  ;;  %v7035_v23 = vmul.f32 %v2920_v57, %v7631_v59  ;;  %v7038_v12 = vmul.f32 %v2921_v43, %v7631_v59  ;;  %v2794_v2 = vmul.f32 %v6936_v46, %v2110_v62  ;;  %v7632_v61 = vld [vmem:[#allocation101_spill] sm:$0xff] }
 0x316   : > { %v2702_v63 = vrot.slane %v2699_v6, 7  ;;  %v2795_v37 = vmul.f32 %v6939_v31, %v2110_v62  ;;  %v2792_v55 = vmul.f32 %v6857_v50, %v2107_v1  ;;  %v2733_v32 = vrot.slane %v2732_v14, 4 }
 0x317   : > { %v2740_v8 = vrot.slane %v2739_v7, 4  ;;  %v2793_v10 = vmul.f32 %v6860_v25, %v2107_v1  ;;  %v2980_v20 = vmul.f32 %v7632_v61, %v2920_v57  ;;  %v2981_v21 = vmul.f32 %v7633_v56, %v2921_v43  ;;  %v7636_v57 = vld [vmem:[#allocation55_spill] sm:$0xff] }
 0x318   : > { %v2703_v29 = vsel %vm1747_vm6, %v2692_v30, %v2702_v63  ;;  %v2800_v4 = vadd.f32 %v2794_v2, %v2792_v55  ;;  %v2850_v6 = vmul.f32 %v6894_v58, %v7017_v60  ;;  %v2734_v3 = vadd.f32 %v2733_v32, %v2732_v14  ;;  %v2104_v1 = vpop.xlane.xlu0 %2103  ;;  %v7637_v55 = vld [vmem:[#allocation81_spill] sm:$0xff] }
 0x319   : > { %2706 = vst.msk [vmem:[#allocation2 + $0x1] ss:$8 sm:$0x3] %vm6533_vm2, %v2703_v29  ;;  %v2741_v0 = vadd.f32 %v2740_v8, %v2739_v7  ;;  %v2807_v50 = vadd.f32 %v2795_v37, %v2793_v10  ;;  %v7052_v28 = vadd.f32 %v2980_v20, %v7635_v34  ;;  %v7055_v62 = vadd.f32 %v2981_v21, %v7636_v57  ;;  %v2116_v29 = vpop.xlane.xlu1 %2115 }
 0x31a   : > { %v2801_v25 = vrot.slane %v2800_v4, 4  ;;  %v2851_v30 = vmul.f32 %v6897_v52, %v7020_v41  ;;  %v2858_v43 = vadd.f32 %v2850_v6, %v6953_v16  ;;  %v2735_v58 = vrot.slane %v2734_v3, 2 }
 0x31b   : > { %v2742_v63 = vrot.slane %v2741_v0, 2  ;;  %v2808_v2 = vrot.slane %v2807_v50, 4  ;;  %v2730_v14 = vmul.f32 %v6885_v53, %v2104_v1  ;;  %v2731_v37 = vmul.f32 %v6888_v9, %v2104_v1  ;;  %v2119_v20 = vpop.xlane.xlu2 %2118 }
 0x31c   : > { %v2802_v7 = vadd.f32 %v2801_v25, %v2800_v4  ;;  %v7064_v32 = vmul.f32 %v7052_v28, %v7637_v55  ;;  %v7068_v8 = vmul.f32 %v7055_v62, %v7637_v55  ;;  %v2736_v10 = vadd.f32 %v2735_v58, %v2734_v3 }
 0x31d   : > { %v2743_v52 = vadd.f32 %v2742_v63, %v2741_v0  ;;  %v2809_v61 = vadd.f32 %v2808_v2, %v2807_v50  ;;  %v2754_v16 = vadd.f32 %v2730_v14, %v6982_v40  ;;  %v2761_v53 = vadd.f32 %v2731_v37, %v6985_v38 }
 0x31e   : > { %v2803_v56 = vrot.slane %v2802_v7, 2  ;;  %v7073_v9 = vmul.f32 %v6993_v44, %v2119_v20  ;;  %v7076_v4 = vmul.f32 %v6996_v48, %v2119_v20  ;;  %v2737_v21 = vrot.slane %v2736_v10, 1 }
 0x31f   : > { %v2744_v6 = vrot.slane %v2743_v52, 1  ;;  %v2810_v34 = vrot.slane %v2809_v61, 2  ;;  %v2755_v25 = vrot.slane %v2754_v16, 4  ;;  %v2762_v0 = vrot.slane %v2761_v53, 4 }
 0x320   : > { %v2804_v3 = vadd.f32 %v2803_v56, %v2802_v7  ;;  %v2798_v50 = vmul.f32 %v7017_v60, %v2116_v29  ;;  %v2799_v40 = vmul.f32 %v7020_v41, %v2116_v29  ;;  %v2738_v1 = vadd.f32 %v2737_v21, %v2736_v10  ;;  %v2113_v2 = vpop.xlane.xlu0 %2112 }
 0x321   : > { %v2745_v57 = vadd.f32 %v2744_v6, %v2743_v52  ;;  %v2811_v58 = vadd.f32 %v2810_v34, %v2809_v61  ;;  %v2756_v38 = vadd.f32 %v2755_v25, %v2754_v16  ;;  %v2763_v44 = vadd.f32 %v2762_v0, %v2761_v53 }
 0x322   : > { %v2805_v63 = vrot.slane %v2804_v3, 1  ;;  %v2859_v48 = vadd.f32 %v2851_v30, %v6956_v51  ;;  %v2918_v14 = vmul.f32 %v6933_v19, %v2858_v43  ;;  %v2796_v7 = vmul.f32 %v7029_v49, %v2113_v2 }
 0x323   : > { %v2748_v37 = vrot.slane %v2745_v57, 7  ;;  %v2812_v55 = vrot.slane %v2811_v58, 1  ;;  %v2757_v20 = vrot.slane %v2756_v38, 2  ;;  %v2764_v60 = vrot.slane %v2763_v44, 2  ;;  %v2128_v53 = vpop.xlane.xlu2 %2127 }
 0x324   : > { %v2806_v56 = vadd.f32 %v2805_v63, %v2804_v3  ;;  %v2797_v41 = vmul.f32 %v7032_v54, %v2113_v2  ;;  %v2919_v10 = vmul.f32 %v6941_v18, %v2859_v48  ;;  %v2822_v29 = vadd.f32 %v2798_v50, %v2796_v7  ;;  %v7638_v3 = vld [vmem:[#allocation56_spill] sm:$0xff]  ;;  %v7639_v63 = vld [vmem:[#allocation57_spill] sm:$0xff] }
 0x325   : > { %v2749_v52 = vsel %vm1747_vm6, %v2738_v1, %v2748_v37  ;;  %v2813_v61 = vadd.f32 %v2812_v55, %v2811_v58  ;;  %v2758_v16 = vadd.f32 %v2757_v20, %v2756_v38  ;;  %v2765_v19 = vadd.f32 %v2764_v60, %v2763_v44  ;;  %v7640_v44 = vld [vmem:[#allocation89_spill] sm:$0xff]  ;;  %v2125_v55 = vpop.xlane.xlu1 %2124 }
 0x326   : > { %2752 = vst.msk [vmem:[#allocation2 + $0x2] ss:$8 sm:$0x3] %vm6533_vm2, %v2749_v52  ;;  %v2829_v51 = vadd.f32 %v2799_v40, %v2797_v41  ;;  %v2866_v30 = vmul.f32 %v2858_v43, %v2128_v53  ;;  %v2867_v21 = vmul.f32 %v2859_v48, %v2128_v53  ;;  %v2823_v25 = vrot.slane %v2822_v29, 4 }
 0x327   : > { %v2816_v6 = vrot.slane %v2813_v61, 7  ;;  %v2759_v34 = vrot.slane %v2758_v16, 1  ;;  %v2926_v0 = vadd.f32 %v2918_v14, %v7638_v3  ;;  %v2766_v57 = vrot.slane %v2765_v19, 1 }
 0x328   : > { %v2830_v18 = vrot.slane %v2829_v51, 4  ;;  %v2927_v1 = vadd.f32 %v2919_v10, %v7639_v63  ;;  %v2848_v50 = vmul.f32 %v6910_v17, %v7029_v49  ;;  %v2824_v2 = vadd.f32 %v2823_v25, %v2822_v29 }
 0x329   : > { %v2817_v58 = vsel %vm1747_vm6, %v2806_v56, %v2816_v6  ;;  %v2760_v38 = vadd.f32 %v2759_v34, %v2758_v16  ;;  %v2934_v40 = vmul.f32 %v2926_v0, %v7640_v44  ;;  %v2767_v43 = vadd.f32 %v2766_v57, %v2765_v19  ;;  %v7642_v19 = vld [vmem:[#allocation62_spill] sm:$0xff] }
 0x32a   : > { %2820 = vst.msk [vmem:[#allocation2 + $0x4] ss:$8 sm:$0x3] %vm6533_vm2, %v2817_v58  ;;  %v2831_v48 = vadd.f32 %v2830_v18, %v2829_v51  ;;  %v2935_v14 = vmul.f32 %v2927_v1, %v7640_v44  ;;  %v7098_v37 = vmul.f32 %v6943_v11, %v2926_v0  ;;  %v2825_v20 = vrot.slane %v2824_v2, 2  ;;  %v7641_v11 = vld [vmem:[#allocation103_spill] sm:$0xff]  ;;  %v7643_v51 = vld [vmem:[#allocation104_spill] sm:$0xff] }
 0x32b   : > { %v7101_v17 = vmul.f32 %v6947_v27, %v2927_v1  ;;  %v2849_v49 = vmul.f32 %v6927_v24, %v7032_v54  ;;  %v2856_v7 = vadd.f32 %v2848_v50, %v6873_v13  ;;  %v2770_v56 = vrot.slane %v2767_v43, 7  ;;  %v2122_v54 = vpop.xlane.xlu0 %2121  ;;  %v7645_v18 = vld [vmem:[#allocation64_spill] sm:$0xff] }
 0x32c   : > { %v2832_v60 = vrot.slane %v2831_v48, 2  ;;  %4633 = vpow2.f32 %v6958_v39  ;;  %v2846_v41 = vmul.f32 %v6998_v36, %v6936_v46  ;;  %v2826_v10 = vadd.f32 %v2825_v20, %v2824_v2 }
 0x32d   : > { %v2857_v52 = vadd.f32 %v2849_v49, %v7641_v11  ;;  %v2864_v61 = vmul.f32 %v2856_v7, %v2125_v55  ;;  %v2916_v16 = vmul.f32 %v6950_v35, %v2856_v7  ;;  %v2771_v27 = vsel %vm1747_vm6, %v2760_v38, %v2770_v56 }
 0x32e   : > { %v2833_v29 = vadd.f32 %v2832_v60, %v2831_v48  ;;  %4635 = vpow2.f32 %v6960_v42  ;;  %v2847_v13 = vmul.f32 %v7004_v26, %v6939_v31  ;;  %2774 = vst.msk [vmem:[#allocation2 + $0x3] ss:$8 sm:$0x3] %vm6533_vm2, %v2771_v27  ;;  %v2827_v24 = vrot.slane %v2826_v10, 1  ;;  %v7644_v31 = vld [vmem:[#allocation63_spill] sm:$0xff] }
 0x32f   : > { %v2865_v39 = vmul.f32 %v2857_v52, %v2125_v55  ;;  %v2890_v46 = vadd.f32 %v2866_v30, %v2864_v61  ;;  %v2917_v36 = vmul.f32 %v6962_v22, %v2857_v52  ;;  %v2924_v35 = vadd.f32 %v2916_v16, %v7642_v19 }
 0x330   : > { %v2834_v53 = vrot.slane %v2833_v29, 1  ;;  %v2854_v6 = vadd.f32 %v2846_v41, %v7643_v51  ;;  %v2855_v34 = vadd.f32 %v2847_v13, %v6900_v33  ;;  %v2828_v42 = vadd.f32 %v2827_v24, %v2826_v10 }
 0x331   : > { %v2891_v25 = vrot.slane %v2890_v46, 4  ;;  %v2897_v3 = vadd.f32 %v2867_v21, %v2865_v39  ;;  %v2925_v26 = vadd.f32 %v2917_v36, %v7644_v31  ;;  %v2932_v63 = vmul.f32 %v2924_v35, %v7645_v18 }
 0x332   : > { %v4634_v0 = vpop.eup %4633  ;;  %v2835_v57 = vadd.f32 %v2834_v53, %v2833_v29  ;;  %v7124_v30 = vmul.f32 %v6979_v47, %v2924_v35  ;;  %v2862_v22 = vmul.f32 %v2854_v6, %v2122_v54  ;;  %v2863_v44 = vmul.f32 %v2855_v34, %v2122_v54  ;;  %v7647_v29 = vld [vmem:[#allocation95_spill] sm:$0xff] }
 0x333   : > { %v2892_v1 = vadd.f32 %v2891_v25, %v2890_v46  ;;  %v2898_v50 = vrot.slane %v2897_v3, 4  ;;  %v2933_v58 = vmul.f32 %v2925_v26, %v7645_v18  ;;  %v7128_v38 = vmul.f32 %v6987_v45, %v2925_v26  ;;  %v7648_v46 = vld [vmem:[#allocation44_spill] sm:$0xff] }
 0x334   : > { %v4636_v33 = vpop.eup %4635  ;;  %v2838_v2 = vrot.slane %v2835_v57, 7  ;;  %v2958_v21 = vadd.f32 %v2934_v40, %v2932_v63  ;;  %v2868_v43 = vadd.f32 %v2862_v22, %v7073_v9  ;;  %v2914_v47 = vmul.f32 %v7014_v5, %v2854_v6 }
 0x335   : > { %v2893_v48 = vrot.slane %v2892_v1, 2  ;;  %v2899_v55 = vadd.f32 %v2898_v50, %v2897_v3  ;;  %v2965_v20 = vadd.f32 %v2935_v14, %v2933_v58  ;;  %v2875_v60 = vadd.f32 %v2863_v44, %v7076_v4  ;;  %v7646_v14 = vld [vmem:[#allocation94_spill] sm:$0xff] }
 0x336   : > { %v2839_v49 = vsel %vm1747_vm6, %v2828_v42, %v2838_v2  ;;  %v2959_v7 = vrot.slane %v2958_v21, 4  ;;  %v2869_v56 = vrot.slane %v2868_v43, 4  ;;  %v2915_v10 = vmul.f32 %v7022_v15, %v2855_v34 }
 0x337   : > { %2842 = vst.msk [vmem:[#allocation2 + $0x5] ss:$8 sm:$0x3] %vm6533_vm2, %v2839_v49  ;;  %v2894_v45 = vadd.f32 %v2893_v48, %v2892_v1  ;;  %v2900_v41 = vrot.slane %v2899_v55, 2  ;;  %v2966_v40 = vrot.slane %v2965_v20, 4  ;;  %v2876_v52 = vrot.slane %v2875_v60, 4 }
 0x338   : > { %v2960_v9 = vadd.f32 %v2959_v7, %v2958_v21  ;;  %v2870_v11 = vadd.f32 %v2869_v56, %v2868_v43  ;;  %v2922_v61 = vadd.f32 %v2914_v47, %v7646_v14  ;;  %v2923_v13 = vadd.f32 %v2915_v10, %v7647_v29  ;;  %v7650_v49 = vld [vmem:[#allocation45_spill] sm:$0xff]  ;;  %v7651_v7 = vld [vmem:[#allocation82_spill] sm:$0xff] }
 0x339   : > { %v2895_v5 = vrot.slane %v2894_v45, 1  ;;  %v2901_v16 = vadd.f32 %v2900_v41, %v2899_v55  ;;  %v2967_v27 = vadd.f32 %v2966_v40, %v2965_v20  ;;  %v2877_v39 = vadd.f32 %v2876_v52, %v2875_v60  ;;  %v7649_v20 = vld [vmem:[#allocation43_spill] sm:$0xff]  ;;  %v7653_v14 = vld [vmem:[#allocation61_spill] sm:$0xff] }
 0x33a   : > { %v2961_v24 = vrot.slane %v2960_v9, 2  ;;  %v2871_v4 = vrot.slane %v2870_v11, 2  ;;  %v2930_v36 = vmul.f32 %v2922_v61, %v7648_v46  ;;  %v2931_v15 = vmul.f32 %v2923_v13, %v7648_v46 }
 0x33b   : > { %v2896_v54 = vadd.f32 %v2895_v5, %v2894_v45  ;;  %v2902_v53 = vrot.slane %v2901_v16, 1  ;;  %v2968_v19 = vrot.slane %v2967_v27, 2  ;;  %v2878_v6 = vrot.slane %v2877_v39, 2 }
 0x33c   : > { %v2962_v35 = vadd.f32 %v2961_v24, %v2960_v9  ;;  %v2872_v51 = vadd.f32 %v2871_v4, %v2870_v11  ;;  %v2936_v34 = vadd.f32 %v2930_v36, %v7035_v23  ;;  %v2943_v3 = vadd.f32 %v2931_v15, %v7038_v12  ;;  %v4685_v24 = vld [vmem:[%s5508_s20] sm:$0xff] }
 0x33d   : > { %v2903_v42 = vadd.f32 %v2902_v53, %v2901_v16  ;;  %v2969_v25 = vadd.f32 %v2968_v19, %v2967_v27  ;;  %v2982_v31 = vmul.f32 %v4634_v0, %v2922_v61  ;;  %v2879_v18 = vadd.f32 %v2878_v6, %v2877_v39  ;;  %v4686_v39 = vld [vmem:[%s5508_s20 + $0x8] sm:$0xff]  ;;  %v7654_v53 = vld [vmem:[#allocation92_spill] sm:$0xff] }
 0x33e   : > { %v2963_v26 = vrot.slane %v2962_v35, 1  ;;  %v2873_v57 = vrot.slane %v2872_v51, 1  ;;  %v2937_v63 = vrot.slane %v2936_v34, 4  ;;  %v2944_v50 = vrot.slane %v2943_v3, 4 }
 0x33f   : > { %v2906_v22 = vrot.slane %v2903_v42, 7  ;;  %v2970_v1 = vrot.slane %v2969_v25, 1  ;;  %v2983_v58 = vmul.f32 %v4636_v33, %v2923_v13  ;;  %v2880_v44 = vrot.slane %v2879_v18, 1  ;;  %v7652_v33 = vld [vmem:[#allocation60_spill] sm:$0xff] }
 0x340   : > { %v2964_v2 = vadd.f32 %v2963_v26, %v2962_v35  ;;  %v2874_v21 = vadd.f32 %v2873_v57, %v2872_v51  ;;  %v2938_v43 = vadd.f32 %v2937_v63, %v2936_v34  ;;  %v2945_v55 = vadd.f32 %v2944_v50, %v2943_v3  ;;  %v7656_v50 = vld [vmem:[#allocation66_spill] sm:$0xff] }
 0x341   : > { %v2907_v48 = vsel %vm1747_vm6, %v2896_v54, %v2906_v22  ;;  %v2971_v23 = vadd.f32 %v2970_v1, %v2969_v25  ;;  %v2208_v47 = vrot.slane %v7649_v20, 5  ;;  %v2881_v12 = vadd.f32 %v2880_v44, %v2879_v18  ;;  %v7655_v18 = vld [vmem:[#allocation65_spill] sm:$0xff] }
 0x342   : > { %2910 = vst.msk [vmem:[#allocation2 + $0x7] ss:$8 sm:$0x3] %vm6533_vm2, %v2907_v48  ;;  %v2939_v0 = vrot.slane %v2938_v43, 2  ;;  %v2211_v56 = vsel %vm1767_vm13, %v7651_v7, %v7650_v49  ;;  %v7152_v60 = vadd.f32 %v7124_v30, %v7652_v33  ;;  %v2946_v41 = vrot.slane %v2945_v55, 2 }
 0x343   : > { %v2974_v45 = vrot.slane %v2971_v23, 7  ;;  %v2212_v40 = vrot.slane %v2211_v56, 7  ;;  %v7154_v10 = vperm.slane %v2208_v47, 0  ;;  %v2884_v9 = vrot.slane %v2881_v12, 7  ;;  %v4687_v12 = vld [vmem:[%s5508_s20 + $0x10] sm:$0xff] }
 0x344   : > { %v2940_v11 = vadd.f32 %v2939_v0, %v2938_v43  ;;  %v7156_v52 = vperm.slane %v2208_v47, 1  ;;  %v7160_v61 = vadd.f32 %v7128_v38, %v7653_v14  ;;  %v2947_v16 = vadd.f32 %v2946_v41, %v2945_v55  ;;  %v7657_v43 = vld [vmem:[#allocation80_spill] sm:$0xff] }
 0x345   : > { %v2975_v5 = vsel %vm1747_vm6, %v2964_v2, %v2974_v45  ;;  %v7163_v30 = vperm.slane %v2212_v40, 0  ;;  %v7165_v27 = vperm.slane %v2212_v40, 1  ;;  %v2885_v29 = vsel %vm1747_vm6, %v2874_v21, %v2884_v9 }
 0x346   : > { %2978 = vst.msk [vmem:[#allocation2 + $0x11] ss:$8 sm:$0x3] %vm6533_vm2, %v2975_v5  ;;  %v2941_v13 = vrot.slane %v2940_v11, 1  ;;  %v2333_v4 = vmul.f32 %v4685_v24, %v7154_v10  ;;  %v2334_v38 = vmul.f32 %v4686_v39, %v7156_v52  ;;  %v2948_v46 = vrot.slane %v2947_v16, 1 }
 0x347   : > { %2888 = vst.msk [vmem:[#allocation2 + $0x6] ss:$8 sm:$0x3] %vm6533_vm2, %v2885_v29  ;;  %v2341_v36 = vmul.f32 %v4685_v24, %v7163_v30  ;;  %v2342_v54 = vmul.f32 %v4686_v39, %v7165_v27  ;;  %v7180_v19 = vmul.f32 %v7152_v60, %v7654_v53  ;;  %v7184_v6 = vmul.f32 %v7160_v61, %v7654_v53 }
 0x348   : > { %v2942_v15 = vadd.f32 %v2941_v13, %v2940_v11  ;;  %v2449_v35 = vmul.f32 1.442695, %v2333_v4  ;;  %v2451_v51 = vmul.f32 1.442695, %v2334_v38  ;;  %v2949_v34 = vadd.f32 %v2948_v46, %v2947_v16 }
 0x349   : > { %v2465_v42 = vmul.f32 1.442695, %v2341_v36  ;;  %v2467_v25 = vmul.f32 1.442695, %v2342_v54  ;;  %v2205_v3 = vsel %vm1758_vm11, %v7650_v49, %v7651_v7  ;;  %v2209_v57 = vsel %vm1764_vm12, %v7650_v49, %v7651_v7  ;;  %v7658_v54 = vld [vmem:[#allocation68_spill] sm:$0xff] }
 0x34a   : > { %4637 = vpow2.f32 %v2449_v35  ;;  %v2206_v26 = vrot.slane %v2205_v3, 4  ;;  %v7193_v63 = vadd.f32 %v2982_v31, %v7655_v18  ;;  %v2952_v22 = vrot.slane %v2949_v34, 7 }
 0x34b   : > { %4639 = vpow2.f32 %v2451_v51  ;;  %v2210_v1 = vrot.slane %v2209_v57, 6  ;;  %v7196_v2 = vadd.f32 %v2983_v58, %v7656_v50  ;;  %v4688_v58 = vld [vmem:[%s5508_s20 + $0x18] sm:$0xff]  ;;  %v7659_v51 = vld [vmem:[#allocation69_spill] sm:$0xff]  ;;  %v2173_v57 = vpop.xlane.xlu2 %2172 }
 0x34c   : > { %4641 = vpow2.f32 %v2465_v42  ;;  %v2237_v21 = vperm.slane %v2206_v26, 0  ;;  %v2238_v44 = vperm.slane %v2206_v26, 1  ;;  %v2998_v48 = vmul.f32 %v7193_v63, %v7657_v43 }
 0x34d   : > { %v2953_v23 = vsel %vm1747_vm6, %v2942_v15, %v2952_v22  ;;  %4643 = vpow2.f32 %v2467_v25  ;;  %v2241_v55 = vperm.slane %v2210_v1, 0  ;;  %v2242_v31 = vperm.slane %v2210_v1, 1  ;;  %v7660_v25 = vld [vmem:[#allocation91_spill] sm:$0xff]  ;;  %v7661_v22 = vld [vmem:[#allocation85_spill] sm:$0xff] }
 0x34e   : > { %2956 = vst.msk [vmem:[#allocation2 + $0x10] ss:$8 sm:$0x3] %vm6533_vm2, %v2953_v23  ;;  %v2329_v20 = vmul.f32 %v4685_v24, %v2237_v21  ;;  %v2330_v47 = vmul.f32 %v4686_v39, %v2238_v44  ;;  %v2331_v0 = vmul.f32 %v4687_v12, %v2237_v21  ;;  %v2332_v49 = vmul.f32 %v4688_v58, %v2238_v44  ;;  %v7662_v21 = vld [vmem:[#allocation86_spill] sm:$0xff] }
 0x34f   : > { %v2337_v7 = vmul.f32 %v4685_v24, %v2241_v55  ;;  %v2338_v56 = vmul.f32 %v4686_v39, %v2242_v31  ;;  %v2339_v33 = vmul.f32 %v4687_v12, %v2241_v55  ;;  %v2340_v45 = vmul.f32 %v4688_v58, %v2242_v31 }
 0x350   : > { %v4638_v41 = vpop.eup %4637  ;;  %v2441_v40 = vmul.f32 1.442695, %v2329_v20  ;;  %v2443_v9 = vmul.f32 1.442695, %v2330_v47  ;;  %v2445_v11 = vmul.f32 1.442695, %v2331_v0  ;;  %v2999_v14 = vmul.f32 %v7196_v2, %v7657_v43 }
 0x351   : > { %v4640_v5 = vpop.eup %4639  ;;  %v3052_v16 = vmul.f32 %v4638_v41, %v7152_v60  ;;  %v2447_v29 = vmul.f32 1.442695, %v2332_v49  ;;  %v2457_v13 = vmul.f32 1.442695, %v2337_v7  ;;  %v2459_v4 = vmul.f32 1.442695, %v2338_v56 }
 0x352   : > { %v4642_v38 = vpop.eup %4641  ;;  %v3053_v46 = vmul.f32 %v4640_v5, %v7160_v61  ;;  %4645 = vpow2.f32 %v2441_v40  ;;  %v2461_v24 = vmul.f32 1.442695, %v2339_v33  ;;  %v2463_v39 = vmul.f32 1.442695, %v2340_v45  ;;  %v7663_v45 = vld [vmem:[#allocation76_spill] sm:$0xff] }
 0x353   : > { %v4644_v36 = vpop.eup %4643  ;;  %v3060_v53 = vadd.f32 %v3052_v16, %v7658_v54  ;;  %4647 = vpow2.f32 %v2443_v9  ;;  %v3004_v15 = vadd.f32 %v2998_v48, %v7064_v32  ;;  %v3011_v35 = vadd.f32 %v2999_v14, %v7068_v8  ;;  %v7665_v16 = vld [vmem:[#allocation70_spill] sm:$0xff] }
 0x354   : > { %v3061_v34 = vadd.f32 %v3053_v46, %v7659_v51  ;;  %4649 = vpow2.f32 %v2445_v11  ;;  %v2335_v60 = vmul.f32 %v4687_v12, %v7154_v10  ;;  %v2336_v42 = vmul.f32 %v4688_v58, %v7156_v52  ;;  %v7664_v11 = vld [vmem:[#allocation77_spill] sm:$0xff]  ;;  %v7669_v51 = vld [vmem:[#allocation74_spill] sm:$0xff] }
 0x355   : > { %v7216_v61 = vmul.f32 %v3060_v53, %v7660_v25  ;;  %v3120_v3 = vmul.f32 %v4642_v38, %v3060_v53  ;;  %4651 = vpow2.f32 %v2447_v29  ;;  %v3005_v26 = vrot.slane %v3004_v15, 4 }
 0x356   : > { %v7219_v18 = vmul.f32 %v3061_v34, %v7660_v25  ;;  %v3121_v32 = vmul.f32 %v4644_v36, %v3061_v34  ;;  %4653 = vpow2.f32 %v2457_v13  ;;  %v3012_v8 = vrot.slane %v3011_v35, 4 }
 0x357   : > { %v3128_v1 = vadd.f32 %v3120_v3, %v7661_v22  ;;  %4655 = vpow2.f32 %v2459_v4  ;;  %v3006_v50 = vadd.f32 %v3005_v26, %v3004_v15  ;;  %v2343_v10 = vmul.f32 %v4687_v12, %v7163_v30  ;;  %v7670_v26 = vld [vmem:[#allocation75_spill] sm:$0xff] }
 0x358   : > { %v4646_v52 = vpop.eup %4645  ;;  %v3129_v44 = vadd.f32 %v3121_v32, %v7662_v21  ;;  %4657 = vpow2.f32 %v2461_v24  ;;  %v3013_v43 = vadd.f32 %v3012_v8, %v3011_v35  ;;  %v2344_v48 = vmul.f32 %v4688_v58, %v7165_v27  ;;  %v7671_v8 = vld [vmem:[#allocation72_spill] sm:$0xff] }
 0x359   : > { %v4648_v23 = vpop.eup %4647  ;;  %v7225_v55 = vmul.f32 %v3128_v1, %v2173_v57  ;;  %4659 = vpow2.f32 %v2463_v39  ;;  %v3007_v31 = vrot.slane %v3006_v50, 2  ;;  %v3048_v20 = vmul.f32 %v4646_v52, %v7052_v28  ;;  %v7672_v1 = vld [vmem:[#allocation98_spill] sm:$0xff] }
 0x35a   : > { %v4650_v47 = vpop.eup %4649  ;;  %v7228_v0 = vmul.f32 %v3129_v44, %v2173_v57  ;;  %v3014_v49 = vrot.slane %v3013_v43, 2  ;;  %v3049_v30 = vmul.f32 %v4648_v23, %v7055_v62  ;;  %v2453_v12 = vmul.f32 1.442695, %v2335_v60  ;;  %v7666_v62 = vld [vmem:[#allocation87_spill] sm:$0xff]  ;;  %v2170_v60 = vpop.xlane.xlu1 %2169 }
 0x35b   : > { %v4652_v7 = vpop.eup %4651  ;;  %v3008_v56 = vadd.f32 %v3007_v31, %v3006_v50  ;;  %v3050_v33 = vmul.f32 %v4650_v47, %v7193_v63  ;;  %v3056_v27 = vadd.f32 %v3048_v20, %v7663_v45  ;;  %v2455_v58 = vmul.f32 1.442695, %v2336_v42  ;;  %v7667_v63 = vld [vmem:[#allocation71_spill] sm:$0xff] }
 0x35c   : > { %v4654_v41 = vpop.eup %4653  ;;  %v3015_v40 = vadd.f32 %v3014_v49, %v3013_v43  ;;  %v3051_v9 = vmul.f32 %v4652_v7, %v7196_v2  ;;  %v3057_v28 = vadd.f32 %v3049_v30, %v7664_v11  ;;  %4661 = vpow2.f32 %v2453_v12  ;;  %v7668_v2 = vld [vmem:[#allocation93_spill] sm:$0xff] }
 0x35d   : > { %v4656_v14 = vpop.eup %4655  ;;  %v3009_v5 = vrot.slane %v3008_v56, 1  ;;  %v3058_v29 = vadd.f32 %v3050_v33, %v7665_v16  ;;  %v3064_v13 = vmul.f32 %v3056_v27, %v7666_v62  ;;  %v3116_v4 = vmul.f32 %v4654_v41, %v3056_v27  ;;  %v7673_v43 = vld [vmem:[#allocation73_spill] sm:$0xff]  ;;  %v7674_v33 = vld [vmem:[#allocation58_spill] sm:$0xff]  ;;  %v7675_v41 = vld [vmem:[#allocation59_spill] sm:$0xff] }
 0x35e   : > { %v4658_v38 = vpop.eup %4657  ;;  %v3016_v46 = vrot.slane %v3015_v40, 1  ;;  %v3059_v24 = vadd.f32 %v3051_v9, %v7667_v63  ;;  %v3065_v39 = vmul.f32 %v3057_v28, %v7666_v62  ;;  %v3117_v36 = vmul.f32 %v4656_v14, %v3057_v28  ;;  %v7677_v63 = vld [vmem:[#allocation78_spill] sm:$0xff] }
 0x35f   : > { %v4660_v54 = vpop.eup %4659  ;;  %v3010_v53 = vadd.f32 %v3009_v5, %v3008_v56  ;;  %v3066_v15 = vmul.f32 %v3058_v29, %v7668_v2  ;;  %v3118_v35 = vmul.f32 %v4658_v38, %v3058_v29  ;;  %v3124_v34 = vadd.f32 %v3116_v4, %v7669_v51 }
 0x360   : > { %v3017_v42 = vadd.f32 %v3016_v46, %v3015_v40  ;;  %v3067_v25 = vmul.f32 %v3059_v24, %v7668_v2  ;;  %v3119_v3 = vmul.f32 %v4660_v54, %v3059_v24  ;;  %v3125_v57 = vadd.f32 %v3117_v36, %v7670_v26 }
 0x361   : > { %v3072_v32 = vadd.f32 %v3066_v15, %v3064_v13  ;;  %v3126_v22 = vadd.f32 %v3118_v35, %v7671_v8  ;;  %v3132_v50 = vmul.f32 %v3124_v34, %v7672_v1  ;;  %4663 = vpow2.f32 %v2455_v58 }
 0x362   : > { %v4662_v52 = vpop.eup %4661  ;;  %v3020_v21 = vrot.slane %v3017_v42, 7  ;;  %v3079_v44 = vadd.f32 %v3067_v25, %v3065_v39  ;;  %v3127_v23 = vadd.f32 %v3119_v3, %v7673_v43  ;;  %v3133_v31 = vmul.f32 %v3125_v57, %v7672_v1 }
 0x363   : > { %v3073_v20 = vrot.slane %v3072_v32, 4  ;;  %v3134_v47 = vmul.f32 %v3126_v22, %v2170_v60  ;;  %v2469_v49 = vmul.f32 1.442695, %v2343_v10  ;;  %v2471_v30 = vmul.f32 1.442695, %v2344_v48  ;;  %v7676_v10 = vld [vmem:[#allocation88_spill] sm:$0xff] }
 0x364   : > { %v3021_v12 = vsel %vm1747_vm6, %v3010_v53, %v3020_v21  ;;  %v3080_v7 = vrot.slane %v3079_v44, 4  ;;  %v3135_v56 = vmul.f32 %v3127_v23, %v2170_v60  ;;  %v2994_v45 = vadd.f32 %v7098_v37, %v7674_v33  ;;  %v7678_v53 = vld [vmem:[#allocation79_spill] sm:$0xff]  ;;  %v7679_v60 = vld [vmem:[#allocation90_spill] sm:$0xff] }
 0x365   : > { %3024 = vst.msk [vmem:[#allocation2 + $0x12] ss:$8 sm:$0x3] %vm6533_vm2, %v3021_v12  ;;  %v3074_v27 = vadd.f32 %v3073_v20, %v3072_v32  ;;  %v3140_v58 = vadd.f32 %v3134_v47, %v3132_v50  ;;  %4665 = vpow2.f32 %v2469_v49  ;;  %v2995_v40 = vadd.f32 %v7101_v17, %v7675_v41  ;;  %v4255_v12 = vld [vmem:[%s5515_s15 + $0x70] sm:$0xf] }
 0x366   : > { %v3081_v9 = vadd.f32 %v3080_v7, %v3079_v44  ;;  %v3147_v11 = vadd.f32 %v3135_v56, %v3133_v31  ;;  %4667 = vpow2.f32 %v2471_v30  ;;  %v3002_v48 = vmul.f32 %v2994_v45, %v7676_v10 }
 0x367   : > { %v4664_v28 = vpop.eup %4663  ;;  %v3075_v14 = vrot.slane %v3074_v27, 2  ;;  %v3141_v5 = vrot.slane %v3140_v58, 4  ;;  %v3003_v16 = vmul.f32 %v2995_v40, %v7676_v10  ;;  %v3054_v37 = vmul.f32 %v4662_v52, %v2994_v45  ;;  %v4417_v45 = vld [vmem:[%s5515_s15 + $0x74] sm:$0xf0]  ;;  %v4416_v10 = vld [vmem:[%s5515_s15 + $0x74] sm:$0xf] }
 0x368   : > { %v3082_v29 = vrot.slane %v3081_v9, 2  ;;  %v3148_v62 = vrot.slane %v3147_v11, 4  ;;  %v3026_v13 = vadd.f32 %v3002_v48, %v7180_v19  ;;  %v3055_v4 = vmul.f32 %v4664_v28, %v2995_v40  ;;  %v2176_v40 = vpop.xlane.xlu0 %2175  ;;  %v4257_v48 = vld [vmem:[%s5515_s15 + $0x78] sm:$0xf0] }
 0x369   : > { %v3076_v38 = vadd.f32 %v3075_v14, %v3074_v27  ;;  %v3142_v46 = vadd.f32 %v3141_v5, %v3140_v58  ;;  %v3033_v17 = vadd.f32 %v3003_v16, %v7184_v6  ;;  %v3062_v24 = vadd.f32 %v3054_v37, %v7677_v63  ;;  %v4433_v27 = vld [vmem:[%s5515_s15 + $0xf4] sm:$0xf0]  ;;  %v7680_v5 = vld [vmem:[#allocation83_spill] sm:$0xff] }
 0x36a   : > { %v3083_v39 = vadd.f32 %v3082_v29, %v3081_v9  ;;  %v3149_v36 = vadd.f32 %v3148_v62, %v3147_v11  ;;  %v3027_v54 = vrot.slane %v3026_v13, 4  ;;  %v3063_v2 = vadd.f32 %v3055_v4, %v7678_v53  ;;  %v7681_v37 = vld [vmem:[#allocation84_spill] sm:$0xff]  ;;  %v4432_v62 = vld [vmem:[%s5515_s15 + $0xf4] sm:$0xf]  ;;  %v4247_v4 = vld [vmem:[%s5515_s15 + $0x60] sm:$0xf] }
 0x36b   : > { %v4666_v15 = vpop.eup %4665  ;;  %v3077_v35 = vrot.slane %v3076_v38, 1  ;;  %v3143_v51 = vrot.slane %v3142_v46, 2  ;;  %v3034_v34 = vrot.slane %v3033_v17, 4  ;;  %v3070_v42 = vmul.f32 %v3062_v24, %v7679_v60 }
 0x36c   : > { %v4668_v25 = vpop.eup %4667  ;;  %v3084_v19 = vrot.slane %v3083_v39, 1  ;;  %v3150_v3 = vrot.slane %v3149_v36, 2  ;;  %v3028_v26 = vadd.f32 %v3027_v54, %v3026_v13  ;;  %v3071_v57 = vmul.f32 %v3063_v2, %v7679_v60  ;;  %v4321_v13 = vld [vmem:[%s5515_s15 + $0xf8] sm:$0xf0] }
 0x36d   : > { %v3078_v6 = vadd.f32 %v3077_v35, %v3076_v38  ;;  %v3144_v32 = vadd.f32 %v3143_v51, %v3142_v46  ;;  %v3035_v8 = vadd.f32 %v3034_v34, %v3033_v17  ;;  %v3094_v22 = vadd.f32 %v3070_v42, %v7216_v61  ;;  %v4415_v38 = vld [vmem:[%s5515_s15 + $0x64] sm:$0xf0]  ;;  %v4414_v35 = vld [vmem:[%s5515_s15 + $0x64] sm:$0xf]  ;;  %v4249_v51 = vld [vmem:[%s5515_s15 + $0x68] sm:$0xf0] }
 0x36e   : > { %v3085_v1 = vadd.f32 %v3084_v19, %v3083_v39  ;;  %v3151_v50 = vadd.f32 %v3150_v3, %v3149_v36  ;;  %v3029_v52 = vrot.slane %v3028_v26, 2  ;;  %v3101_v21 = vadd.f32 %v3071_v57, %v7219_v18  ;;  %v4319_v18 = vld [vmem:[%s5515_s15 + $0xf0] sm:$0xf]  ;;  %v4311_v39 = vld [vmem:[%s5515_s15 + $0xe0] sm:$0xf] }
 0x36f   : > { %v3145_v44 = vrot.slane %v3144_v32, 1  ;;  %v3036_v43 = vrot.slane %v3035_v8, 2  ;;  %v3095_v23 = vrot.slane %v3094_v22, 4  ;;  %v3122_v31 = vmul.f32 %v4666_v15, %v3062_v24  ;;  %v4431_v36 = vld [vmem:[%s5515_s15 + $0xe4] sm:$0xf0] }
 0x370   : > { %v3088_v20 = vrot.slane %v3085_v1, 7  ;;  %v3152_v47 = vrot.slane %v3151_v50, 1  ;;  %v3030_v49 = vadd.f32 %v3029_v52, %v3028_v26  ;;  %v3102_v30 = vrot.slane %v3101_v21, 4  ;;  %v4430_v34 = vld [vmem:[%s5515_s15 + $0xe4] sm:$0xf] }
 0x371   : > { %v3146_v61 = vadd.f32 %v3145_v44, %v3144_v32  ;;  %v3037_v7 = vadd.f32 %v3036_v43, %v3035_v8  ;;  %v3096_v56 = vadd.f32 %v3095_v23, %v3094_v22  ;;  %v3123_v33 = vmul.f32 %v4668_v25, %v3063_v2  ;;  %v4313_v3 = vld [vmem:[%s5515_s15 + $0xe8] sm:$0xf0]  ;;  %v4239_v26 = vld [vmem:[%s5515_s15 + $0x50] sm:$0xf]  ;;  %v4413_v57 = vld [vmem:[%s5515_s15 + $0x54] sm:$0xf0] }
 0x372   : > { %v3089_v58 = vsel %vm1747_vm6, %v3078_v6, %v3088_v20  ;;  %v3153_v41 = vadd.f32 %v3152_v47, %v3151_v50  ;;  %v3031_v9 = vrot.slane %v3030_v49, 1  ;;  %v3103_v11 = vadd.f32 %v3102_v30, %v3101_v21  ;;  %v4303_v44 = vld [vmem:[%s5515_s15 + $0xd0] sm:$0xf]  ;;  %v4429_v43 = vld [vmem:[%s5515_s15 + $0xd4] sm:$0xf0] }
 0x373   : > { %3092 = vst.msk [vmem:[#allocation2 + $0x14] ss:$8 sm:$0x3] %vm6533_vm2, %v3089_v58  ;;  %v3038_v28 = vrot.slane %v3037_v7, 1  ;;  %v3097_v14 = vrot.slane %v3096_v56, 2  ;;  %v3130_v16 = vadd.f32 %v3122_v31, %v7680_v5  ;;  %v3131_v29 = vadd.f32 %v3123_v33, %v7681_v37  ;;  %v7682_v23 = vld [vmem:[#allocation51_spill] sm:$0xff] }
 0x374   : > { %v3156_v46 = vrot.slane %v3153_v41, 7  ;;  %v3032_v17 = vadd.f32 %v3031_v9, %v3030_v49  ;;  %v3104_v63 = vrot.slane %v3103_v11, 2  ;;  %v4256_v24 = vor.u32 %v4417_v45, %v4255_v12  ;;  %v4412_v47 = vld [vmem:[%s5515_s15 + $0x54] sm:$0xf]  ;;  %v4305_v45 = vld [vmem:[%s5515_s15 + $0xd8] sm:$0xf0] }
 0x375   : > { %v3039_v54 = vadd.f32 %v3038_v28, %v3037_v7  ;;  %v3098_v53 = vadd.f32 %v3097_v14, %v3096_v56  ;;  %v3138_v2 = vmul.f32 %v3130_v16, %v2176_v40  ;;  %v3139_v15 = vmul.f32 %v3131_v29, %v2176_v40  ;;  %v4410_v14 = vld [vmem:[%s5515_s15 + $0x44] sm:$0xf]  ;;  %v4233_v5 = vld [vmem:[%s5515_s15 + $0x48] sm:$0xf0] }
 0x376   : > { %v3157_v60 = vsel %vm1747_vm6, %v3146_v61, %v3156_v46  ;;  %v3105_v42 = vadd.f32 %v3104_v63, %v3103_v11  ;;  %3423 = vmatpush.bf16.msrb.mxu0 %v4256_v24  ;;  %v4320_v25 = vor.u32 %v4433_v27, %v4319_v18  ;;  %v4260_v19 = vor.u32 %v4416_v10, %v4257_v48  ;;  %v4428_v61 = vld [vmem:[%s5515_s15 + $0xd4] sm:$0xf]  ;;  %v4231_v18 = vld [vmem:[%s5515_s15 + $0x40] sm:$0xf]  ;;  %v4411_v27 = vld [vmem:[%s5515_s15 + $0x44] sm:$0xf0] }
 0x377   : > { %3160 = vst.msk [vmem:[#allocation2 + $0x16] ss:$8 sm:$0x3] %vm6533_vm2, %v3157_v60  ;;  %v3042_v6 = vrot.slane %v3039_v54, 7  ;;  %v3099_v32 = vrot.slane %v3098_v53, 1  ;;  %v3162_v8 = vadd.f32 %v3138_v2, %v7225_v55  ;;  %v3169_v22 = vadd.f32 %v3139_v15, %v7228_v0  ;;  %v7683_v46 = vld [vmem:[#allocation46_spill] sm:$0xff] }
 0x378   : > { %v3106_v1 = vrot.slane %v3105_v42, 1  ;;  %3437 = vmatpush.bf16.msrb.mxu1 %v4320_v25  ;;  %3451 = vmatpush.bf16.msrb.mxu2 %v4260_v19  ;;  %v4324_v50 = vor.u32 %v4432_v62, %v4321_v13  ;;  %v4248_v52 = vor.u32 %v4415_v38, %v4247_v4  ;;  %v4312_v21 = vor.u32 %v4431_v36, %v4311_v39  ;;  %v4241_v0 = vld [vmem:[%s5515_s15 + $0x58] sm:$0xf0]  ;;  %v4295_v11 = vld [vmem:[%s5515_s15 + $0xc0] sm:$0xf] }
 0x379   : > { %4669 = vpow2.f32 %v7682_v23  ;;  %v3043_v31 = vsel %vm1747_vm6, %v3032_v17, %v3042_v6  ;;  %v3163_v20 = vrot.slane %v3162_v8, 4  ;;  %v3170_v55 = vrot.slane %v3169_v22, 4  ;;  %v4427_v10 = vld [vmem:[%s5515_s15 + $0xc4] sm:$0xf0]  ;;  %v4426_v62 = vld [vmem:[%s5515_s15 + $0xc4] sm:$0xf] }
 0x37a   : > { %3046 = vst.msk [vmem:[#allocation2 + $0x13] ss:$8 sm:$0x3] %vm6533_vm2, %v3043_v31  ;;  %v3107_v49 = vadd.f32 %v3106_v1, %v3105_v42  ;;  %3465 = vmatpush.bf16.msrb.mxu3 %v4324_v50  ;;  %3424 = vmatpush.bf16.msrb.mxu0 %v4248_v52  ;;  %v4252_v30 = vor.u32 %v4414_v35, %v4249_v51  ;;  %v4297_v13 = vld [vmem:[%s5515_s15 + $0xc8] sm:$0xf0]  ;;  %v3213_v17 = vadd.f32 1.0, %v7683_v46 }
 0x37b   : > { %v4316_v12 = vor.u32 %v4430_v34, %v4313_v3  ;;  %v3164_v7 = vadd.f32 %v3163_v20, %v3162_v8  ;;  %v3171_v56 = vadd.f32 %v3170_v55, %v3169_v22  ;;  %v4240_v33 = vor.u32 %v4413_v57, %v4239_v26  ;;  %v4223_v4 = vld [vmem:[%s5515_s15 + $0x30] sm:$0xf]  ;;  %v4409_v39 = vld [vmem:[%s5515_s15 + $0x34] sm:$0xf0]  ;;  %v4408_v25 = vld [vmem:[%s5515_s15 + $0x34] sm:$0xf] }
 0x37c   : > { %v3100_v58 = vadd.f32 %v3099_v32, %v3098_v53  ;;  %v3110_v41 = vrot.slane %v3107_v49, 7  ;;  %3438 = vmatpush.bf16.msrb.mxu1 %v4312_v21  ;;  %3452 = vmatpush.bf16.msrb.mxu2 %v4252_v30  ;;  %v4304_v40 = vor.u32 %v4429_v43, %v4303_v44  ;;  %v4244_v9 = vor.u32 %v4412_v47, %v4241_v0  ;;  %v7685_v36 = vld [vmem:[#allocation52_spill] sm:$0xff]  ;;  %v7686_v53 = vld [vmem:[#allocation53_spill] sm:$0xff]  ;;  %v4287_v51 = vld [vmem:[%s5515_s15 + $0xb0] sm:$0xf] }
 0x37d   : > { %v3165_v48 = vrot.slane %v3164_v7, 2  ;;  %v3172_v28 = vrot.slane %v3171_v56, 2  ;;  %v4308_v37 = vor.u32 %v4428_v61, %v4305_v45  ;;  %v4232_v29 = vor.u32 %v4411_v27, %v4231_v18  ;;  %v4425_v34 = vld [vmem:[%s5515_s15 + $0xb4] sm:$0xf0]  ;;  %v4225_v19 = vld [vmem:[%s5515_s15 + $0x38] sm:$0xf0] }
 0x37e   : > { %v3111_v16 = vsel %vm1747_vm6, %v3100_v58, %v3110_v41  ;;  %3466 = vmatpush.bf16.msrb.mxu3 %v4316_v12  ;;  %3425 = vmatpush.bf16.msrb.mxu0 %v4240_v33  ;;  %v3214_v54 = vadd.f32 1.0, %v7685_v36  ;;  %v3215_v2 = vadd.f32 1.0, %v7686_v53  ;;  %v4296_v15 = vor.u32 %v4427_v10, %v4295_v11  ;;  %v7327_v3 = vld [vmem:[%s888_s7] sm:$0x3]  ;;  %v4424_v32 = vld [vmem:[%s5515_s15 + $0xb4] sm:$0xf] }
 0x37f   : > { %v4670_v38 = vpop.eup %4669  ;;  %3114 = vst.msk [vmem:[#allocation2 + $0x15] ss:$8 sm:$0x3] %vm6533_vm2, %v3111_v16  ;;  %v3166_v63 = vadd.f32 %v3165_v48, %v3164_v7  ;;  %v3173_v24 = vadd.f32 %v3172_v28, %v3171_v56  ;;  %v4236_v35 = vor.u32 %v4410_v14, %v4233_v5  ;;  %v4300_v57 = vor.u32 %v4426_v62, %v4297_v13  ;;  %v4289_v22 = vld [vmem:[%s5515_s15 + $0xb8] sm:$0xf0]  ;;  %v3184_v28 = vld [vmem:[#allocation2] sm:$0xff] }
 0x380   : > { %3439 = vmatpush.bf16.msrb.mxu1 %v4304_v40  ;;  %3453 = vmatpush.bf16.msrb.mxu2 %v4244_v9  ;;  %v3216_v26 = vadd.f32 1.0, %v4670_v38  ;;  %v4224_v6 = vor.u32 %v4409_v39, %v4223_v4  ;;  %4671 = vrcp.f32 %v3213_v17  ;;  %v4215_v1 = vld [vmem:[%s5515_s15 + $0x20] sm:$0xf]  ;;  %v4407_v50 = vld [vmem:[%s5515_s15 + $0x24] sm:$0xf0]  ;;  %v4288_v52 = vor.u32 %v4425_v34, %v4287_v51  ;;  %v3185_v14 = vld [vmem:[#allocation2 + $0x8] sm:$0xff] }
 0x381   : > { %v3167_v60 = vrot.slane %v3166_v63, 1  ;;  %v3174_v42 = vrot.slane %v3173_v24, 1  ;;  %4673 = vrcp.f32 %v3214_v54  ;;  %v4228_v21 = vor.u32 %v4408_v25, %v4225_v19  ;;  %v4279_v44 = vld [vmem:[%s5515_s15 + $0xa0] sm:$0xf]  ;;  %v4423_v43 = vld [vmem:[%s5515_s15 + $0xa4] sm:$0xf0] }
 0x382   : > { %3467 = vmatpush.bf16.msrb.mxu3 %v4308_v37  ;;  %3426 = vmatpush.bf16.msrb.mxu0 %v4232_v29  ;;  %4675 = vrcp.f32 %v3215_v2  ;;  %v3189_v23 = vperm.slane %v7327_v3, 0  ;;  %v4406_v55 = vld [vmem:[%s5515_s15 + $0x24] sm:$0xf]  ;;  %v4217_v47 = vld [vmem:[%s5515_s15 + $0x28] sm:$0xf0]  ;;  %v3190_v0 = vperm.slane %v7327_v3, 1  ;;  %v4292_v49 = vor.u32 %v4424_v32, %v4289_v22 }
 0x383   : > { %v3175_v8 = vadd.f32 %v3174_v42, %v3173_v24  ;;  %v3168_v31 = vadd.f32 %v3167_v60, %v3166_v63  ;;  %4677 = vrcp.f32 %v3216_v26  ;;  %v4216_v30 = vor.u32 %v4407_v50, %v4215_v1  ;;  %v4422_v12 = vld [vmem:[%s5515_s15 + $0xa4] sm:$0xf]  ;;  %v4281_v7 = vld [vmem:[%s5515_s15 + $0xa8] sm:$0xf0]  ;;  %v4207_v56 = vld [vmem:[%s5515_s15 + $0x10] sm:$0xf] }
 0x384   : > { %3440 = vmatpush.bf16.msrb.mxu1 %v4296_v15  ;;  %3454 = vmatpush.bf16.msrb.mxu2 %v4236_v35  ;;  %v4405_v33 = vld [vmem:[%s5515_s15 + $0x14] sm:$0xf0]  ;;  %v4280_v45 = vor.u32 %v4423_v43, %v4279_v44  ;;  %v4220_v18 = vor.u32 %v4406_v55, %v4217_v47  ;;  %v4271_v27 = vld [vmem:[%s5515_s15 + $0x90] sm:$0xf]  ;;  %v4404_v40 = vld [vmem:[%s5515_s15 + $0x14] sm:$0xf]  ;;  %v4284_v10 = vor.u32 %v4422_v12, %v4281_v7 }
 0x385   : > { %v3178_v20 = vrot.slane %v3175_v8, 7  ;;  %v4421_v41 = vld [vmem:[%s5515_s15 + $0x94] sm:$0xf0]  ;;  %v4209_v9 = vld [vmem:[%s5515_s15 + $0x18] sm:$0xf0]  ;;  %v4208_v59 = vor.u32 %v4405_v33, %v4207_v56  ;;  %v7687_v16 = vld [vmem:[#allocation38_spill] sm:$0xff] }
 0x386   : > { %3468 = vmatpush.bf16.msrb.mxu3 %v4300_v57  ;;  %3427 = vmatpush.bf16.msrb.mxu0 %v4224_v6  ;;  %v4672_v58 = vpop.eup %4671  ;;  %v4420_v48 = vld [vmem:[%s5515_s15 + $0x94] sm:$0xf]  ;;  %v3193_v37 = vmul.f32 %v3189_v23, %v7687_v16  ;;  %v7688_v29 = vld [vmem:[#allocation41_spill] sm:$0xff]  ;;  %v4273_v13 = vld [vmem:[%s5515_s15 + $0x98] sm:$0xf0]  ;;  %v4272_v17 = vor.u32 %v4421_v41, %v4271_v27  ;;  %v4212_v63 = vor.u32 %v4404_v40, %v4209_v9 }
 0x387   : > { %v3179_v61 = vsel %vm1747_vm6, %v3168_v31, %v3178_v20  ;;  %v4674_v11 = vpop.eup %4673  ;;  %v3194_v62 = vmul.f32 %v3190_v0, %v7688_v29  ;;  %v4199_v4 = vld [vmem:[%s5515_s15] sm:$0xf]  ;;  %v4403_v38 = vld [vmem:[%s5515_s15 + $0x4] sm:$0xf0]  ;;  %v7689_v36 = vld [vmem:[#allocation40_spill] sm:$0xff]  ;;  %v4276_v25 = vor.u32 %v4420_v48, %v4273_v13 }
 0x388   : > { %3182 = vst.msk [vmem:[#allocation2 + $0x17] ss:$8 sm:$0x3] %vm6533_vm2, %v3179_v61  ;;  %3441 = vmatpush.bf16.msrb.mxu1 %v4288_v52  ;;  %3455 = vmatpush.bf16.msrb.mxu2 %v4228_v21  ;;  %v4676_v5 = vpop.eup %4675  ;;  %v4263_v24 = vld [vmem:[%s5515_s15 + $0x80] sm:$0xf]  ;;  %v3195_v54 = vmul.f32 %v3189_v23, %v7689_v36  ;;  %v7690_v53 = vld [vmem:[#allocation39_spill] sm:$0xff]  ;;  %v3197_v51 = vadd.f32 %v3193_v37, %v3184_v28 }
 0x389   : > { %v4678_v46 = vpop.eup %4677  ;;  %v4419_v39 = vld [vmem:[%s5515_s15 + $0x84] sm:$0xf0]  ;;  %v3196_v2 = vmul.f32 %v3190_v0, %v7690_v53  ;;  %v4402_v15 = vld [vmem:[%s5515_s15 + $0x4] sm:$0xf]  ;;  %v4201_v35 = vld [vmem:[%s5515_s15 + $0x8] sm:$0xf0]  ;;  %v3198_v34 = vadd.f32 %v3194_v62, %v3185_v14  ;;  %v4200_v19 = vor.u32 %v4403_v38, %v4199_v4 }
 0x38a   : > { %3469 = vmatpush.bf16.msrb.mxu3 %v4292_v49  ;;  %3428 = vmatpush.bf16.msrb.mxu0 %v4216_v30  ;;  %v7691_v60 = vld [vmem:[#allocation47_spill] sm:$0xff]  ;;  %v4418_v3 = vld [vmem:[%s5515_s15 + $0x84] sm:$0xf]  ;;  %v7692_v26 = vld [vmem:[#allocation48_spill] sm:$0xff]  ;;  %v4264_v1 = vor.u32 %v4419_v39, %v4263_v24  ;;  %v4204_v44 = vor.u32 %v4402_v15, %v4201_v35 }
 0x38b   : > { %v3221_v42 = vmul.f32 %v4672_v58, %v7691_v60  ;;  %v3222_v57 = vmul.f32 %v4674_v11, %v7692_v26  ;;  %v7693_v6 = vld [vmem:[#allocation49_spill] sm:$0xff]  ;;  %v7694_v8 = vld [vmem:[#allocation50_spill] sm:$0xff] }
 0x38c   : > { %3442 = vmatpush.bf16.msrb.mxu1 %v4280_v45  ;;  %3456 = vmatpush.bf16.msrb.mxu2 %v4220_v18  ;;  %v3223_v32 = vmul.f32 %v4676_v5, %v7693_v6  ;;  %v3224_v22 = vmul.f32 %v4678_v46, %v7694_v8  ;;  %v4265_v50 = vld [vmem:[%s5515_s15 + $0x88] sm:$0xf0]  ;;  %s3574_s15 = scalar_lea.hbm %s7695_s16, %s4434_s13 }
 0x38d   : > { %v3225_v31 = vmul.f32 %v3221_v42, %v3197_v51  ;;  %v3226_v20 = vmul.f32 %v3222_v57, %v3198_v34  ;;  %v4268_v55 = vor.u32 %v4418_v3, %v4265_v50  ;;  %v896_v57 = vld [vmem:[%s769_s1] sm:$0x3]  ;;  %s3577_s1 = sshll.u32 %s3574_s15, 4  ;;  %s3578_s1 = int_to_ptr.hbm [resolvable:$true] %s3577_s1 }
 0x38e   : > { %3470 = vmatpush.bf16.msrb.mxu3 %v4284_v10  ;;  %3429 = vmatpush.bf16.msrb.mxu0 %v4208_v59  ;;  %v5093_v59 = vmov 256.0   ;;  %v3538_v50 = vperm.slane %v896_v57, 1  ;;  %s5015_s22 = sshra.s32 %s3578_s1, 4  ;;  %s5016_s22 = int_to_ptr.hbm [resolvable:$true] %s5015_s22 }
 0x38f   : > { %v3186_v52 = vld [vmem:[#allocation2 + $0x10] sm:$0xff]  ;;  %v3187_v21 = vld [vmem:[#allocation2 + $0x18] sm:$0xff]  ;;  %4679 = vrcp.f32 %v5093_v59  ;;  %s5017_s26 = scalar_lea.hbm %s5016_s22, 32  ;;  %p5022_p13 = scmp.lt.s32.totalorder %s5016_s22, %s7695_s16 }
 0x390   : > { %3443 = vmatpush.bf16.msrb.mxu1 %v4272_v17  ;;  %3457 = vmatpush.bf16.msrb.mxu2 %v4212_v63  ;;  %v3199_v43 = vadd.f32 %v3195_v54, %v3186_v52  ;;  %v3200_v23 = vadd.f32 %v3196_v2, %v3187_v21  ;;  %v897_v52 = vld [vmem:[%s779_s9] sm:$0x3]  ;;  %p5018_p6 = scmp.ne.s32.totalorder %s5016_s22, %s5017_s26  ;;  %p5023_p0 = scmp.lt.s32.totalorder %s5021_s10, %s5017_s26 }
 0x392   : > { %3471 = vmatpush.bf16.msrb.mxu3 %v4276_v25  ;;  %3430 = vmatpush.bf16.msrb.mxu0 %v4200_v19  ;;  %v3227_v47 = vmul.f32 %v3223_v32, %v3199_v43  ;;  %v3228_v0 = vmul.f32 %v3224_v22, %v3200_v23  ;;  %p5019_p8 = pnand %p5018_p6, %p5214_p9  ;;  %p5024_p1 = por %p5023_p0, %p5022_p13 }
 0x394   : > { %3444 = vmatpush.bf16.msrb.mxu1 %v4264_v1  ;;  %3458 = vmatpush.bf16.msrb.mxu2 %v4204_v44  ;;  %v3229_v49 = vpack.c.bf16 %v3227_v47, %v3225_v31  ;;  %v3230_v30 = vpack.c.bf16 %v3228_v0, %v3226_v20  ;;  %v3537_v1 = vperm.slane %v896_v57, 0  ;;  %v3550_v20 = vperm.slane %v897_v52, 0  ;;  %p5020_p12 = pneg %p5019_p8 }
 0x395   : > { %v4680_v48 = vpop.eup %4679 }
 0x396   : > { %3472 = vmatpush.bf16.msrb.mxu3 %v4268_v55  ;;  %3431 = vmatmul.bf16.vlgmr.msrb.gmra.mxu0 %v3229_v49  ;;  %v3486_v28 = vmul.f32 256.0, %v4680_v48  ;;  %vm3490_vm3 = vweird.f32 %v4680_v48  ;;  %v3551_v55 = vperm.slane %v897_v52, 1  ;;  %p5025_p2 = pnand %p5024_p1, %p5020_p12 }
 0x397   : > { %3445 = vmatmul.bf16.vlgmr.msrb.gmra.mxu1 %v3230_v30  ;;  %3459 = vmatmul.bf16.vlgmr.msrb.gmra.mxu2 %v3229_v49 }
 0x398   : > { %v3487_v14 = vsub.f32 1.0, %v3486_v28 }
 0x399   : > { %3473 = vmatmul.bf16.vlgmr.msrb.gmra.mxu3 %v3230_v30  ;;  %v4689_v30 = vld [vmem:[%s5470_s30] sm:$0xff] }
 0x39a   : > { %v3488_v5 = vmul.f32 %v4680_v48, %v3487_v14 }
 0x39c   : > { %v3489_v16 = vadd.f32 %v4680_v48, %v3488_v5 }
 0x39e   : > { %v3491_v37 = vsel %vm3490_vm3, %v4680_v48, %v3489_v16 }
 0x413   : > { %v3432_v12 = vpop.f32.mrf.mxu0 }
 0x414   : > { %v3446_v61 = vpop.f32.mrf.mxu1 }
 0x415   : > { %v3447_v33 = vadd.f32 %v3446_v61, %v3432_v12  ;;  %v4690_v61 = vld [vmem:[%s5470_s30 + $0x8] sm:$0xff] }
 0x41a   : > { %v3460_v7 = vpop.f32.mrf.mxu2 }
 0x41b   : > { %v3434_v27 = vpop.f32.mrf.mxu0 }
 0x41c   : > { %v3474_v56 = vpop.f32.mrf.mxu3  ;;  %v3448_v58 = vpop.f32.mrf.mxu1 }
 0x41d   : > { %v3475_v45 = vadd.f32 %v3474_v56, %v3460_v7  ;;  %v3449_v9 = vadd.f32 %v3448_v58, %v3434_v27 }
 0x41f   : > { %v3479_v18 = vadd.f32 %v3475_v45, %v3447_v33 }
 0x421   : > { %3480 = vadd.xlane.f32.xlu1 %v3479_v18 }
 0x422   : > { %v3462_v41 = vpop.f32.mrf.mxu2 }
 0x424   : > { %v3476_v40 = vpop.f32.mrf.mxu3 }
 0x425   : > { %v3477_v11 = vadd.f32 %v3476_v40, %v3462_v41 }
 0x427   : > { %v3482_v10 = vadd.f32 %v3477_v11, %v3449_v9 }
 0x429   : > { %3483 = vadd.xlane.f32.xlu2 %v3482_v10  ;;  %v4692_v10 = vld [vmem:[%s5470_s30 + $0x18] sm:$0xff] }
 0x494   : > { %v3481_v29 = vpop.xlane.xlu1 %3480 }
 0x495   : > { %v3492_v62 = vmul.f32 %v3491_v37, %v3481_v29 }
 0x497   : > { %v3494_v13 = vsub.f32 %v3447_v33, %v3492_v62  ;;  %v3495_v4 = vsub.f32 %v3475_v45, %v3492_v62 }
 0x499   : > { %v3498_v38 = vmul.f32 %v3494_v13, %v3494_v13  ;;  %v3499_v46 = vmul.f32 %v3495_v4, %v3495_v4 }
 0x49b   : > { %v3502_v17 = vadd.f32 %v3499_v46, %v3498_v38 }
 0x49c   : > { %v3484_v63 = vpop.xlane.xlu2 %3483 }
 0x49d   : > { %v3493_v24 = vmul.f32 %v3491_v37, %v3484_v63  ;;  %3503 = vadd.xlane.f32.xlu0 %v3502_v17 }
 0x49f   : > { %v3496_v39 = vsub.f32 %v3449_v9, %v3493_v24  ;;  %v3497_v36 = vsub.f32 %v3477_v11, %v3493_v24  ;;  %v4691_v9 = vld [vmem:[%s5470_s30 + $0x10] sm:$0xff] }
 0x4a1   : > { %v3500_v54 = vmul.f32 %v3496_v39, %v3496_v39  ;;  %v3501_v53 = vmul.f32 %v3497_v36, %v3497_v36 }
 0x4a3   : > { %v3505_v2 = vadd.f32 %v3501_v53, %v3500_v54 }
 0x4a5   : > { %3506 = vadd.xlane.f32.xlu1 %v3505_v2 }
 0x510   : > { %v3504_v15 = vpop.xlane.xlu0 %3503 }
 0x511   : > { %v3508_v35 = vmul.f32 %v3504_v15, %v3491_v37 }
 0x513   : > { %v3510_v51 = vadd.f32 1e-06, %v3508_v35 }
 0x515   : > { %4681 = vrsqrt.f32 %v3510_v51  ;;  %vm3518_vm5 = vweird.f32 %v3510_v51 }
 0x518   : > { %v3507_v34 = vpop.xlane.xlu1 %3506 }
 0x519   : > { %v3509_v60 = vmul.f32 %v3507_v34, %v3491_v37 }
 0x51b   : > { %v4682_v42 = vpop.eup %4681  ;;  %v3511_v25 = vadd.f32 1e-06, %v3509_v60 }
 0x51c   : > { %v3513_v19 = vmul.f32 %v4682_v42, %v3510_v51  ;;  %vm3519_vm4 = vweird.f32 %v4682_v42 }
 0x51d   : > { %4683 = vrsqrt.f32 %v3511_v25  ;;  %vm3520_vm6 = vmor %vm3518_vm5, %vm3519_vm4  ;;  %vm3528_vm8 = vweird.f32 %v3511_v25 }
 0x51e   : > { %v3514_v3 = vmul.f32 %v4682_v42, %v3513_v19 }
 0x520   : > { %v3515_v26 = vmul.f32 0.5, %v3514_v3 }
 0x522   : > { %v3516_v6 = vsub.f32 1.5, %v3515_v26 }
 0x523   : > { %v4684_v32 = vpop.eup %4683 }
 0x524   : > { %v3517_v8 = vmul.f32 %v4682_v42, %v3516_v6  ;;  %v3523_v22 = vmul.f32 %v4684_v32, %v3511_v25  ;;  %vm3529_vm7 = vweird.f32 %v4684_v32 }
 0x525   : > { %vm3530_vm9 = vmor %vm3528_vm8, %vm3529_vm7 }
 0x526   : > { %v3521_v21 = vsel %vm3520_vm6, %v4682_v42, %v3517_v8  ;;  %v3524_v44 = vmul.f32 %v4684_v32, %v3523_v22 }
 0x527   : > { %v3532_v43 = vmul.f32 %v3521_v21, %v3494_v13  ;;  %v3533_v23 = vmul.f32 %v3521_v21, %v3495_v4 }
 0x528   : > { %v3525_v31 = vmul.f32 0.5, %v3524_v44 }
 0x529   : > { %v3541_v47 = vmul.f32 %v3537_v1, %v3532_v43  ;;  %v3542_v0 = vmul.f32 %v3538_v50, %v3533_v23 }
 0x52a   : > { %v3526_v49 = vsub.f32 1.5, %v3525_v31 }
 0x52b   : > { %v3545_v12 = vadd.f32 %v4689_v30, %v3541_v47  ;;  %v3546_v7 = vadd.f32 %v4690_v61, %v3542_v0 }
 0x52c   : > { %v3527_v56 = vmul.f32 %v4684_v32, %v3526_v49 }
 0x52d   : > { %v3554_v33 = vadd.f32 %v3550_v20, %v3545_v12  ;;  %v3555_v45 = vadd.f32 %v3551_v55, %v3546_v7 }
 0x52e   : > { %v3531_v18 = vsel %vm3530_vm9, %v4684_v32, %v3527_v56 }
 0x52f   : > { %3558 = vst [vmem:[%s880_s21] sm:$0xff] %v3554_v33  ;;  %v3534_v27 = vmul.f32 %v3531_v18, %v3496_v39  ;;  %v3535_v58 = vmul.f32 %v3531_v18, %v3497_v36 }
 0x530   : > { %3559 = vst [vmem:[%s880_s21 + $0x8] sm:$0xff] %v3555_v45 }
 0x531   : > { %v3543_v41 = vmul.f32 %v3537_v1, %v3534_v27  ;;  %v3544_v40 = vmul.f32 %v3538_v50, %v3535_v58 }
 0x533   : > { %v3547_v11 = vadd.f32 %v4691_v9, %v3543_v41  ;;  %v3548_v59 = vadd.f32 %v4692_v10, %v3544_v40 }
 0x535   : > { %v3556_v48 = vadd.f32 %v3550_v20, %v3547_v11  ;;  %v3557_v28 = vadd.f32 %v3551_v55, %v3548_v59 }
 0x537   : > { %3560 = vst [vmem:[%s880_s21 + $0x10] sm:$0xff] %v3556_v48 }
 0x538   : > { %3561 = vst [vmem:[%s880_s21 + $0x18] sm:$0xff] %v3557_v28 }
 0x539   : > { %5028 = shalt.err (!%p5025_p2)
}
 0x53a   : > { %s5094_s17 = smov 256   ;;  %s5095_s6 = smov 16  }
 0x53b   : > { %4457 = dma.vmem_to_hbm [thread:$0]  (%p5214_p9), %s3576_s18, 512, %s3578_s1, %s3563_s19, %s5094_s17, %s5094_s17, %s5095_s6  }
 0x53c PF: > { %s7697_s5 = sld [smem:[#allocation29_spill]]  ;;  %p4460_p3 = pnand %p3892_p11, %p5218_p10 }
 0x53e   : > { %p4461_p4 = pneg %p4460_p3 }
 0x542   : > { %s3592_s7 = sand.u32 1, %s7697_s5  }
 0x543   : > { %s3593_s9 = scalar_lea.sflag [#allocation5], %s3592_s7 }
 0x544   : > { %5070 = dma.done.wait (%p4461_p4), %s3593_s9, 512  }
 0x545   : > { %5072 = vsyncadd (%p4461_p4), %s3593_s9, 4294966784  ;;  %s7699_s28 = sld [smem:[#allocation33_spill]] }
 0x546   : > { %s7700_s25 = sld [smem:[#allocation30_spill]] }
 0x547   : > { %s7701_s26 = sld [smem:[#allocation31_spill]] }
 0x548   : > { %s7702_s27 = sld [smem:[#allocation34_spill]] }
 0x54b   : > { %p41_p7 = scmp.ge.s32.totalorder %s7699_s28, 4  }
 0x54d   :  { %43 = sbr.rel (!%p41_p7) target bundleno = 26 (0x1a), region = 261 }
 0x552   :  { %3599 = vsyncpa [#allocation4], 1 }
 0x553   :  { %3601 = vsyncpa [#allocation4 + $0x1], 1 }
 0x554   :  { %3602 = vsyncpa [#allocation7], 1 }
 0x555   :  { %3604 = vsyncpa [#allocation7 + $0x1], 1 }
 0x556   :  { %3605 = vsyncpa [#allocation10], 1 }
 0x557   :  { %3607 = vsyncpa [#allocation10 + $0x1], 1 }
 0x558   :  { %3608 = vsyncpa [#allocation13], 1 }
 0x559   :  { %3610 = vsyncpa [#allocation13 + $0x1], 1 }
 0x55a   :  { %3611 = vsyncpa [#allocation16], 1 }
 0x55b   :  { %3613 = vsyncpa [#allocation16 + $0x1], 1 }
 0x55c   :  { %3614 = vsyncpa [#allocation19], 1 }
 0x55d   :  { %3616 = vsyncpa [#allocation19 + $0x1], 1 }
 0x55e   :  { %3617 = vsyncpa [#allocation5], 1 }
 0x55f   :  { %3619 = vsyncpa [#allocation5 + $0x1], 1 }

</bundles_post_ra>
